<compile_context>
chip_gen: v6e
topology: v6e:2x2x1
jax: 0.10.0
libtpu: 0.0.40
codegen_flags: <defaults>
</compile_context>

<pallas_src>
import functools

import jax
import jax.numpy as jnp
from jax.experimental import pallas as pl
from jax.experimental.pallas import tpu as pltpu

LANE = 128


def _bilinear_matrix(n_in, factor):
    """(n_out, n_in) interpolation matrix matching PyTorch bilinear,
    align_corners=False (half-pixel centers, source coord clamped at 0)."""
    n_out = n_in * factor
    out_idx = jnp.arange(n_out, dtype=jnp.float32)
    src = (out_idx + 0.5) / float(factor) - 0.5
    src = jnp.maximum(src, 0.0)
    i0 = jnp.clip(jnp.floor(src).astype(jnp.int32), 0, n_in - 1)
    i1 = jnp.clip(i0 + 1, 0, n_in - 1)
    w1 = src - i0.astype(jnp.float32)
    w0 = 1.0 - w1
    rows = jnp.arange(n_out)
    a = jnp.zeros((n_out, n_in), jnp.float32)
    a = a.at[rows, i0].add(w0)
    a = a.at[rows, i1].add(w1)
    return a


def decoder_kernel(x_ref, w1_ref, b1_ref, ah_ref, g_ref, b2_ref, out_ref, *,
                   Bt, H, W, Ep, Ho, Wo, Cp):
    M1 = Bt * H * W

    # ---- Conv2d(E,E,3,pad=1) + ReLU: 9 accumulated matmuls --------------
    # x_ref block: (Bt, H+2, W+2, Ep), spatially + channel zero-padded in the
    # wrapper, so each tap slice is a pure sublane-offset window with a full
    # 128-lane minor dim.
    acc1 = jnp.zeros((M1, Ep), jnp.float32)
    for dy in range(3):
        for dx in range(3):
            sl = x_ref[:, dy:dy + H, dx:dx + W, :]          # (Bt, H, W, Ep)
            acc1 = acc1 + jnp.dot(sl.reshape(M1, Ep),
                                  w1_ref[3 * dy + dx],
                                  preferred_element_type=jnp.float32)
    y1 = jnp.maximum(acc1 + b1_ref[...], 0.0)               # (Bt*H*W, Ep)

    # ---- H-direction bilinear upsample (separable), zero-pad rows folded
    # into ah_pad: one small block-diagonal matmul over the Bt images.
    y1r = y1.reshape(Bt * H, W * Ep)                         # (Bt*H, W*Ep)
    u1p = jnp.dot(ah_ref[...], y1r,
                  preferred_element_type=jnp.float32)        # (Bt*(Ho+2), W*Ep)
    u1p = u1p.reshape(Bt, Ho + 2, W * Ep)

    # ---- Fused W-upsample + Conv2d(E,C,3,pad=1): 3 accumulated matmuls ----
    # G_dy already contains the W-upsample weights, the dx taps of conv2 and
    # the W-direction zero padding; only the dy shift remains as a slice.
    acc2 = jnp.zeros((Bt * Ho, Wo * Cp), jnp.float32)
    for dy in range(3):
        lhs = u1p[:, dy:dy + Ho, :].reshape(Bt * Ho, W * Ep)
        acc2 = acc2 + jnp.dot(lhs, g_ref[dy],
                              preferred_element_type=jnp.float32)

    # Single lane-dense store: last dim Wo*Cp is a multiple of 128.
    out_ref[...] = (acc2 + b2_ref[...]).reshape(Bt, Ho, Wo * Cp)


def decoder_forward(x, params, grid_size, upsample_factor, *, bt=None):
    H, W = grid_size
    B, N, E = x.shape
    assert N == H * W
    C = params["w2"].shape[-1]
    Ho, Wo = H * upsample_factor, W * upsample_factor

    # Padded channel widths: Ep = lane-tile multiple; Cp chosen so the output
    # last dim Wo*Cp is a multiple of 128 (lane-dense unmasked stores).
    Ep = ((E + LANE - 1) // LANE) * LANE
    Cp = C
    while (Wo * Cp) % LANE != 0:
        Cp += 1

    # Batch tile: largest divisor of B with Bt*H*W <= 256 (fills MXU M on
    # v6e/v7x; M=128 already saturates v5e's 128x128 MXU).
    if bt is None:
        bt = 1
        for d in range(1, B + 1):
            if B % d == 0 and d * H * W <= 256:
                bt = d
    assert B % bt == 0

    # ---- Input: NHWC image, spatial 1-px zero border + channel pad to Ep.
    img = x.reshape(B, H, W, E).astype(jnp.float32)
    img = jnp.pad(img, ((0, 0), (1, 1), (1, 1), (0, Ep - E)))   # (B,H+2,W+2,Ep)

    # ---- Conv1 weights: per-tap (Ep, Ep), zero-padded channels.
    w1 = params["w1"].astype(jnp.float32)                        # (3,3,E,E)
    w1p = jnp.zeros((3, 3, Ep, Ep), jnp.float32).at[:, :, :E, :E].set(w1)
    w1p = w1p.reshape(9, Ep, Ep)
    b1p = jnp.zeros((1, Ep), jnp.float32).at[0, :E].set(
        params["b1"].astype(jnp.float32))

    # ---- Separable bilinear matrices with the conv2 zero-padding folded in.
    ah = _bilinear_matrix(H, upsample_factor)                    # (Ho, H)
    aw = _bilinear_matrix(W, upsample_factor)                    # (Wo, W)
    ah_pad = jnp.pad(ah, ((1, 1), (0, 0)))                       # (Ho+2, H)
    aw_pad = jnp.pad(aw, ((1, 1), (0, 0)))                       # (Wo+2, W)
    ah_blk = jnp.kron(jnp.eye(bt, dtype=jnp.float32), ah_pad)    # (bt*(Ho+2), bt*H)

    # ---- Fused W-upsample + conv2 weights:
    # G[dy, w*Ep+e, p*Cp+c] = sum_dx aw_pad[p+dx, w] * w2[dy, dx, e, c]
    w2 = params["w2"].astype(jnp.float32)                        # (3,3,E,C)
    w2p = jnp.zeros((3, 3, Ep, Cp), jnp.float32).at[:, :, :E, :C].set(w2)
    aw_sh = jnp.stack([aw_pad[dx:dx + Wo, :] for dx in range(3)], axis=0)  # (3,Wo,W)
    g = jnp.einsum("xpw,yxec->ywepc", aw_sh, w2p).reshape(3, W * Ep, Wo * Cp)
    b2p = jnp.zeros((Cp,), jnp.float32).at[:C].set(params["b2"].astype(jnp.float32))
    b2row = jnp.tile(b2p, Wo).reshape(1, Wo * Cp)

    kernel = functools.partial(decoder_kernel, Bt=bt, H=H, W=W, Ep=Ep,
                               Ho=Ho, Wo=Wo, Cp=Cp)

    out = pl.pallas_call(
        kernel,
        out_shape=jax.ShapeDtypeStruct((B, Ho, Wo * Cp), jnp.float32),
        grid_spec=pltpu.PrefetchScalarGridSpec(
            num_scalar_prefetch=0,
            grid=(B // bt,),
            in_specs=[
                pl.BlockSpec((bt, H + 2, W + 2, Ep), lambda b: (b, 0, 0, 0)),
                pl.BlockSpec((9, Ep, Ep), lambda b: (0, 0, 0)),
                pl.BlockSpec((1, Ep), lambda b: (0, 0)),
                pl.BlockSpec((bt * (Ho + 2), bt * H), lambda b: (0, 0)),
                pl.BlockSpec((3, W * Ep, Wo * Cp), lambda b: (0, 0, 0)),
                pl.BlockSpec((1, Wo * Cp), lambda b: (0, 0)),
            ],
            out_specs=pl.BlockSpec((bt, Ho, Wo * Cp), lambda b: (b, 0, 0)),
        ),
        compiler_params=pltpu.CompilerParams(
            dimension_semantics=("parallel",),
            vmem_limit_bytes=32 * 1024 * 1024),
    )(img, w1p, b1p, ah_blk, g, b2row)

    # Strip the small channel padding and produce PyTorch's NCHW layout.
    out = out.reshape(B, Ho, Wo, Cp)[..., :C]
    return jnp.transpose(out, (0, 3, 1, 2))


def decoder_reference(x, params, grid_size, upsample_factor):
    """Pure-JAX reference (XLA convs + separable bilinear) for correctness."""
    H, W = grid_size
    B, N, E = x.shape
    C = params["w2"].shape[-1]
    img = x.reshape(B, H, W, E).astype(jnp.float32)
    hi = jax.lax.Precision.HIGHEST
    y = jax.lax.conv_general_dilated(
        img, params["w1"], (1, 1), "SAME",
        dimension_numbers=("NHWC", "HWIO", "NHWC"),
        precision=hi) + params["b1"].reshape(1, 1, 1, E)
    y = jnp.maximum(y, 0.0)
    ah = _bilinear_matrix(H, upsample_factor)
    aw = _bilinear_matrix(W, upsample_factor)
    y = jnp.einsum("oh,bhwe->bowe", ah, y, precision=hi)
    y = jnp.einsum("pw,bowe->bope", aw, y, precision=hi)
    y = jax.lax.conv_general_dilated(
        y, params["w2"], (1, 1), "SAME",
        dimension_numbers=("NHWC", "HWIO", "NHWC"),
        precision=hi) + params["b2"].reshape(1, 1, 1, C)
    return jnp.transpose(y, (0, 3, 1, 2))


if __name__ == "__main__":
    B, H, W = 2, 8, 8
    embed_dim, out_channels, upsample_factor = 32, 4, 2

    key = jax.random.PRNGKey(0)
    k1, k2, k3, k4, kx = jax.random.split(key, 5)
    params = {
        "w1": 0.1 * jax.random.normal(k1, (3, 3, embed_dim, embed_dim), jnp.float32),
        "b1": 0.05 * jax.random.normal(k2, (embed_dim,), jnp.float32),
        "w2": 0.1 * jax.random.normal(k3, (3, 3, embed_dim, out_channels), jnp.float32),
        "b2": 0.05 * jax.random.normal(k4, (out_channels,), jnp.float32),
    }
    x = jax.random.normal(kx, (B, H * W, embed_dim), jnp.float32)

    out = decoder_forward(x, params, (H, W), upsample_factor)
    out = jax.block_until_ready(out)
    assert out.shape == (B, out_channels, H * upsample_factor, W * upsample_factor)

    ref = decoder_reference(x, params, (H, W), upsample_factor)
    max_err = float(jnp.max(jnp.abs(out - ref)))
    if max_err > 2e-3:
        raise AssertionError(f"mismatch vs reference, max abs err = {max_err}")
    print("KERNEL_OK")
</pallas_src>

<mosaic_0001>
module attributes {stable_mosaic.version = 11 : i64} {
  func.func @decoder_kernel(%arg0: i32, %arg1: memref<2x10x10x128xf32, #tpu.memory_space<vmem>>, %arg2: memref<9x128x128xf32, #tpu.memory_space<vmem>>, %arg3: memref<1x128xf32, #tpu.memory_space<vmem>>, %arg4: memref<36x16xf32, #tpu.memory_space<vmem>>, %arg5: memref<3x1024x128xf32, #tpu.memory_space<vmem>>, %arg6: memref<1x128xf32, #tpu.memory_space<vmem>>, %arg7: memref<2x16x128xf32, #tpu.memory_space<vmem>>) attributes {dimension_semantics = [#tpu.dimension_semantics<parallel>], iteration_bounds = array<i64: 1>, scalar_prefetch = 0 : i64, scratch_operands = 0 : i64, tpu.core_type = #tpu.core_type<tc>, window_params = [{transform_indices = @transform_0, window_bounds = array<i64: 2, 10, 10, 128>}, {pipeline_mode = #tpu.pipeline_mode<synchronous>, transform_indices = @transform_1, window_bounds = array<i64: 9, 128, 128>}, {pipeline_mode = #tpu.pipeline_mode<synchronous>, transform_indices = @transform_2, window_bounds = array<i64: 1, 128>}, {pipeline_mode = #tpu.pipeline_mode<synchronous>, transform_indices = @transform_3, window_bounds = array<i64: 36, 16>}, {pipeline_mode = #tpu.pipeline_mode<synchronous>, transform_indices = @transform_4, window_bounds = array<i64: 3, 1024, 128>}, {pipeline_mode = #tpu.pipeline_mode<synchronous>, transform_indices = @transform_5, window_bounds = array<i64: 1, 128>}, {transform_indices = @transform_6, window_bounds = array<i64: 2, 16, 128>}]} {
    %cst = arith.constant 0.000000e+00 : f32
    %0 = vector.broadcast %cst : f32 to vector<128x128xf32>
    %c0 = arith.constant 0 : index
    %c0_0 = arith.constant 0 : index
    %c0_1 = arith.constant 0 : index
    %c0_2 = arith.constant 0 : index
    %1 = vector.load %arg1[%c0, %c0_0, %c0_1, %c0_2] : memref<2x10x10x128xf32, #tpu.memory_space<vmem>>, vector<2x8x8x128xf32>
    %2 = vector.shape_cast %1 : vector<2x8x8x128xf32> to vector<128x128xf32>
    %c0_3 = arith.constant 0 : index
    %c0_4 = arith.constant 0 : index
    %c0_5 = arith.constant 0 : index
    %3 = vector.load %arg2[%c0_3, %c0_4, %c0_5] : memref<9x128x128xf32, #tpu.memory_space<vmem>>, vector<1x128x128xf32>
    %4 = vector.shape_cast %3 : vector<1x128x128xf32> to vector<128x128xf32>
    %cst_6 = arith.constant dense<0.000000e+00> : vector<128x128xf32>
    %5 = tpu.matmul %2, %4, %cst_6 {dimension_numbers = #tpu.dot_dimension_numbers<[1], [0], [0], [1], [0, 0, 1, 1], [], []>} : vector<128x128xf32>, vector<128x128xf32>, vector<128x128xf32> -> vector<128x128xf32>
    %6 = arith.addf %0, %5 : vector<128x128xf32>
    %c0_7 = arith.constant 0 : index
    %c0_8 = arith.constant 0 : index
    %c1 = arith.constant 1 : index
    %c0_9 = arith.constant 0 : index
    %7 = vector.load %arg1[%c0_7, %c0_8, %c1, %c0_9] : memref<2x10x10x128xf32, #tpu.memory_space<vmem>>, vector<2x8x8x128xf32>
    %8 = vector.shape_cast %7 : vector<2x8x8x128xf32> to vector<128x128xf32>
    %c1_10 = arith.constant 1 : index
    %c0_11 = arith.constant 0 : index
    %c0_12 = arith.constant 0 : index
    %9 = vector.load %arg2[%c1_10, %c0_11, %c0_12] : memref<9x128x128xf32, #tpu.memory_space<vmem>>, vector<1x128x128xf32>
    %10 = vector.shape_cast %9 : vector<1x128x128xf32> to vector<128x128xf32>
    %cst_13 = arith.constant dense<0.000000e+00> : vector<128x128xf32>
    %11 = tpu.matmul %8, %10, %cst_13 {dimension_numbers = #tpu.dot_dimension_numbers<[1], [0], [0], [1], [0, 0, 1, 1], [], []>} : vector<128x128xf32>, vector<128x128xf32>, vector<128x128xf32> -> vector<128x128xf32>
    %12 = arith.addf %6, %11 : vector<128x128xf32>
    %c0_14 = arith.constant 0 : index
    %c0_15 = arith.constant 0 : index
    %c2 = arith.constant 2 : index
    %c0_16 = arith.constant 0 : index
    %13 = vector.load %arg1[%c0_14, %c0_15, %c2, %c0_16] : memref<2x10x10x128xf32, #tpu.memory_space<vmem>>, vector<2x8x8x128xf32>
    %14 = vector.shape_cast %13 : vector<2x8x8x128xf32> to vector<128x128xf32>
    %c2_17 = arith.constant 2 : index
    %c0_18 = arith.constant 0 : index
    %c0_19 = arith.constant 0 : index
    %15 = vector.load %arg2[%c2_17, %c0_18, %c0_19] : memref<9x128x128xf32, #tpu.memory_space<vmem>>, vector<1x128x128xf32>
    %16 = vector.shape_cast %15 : vector<1x128x128xf32> to vector<128x128xf32>
    %cst_20 = arith.constant dense<0.000000e+00> : vector<128x128xf32>
    %17 = tpu.matmul %14, %16, %cst_20 {dimension_numbers = #tpu.dot_dimension_numbers<[1], [0], [0], [1], [0, 0, 1, 1], [], []>} : vector<128x128xf32>, vector<128x128xf32>, vector<128x128xf32> -> vector<128x128xf32>
    %18 = arith.addf %12, %17 : vector<128x128xf32>
    %c0_21 = arith.constant 0 : index
    %c1_22 = arith.constant 1 : index
    %c0_23 = arith.constant 0 : index
    %c0_24 = arith.constant 0 : index
    %19 = vector.load %arg1[%c0_21, %c1_22, %c0_23, %c0_24] : memref<2x10x10x128xf32, #tpu.memory_space<vmem>>, vector<2x8x8x128xf32>
    %20 = vector.shape_cast %19 : vector<2x8x8x128xf32> to vector<128x128xf32>
    %c3 = arith.constant 3 : index
    %c0_25 = arith.constant 0 : index
    %c0_26 = arith.constant 0 : index
    %21 = vector.load %arg2[%c3, %c0_25, %c0_26] : memref<9x128x128xf32, #tpu.memory_space<vmem>>, vector<1x128x128xf32>
    %22 = vector.shape_cast %21 : vector<1x128x128xf32> to vector<128x128xf32>
    %cst_27 = arith.constant dense<0.000000e+00> : vector<128x128xf32>
    %23 = tpu.matmul %20, %22, %cst_27 {dimension_numbers = #tpu.dot_dimension_numbers<[1], [0], [0], [1], [0, 0, 1, 1], [], []>} : vector<128x128xf32>, vector<128x128xf32>, vector<128x128xf32> -> vector<128x128xf32>
    %24 = arith.addf %18, %23 : vector<128x128xf32>
    %c0_28 = arith.constant 0 : index
    %c1_29 = arith.constant 1 : index
    %c1_30 = arith.constant 1 : index
    %c0_31 = arith.constant 0 : index
    %25 = vector.load %arg1[%c0_28, %c1_29, %c1_30, %c0_31] : memref<2x10x10x128xf32, #tpu.memory_space<vmem>>, vector<2x8x8x128xf32>
    %26 = vector.shape_cast %25 : vector<2x8x8x128xf32> to vector<128x128xf32>
    %c4 = arith.constant 4 : index
    %c0_32 = arith.constant 0 : index
    %c0_33 = arith.constant 0 : index
    %27 = vector.load %arg2[%c4, %c0_32, %c0_33] : memref<9x128x128xf32, #tpu.memory_space<vmem>>, vector<1x128x128xf32>
    %28 = vector.shape_cast %27 : vector<1x128x128xf32> to vector<128x128xf32>
    %cst_34 = arith.constant dense<0.000000e+00> : vector<128x128xf32>
    %29 = tpu.matmul %26, %28, %cst_34 {dimension_numbers = #tpu.dot_dimension_numbers<[1], [0], [0], [1], [0, 0, 1, 1], [], []>} : vector<128x128xf32>, vector<128x128xf32>, vector<128x128xf32> -> vector<128x128xf32>
    %30 = arith.addf %24, %29 : vector<128x128xf32>
    %c0_35 = arith.constant 0 : index
    %c1_36 = arith.constant 1 : index
    %c2_37 = arith.constant 2 : index
    %c0_38 = arith.constant 0 : index
    %31 = vector.load %arg1[%c0_35, %c1_36, %c2_37, %c0_38] : memref<2x10x10x128xf32, #tpu.memory_space<vmem>>, vector<2x8x8x128xf32>
    %32 = vector.shape_cast %31 : vector<2x8x8x128xf32> to vector<128x128xf32>
    %c5 = arith.constant 5 : index
    %c0_39 = arith.constant 0 : index
    %c0_40 = arith.constant 0 : index
    %33 = vector.load %arg2[%c5, %c0_39, %c0_40] : memref<9x128x128xf32, #tpu.memory_space<vmem>>, vector<1x128x128xf32>
    %34 = vector.shape_cast %33 : vector<1x128x128xf32> to vector<128x128xf32>
    %cst_41 = arith.constant dense<0.000000e+00> : vector<128x128xf32>
    %35 = tpu.matmul %32, %34, %cst_41 {dimension_numbers = #tpu.dot_dimension_numbers<[1], [0], [0], [1], [0, 0, 1, 1], [], []>} : vector<128x128xf32>, vector<128x128xf32>, vector<128x128xf32> -> vector<128x128xf32>
    %36 = arith.addf %30, %35 : vector<128x128xf32>
    %c0_42 = arith.constant 0 : index
    %c2_43 = arith.constant 2 : index
    %c0_44 = arith.constant 0 : index
    %c0_45 = arith.constant 0 : index
    %37 = vector.load %arg1[%c0_42, %c2_43, %c0_44, %c0_45] : memref<2x10x10x128xf32, #tpu.memory_space<vmem>>, vector<2x8x8x128xf32>
    %38 = vector.shape_cast %37 : vector<2x8x8x128xf32> to vector<128x128xf32>
    %c6 = arith.constant 6 : index
    %c0_46 = arith.constant 0 : index
    %c0_47 = arith.constant 0 : index
    %39 = vector.load %arg2[%c6, %c0_46, %c0_47] : memref<9x128x128xf32, #tpu.memory_space<vmem>>, vector<1x128x128xf32>
    %40 = vector.shape_cast %39 : vector<1x128x128xf32> to vector<128x128xf32>
    %cst_48 = arith.constant dense<0.000000e+00> : vector<128x128xf32>
    %41 = tpu.matmul %38, %40, %cst_48 {dimension_numbers = #tpu.dot_dimension_numbers<[1], [0], [0], [1], [0, 0, 1, 1], [], []>} : vector<128x128xf32>, vector<128x128xf32>, vector<128x128xf32> -> vector<128x128xf32>
    %42 = arith.addf %36, %41 : vector<128x128xf32>
    %c0_49 = arith.constant 0 : index
    %c2_50 = arith.constant 2 : index
    %c1_51 = arith.constant 1 : index
    %c0_52 = arith.constant 0 : index
    %43 = vector.load %arg1[%c0_49, %c2_50, %c1_51, %c0_52] : memref<2x10x10x128xf32, #tpu.memory_space<vmem>>, vector<2x8x8x128xf32>
    %44 = vector.shape_cast %43 : vector<2x8x8x128xf32> to vector<128x128xf32>
    %c7 = arith.constant 7 : index
    %c0_53 = arith.constant 0 : index
    %c0_54 = arith.constant 0 : index
    %45 = vector.load %arg2[%c7, %c0_53, %c0_54] : memref<9x128x128xf32, #tpu.memory_space<vmem>>, vector<1x128x128xf32>
    %46 = vector.shape_cast %45 : vector<1x128x128xf32> to vector<128x128xf32>
    %cst_55 = arith.constant dense<0.000000e+00> : vector<128x128xf32>
    %47 = tpu.matmul %44, %46, %cst_55 {dimension_numbers = #tpu.dot_dimension_numbers<[1], [0], [0], [1], [0, 0, 1, 1], [], []>} : vector<128x128xf32>, vector<128x128xf32>, vector<128x128xf32> -> vector<128x128xf32>
    %48 = arith.addf %42, %47 : vector<128x128xf32>
    %c0_56 = arith.constant 0 : index
    %c2_57 = arith.constant 2 : index
    %c2_58 = arith.constant 2 : index
    %c0_59 = arith.constant 0 : index
    %49 = vector.load %arg1[%c0_56, %c2_57, %c2_58, %c0_59] : memref<2x10x10x128xf32, #tpu.memory_space<vmem>>, vector<2x8x8x128xf32>
    %50 = vector.shape_cast %49 : vector<2x8x8x128xf32> to vector<128x128xf32>
    %c8 = arith.constant 8 : index
    %c0_60 = arith.constant 0 : index
    %c0_61 = arith.constant 0 : index
    %51 = vector.load %arg2[%c8, %c0_60, %c0_61] : memref<9x128x128xf32, #tpu.memory_space<vmem>>, vector<1x128x128xf32>
    %52 = vector.shape_cast %51 : vector<1x128x128xf32> to vector<128x128xf32>
    %cst_62 = arith.constant dense<0.000000e+00> : vector<128x128xf32>
    %53 = tpu.matmul %50, %52, %cst_62 {dimension_numbers = #tpu.dot_dimension_numbers<[1], [0], [0], [1], [0, 0, 1, 1], [], []>} : vector<128x128xf32>, vector<128x128xf32>, vector<128x128xf32> -> vector<128x128xf32>
    %54 = arith.addf %48, %53 : vector<128x128xf32>
    %c0_63 = arith.constant 0 : index
    %c0_64 = arith.constant 0 : index
    %55 = vector.load %arg3[%c0_63, %c0_64] : memref<1x128xf32, #tpu.memory_space<vmem>>, vector<1x128xf32>
    %56 = vector.broadcast %55 : vector<1x128xf32> to vector<128x128xf32>
    %57 = arith.addf %54, %56 : vector<128x128xf32>
    %cst_65 = arith.constant 0.000000e+00 : f32
    %58 = vector.broadcast %cst_65 : f32 to vector<128x128xf32>
    %59 = arith.maximumf %57, %58 : vector<128x128xf32>
    %60 = vector.shape_cast %59 : vector<128x128xf32> to vector<16x1024xf32>
    %c0_66 = arith.constant 0 : index
    %c0_67 = arith.constant 0 : index
    %61 = vector.load %arg4[%c0_66, %c0_67] : memref<36x16xf32, #tpu.memory_space<vmem>>, vector<36x16xf32>
    %cst_68 = arith.constant dense<0.000000e+00> : vector<36x1024xf32>
    %62 = tpu.matmul %61, %60, %cst_68 {dimension_numbers = #tpu.dot_dimension_numbers<[1], [0], [0], [1], [0, 0, 1, 1], [], []>} : vector<36x16xf32>, vector<16x1024xf32>, vector<36x1024xf32> -> vector<36x1024xf32>
    %63 = vector.shape_cast %62 : vector<36x1024xf32> to vector<2x18x1024xf32>
    %cst_69 = arith.constant 0.000000e+00 : f32
    %64 = vector.broadcast %cst_69 : f32 to vector<32x128xf32>
    %65 = vector.extract_strided_slice %63 {offsets = [0, 0, 0], sizes = [2, 16, 1024], strides = [1, 1, 1]} : vector<2x18x1024xf32> to vector<2x16x1024xf32>
    %66 = vector.shape_cast %65 : vector<2x16x1024xf32> to vector<32x1024xf32>
    %c0_70 = arith.constant 0 : index
    %c0_71 = arith.constant 0 : index
    %c0_72 = arith.constant 0 : index
    %67 = vector.load %arg5[%c0_70, %c0_71, %c0_72] : memref<3x1024x128xf32, #tpu.memory_space<vmem>>, vector<1x1024x128xf32>
    %68 = vector.shape_cast %67 : vector<1x1024x128xf32> to vector<1024x128xf32>
    %cst_73 = arith.constant dense<0.000000e+00> : vector<32x128xf32>
    %69 = tpu.matmul %66, %68, %cst_73 {dimension_numbers = #tpu.dot_dimension_numbers<[1], [0], [0], [1], [0, 0, 1, 1], [], []>} : vector<32x1024xf32>, vector<1024x128xf32>, vector<32x128xf32> -> vector<32x128xf32>
    %70 = arith.addf %64, %69 : vector<32x128xf32>
    %71 = vector.extract_strided_slice %63 {offsets = [0, 1, 0], sizes = [2, 16, 1024], strides = [1, 1, 1]} : vector<2x18x1024xf32> to vector<2x16x1024xf32>
    %72 = vector.shape_cast %71 : vector<2x16x1024xf32> to vector<32x1024xf32>
    %c1_74 = arith.constant 1 : index
    %c0_75 = arith.constant 0 : index
    %c0_76 = arith.constant 0 : index
    %73 = vector.load %arg5[%c1_74, %c0_75, %c0_76] : memref<3x1024x128xf32, #tpu.memory_space<vmem>>, vector<1x1024x128xf32>
    %74 = vector.shape_cast %73 : vector<1x1024x128xf32> to vector<1024x128xf32>
    %cst_77 = arith.constant dense<0.000000e+00> : vector<32x128xf32>
    %75 = tpu.matmul %72, %74, %cst_77 {dimension_numbers = #tpu.dot_dimension_numbers<[1], [0], [0], [1], [0, 0, 1, 1], [], []>} : vector<32x1024xf32>, vector<1024x128xf32>, vector<32x128xf32> -> vector<32x128xf32>
    %76 = arith.addf %70, %75 : vector<32x128xf32>
    %77 = vector.extract_strided_slice %63 {offsets = [0, 2, 0], sizes = [2, 16, 1024], strides = [1, 1, 1]} : vector<2x18x1024xf32> to vector<2x16x1024xf32>
    %78 = vector.shape_cast %77 : vector<2x16x1024xf32> to vector<32x1024xf32>
    %c2_78 = arith.constant 2 : index
    %c0_79 = arith.constant 0 : index
    %c0_80 = arith.constant 0 : index
    %79 = vector.load %arg5[%c2_78, %c0_79, %c0_80] : memref<3x1024x128xf32, #tpu.memory_space<vmem>>, vector<1x1024x128xf32>
    %80 = vector.shape_cast %79 : vector<1x1024x128xf32> to vector<1024x128xf32>
    %cst_81 = arith.constant dense<0.000000e+00> : vector<32x128xf32>
    %81 = tpu.matmul %78, %80, %cst_81 {dimension_numbers = #tpu.dot_dimension_numbers<[1], [0], [0], [1], [0, 0, 1, 1], [], []>} : vector<32x1024xf32>, vector<1024x128xf32>, vector<32x128xf32> -> vector<32x128xf32>
    %82 = arith.addf %76, %81 : vector<32x128xf32>
    %c0_82 = arith.constant 0 : index
    %c0_83 = arith.constant 0 : index
    %83 = vector.load %arg6[%c0_82, %c0_83] : memref<1x128xf32, #tpu.memory_space<vmem>>, vector<1x128xf32>
    %84 = vector.broadcast %83 : vector<1x128xf32> to vector<32x128xf32>
    %85 = arith.addf %82, %84 : vector<32x128xf32>
    %86 = vector.shape_cast %85 : vector<32x128xf32> to vector<2x16x128xf32>
    %c0_84 = arith.constant 0 : index
    %c0_85 = arith.constant 0 : index
    %c0_86 = arith.constant 0 : index
    %87 = vector.load %arg7[%c0_84, %c0_85, %c0_86] : memref<2x16x128xf32, #tpu.memory_space<vmem>>, vector<2x16x128xf32>
    tpu.vector_store %arg7[%c0_84, %c0_85, %c0_86], %86 {strides = array<i32>} : memref<2x16x128xf32, #tpu.memory_space<vmem>>, vector<2x16x128xf32>,
    return
  }
  func.func @transform_0(%arg0: i32) -> (i32, i32, i32, i32) {
    %c0_i32 = arith.constant 0 : i32
    %c0_i32_0 = arith.constant 0 : i32
    %c0_i32_1 = arith.constant 0 : i32
    %c0_i32_2 = arith.constant 0 : i32
    return %arg0, %c0_i32, %c0_i32_0, %c0_i32_1 : i32, i32, i32, i32
  }
  func.func @transform_1(%arg0: i32) -> (i32, i32, i32) {
    %c0_i32 = arith.constant 0 : i32
    %c0_i32_0 = arith.constant 0 : i32
    %c0_i32_1 = arith.constant 0 : i32
    %c0_i32_2 = arith.constant 0 : i32
    return %c0_i32, %c0_i32_0, %c0_i32_1 : i32, i32, i32
  }
  func.func @transform_2(%arg0: i32) -> (i32, i32) {
    %c0_i32 = arith.constant 0 : i32
    %c0_i32_0 = arith.constant 0 : i32
    %c0_i32_1 = arith.constant 0 : i32
    return %c0_i32, %c0_i32_0 : i32, i32
  }
  func.func @transform_3(%arg0: i32) -> (i32, i32) {
    %c0_i32 = arith.constant 0 : i32
    %c0_i32_0 = arith.constant 0 : i32
    %c0_i32_1 = arith.constant 0 : i32
    return %c0_i32, %c0_i32_0 : i32, i32
  }
  func.func @transform_4(%arg0: i32) -> (i32, i32, i32) {
    %c0_i32 = arith.constant 0 : i32
    %c0_i32_0 = arith.constant 0 : i32
    %c0_i32_1 = arith.constant 0 : i32
    %c0_i32_2 = arith.constant 0 : i32
    return %c0_i32, %c0_i32_0, %c0_i32_1 : i32, i32, i32
  }
  func.func @transform_5(%arg0: i32) -> (i32, i32) {
    %c0_i32 = arith.constant 0 : i32
    %c0_i32_0 = arith.constant 0 : i32
    %c0_i32_1 = arith.constant 0 : i32
    return %c0_i32, %c0_i32_0 : i32, i32
  }
  func.func @transform_6(%arg0: i32) -> (i32, i32, i32) {
    %c0_i32 = arith.constant 0 : i32
    %c0_i32_0 = arith.constant 0 : i32
    %c0_i32_1 = arith.constant 0 : i32
    return %arg0, %c0_i32, %c0_i32_0 : i32, i32, i32
  }
}

</mosaic_0001>

<bundles_post_ra>
// kernel: tpu_custom_call.1
= control target key start
LH: loop header
LB: loop body
LE: loop exit
PB: predicated region body
PF: predicated region fallthrough
CT: control target
= control target key end

     0   :  { %11 = vsyncpa [#allocation3], 0  ;;  %s8894_s0 = inlined_call_operand.vmem [shape: f32[2,10,10,128], index: 0, kind: input, shape index: {}]   ;;  %s8895_s1 = inlined_call_operand.hbm [shape: f32[9,128,128], index: 1, kind: input, shape index: {}]   ;;  %s8896_s2 = inlined_call_operand.hbm [shape: f32[1,128], index: 2, kind: input, shape index: {}]   ;;  %s8897_s3 = inlined_call_operand.vmem [shape: f32[36,16], index: 3, kind: input, shape index: {}]   ;;  %s8898_s4 = inlined_call_operand.hbm [shape: f32[3,1024,128], index: 4, kind: input, shape index: {}]   ;;  %s8899_s5 = inlined_call_operand.hbm [shape: f32[1,128], index: 5, kind: input, shape index: {}]   ;;  %s8900_s6 = inlined_call_operand.hbm [shape: f32[2,16,128], index: 6, kind: output, shape index: {}]  }
   0x1   :  { %12 = vsyncpa [#allocation6], 0 }
   0x2   :  { %13 = vsyncpa [#allocation9], 0 }
   0x3   :  { %14 = vsyncpa [#allocation4], 0  ;;  %s7005_s21 = smov [#allocation5]   ;;  %s7006_s23 = smov [#allocation2]  }
   0x4   :  { %s35_s22 = sshll.u32 %s7005_s21, 4  ;;  %s22_s24 = sshll.u32 %s7006_s23, 4  ;;  %s36_s22 = int_to_ptr.vmem [resolvable:$true] %s35_s22  ;;  %s23_s24 = int_to_ptr.vmem [resolvable:$true] %s22_s24 }
   0x5   :  { %s6905_s25 = scalar_lea.vmem %s36_s22, 16  ;;  %s6909_s26 = scalar_lea.vmem %s36_s22, 32 }
   0x6   :  { %p6906_p0 = scmp.ne.s32.totalorder %s36_s22, %s6905_s25  ;;  %p6910_p1 = scmp.lt.s32.totalorder %s36_s22, %s36_s22 }
   0x7   :  { %p6911_p2 = scmp.lt.s32.totalorder %s6909_s26, %s6905_s25 }
   0x9   :  { %p6912_p3 = por %p6911_p2, %p6910_p1 }
   0xb   :  { %p6913_p4 = pnand %p6912_p3, %p6906_p0 }
   0xd   :  { %6916 = shalt.err (!%p6913_p4)
}
   0xe   :  { %38 = dma.hbm_to_vmem [thread:$0]  %s8896_s2, 16, %s36_s22, [#allocation6]  }
   0xf   :  { %s6925_s29 = scalar_lea.vmem %s23_s24, 18432  ;;  %p6930_p6 = scmp.lt.s32.totalorder %s23_s24, %s23_s24 }
  0x10   :  { %p6926_p5 = scmp.ne.s32.totalorder %s23_s24, %s6925_s29  ;;  %p6931_p7 = scmp.lt.s32.totalorder %s6925_s29, %s6925_s29 }
  0x12   :  { %p6932_p8 = por %p6931_p7, %p6930_p6 }
  0x14   :  { %p6933_p9 = pnand %p6932_p8, %p6926_p5 }
  0x16   :  { %6936 = shalt.err (!%p6933_p9)
}
  0x17   :  { %s7007_s30 = smov 128   ;;  %s7008_s7 = smov 8  }
  0x18   :  { %28 = dma.hbm_to_vmem [thread:$0]  %s8895_s1, 18432, %s23_s24, [#allocation3], %s7007_s30, %s7007_s30, %s7008_s7  }
  0x19   :  { %s7009_s10 = smov [#allocation7]   ;;  %s7010_s12 = smov [#allocation8]  }
  0x1a   :  { %s46_s11 = sshll.u32 %s7009_s10, 4  ;;  %s59_s2 = sshll.u32 %s7010_s12, 4  ;;  %s47_s11 = int_to_ptr.vmem [resolvable:$true] %s46_s11  ;;  %s60_s2 = int_to_ptr.vmem [resolvable:$true] %s59_s2 }
  0x1b   :  { %s6945_s13 = scalar_lea.vmem %s47_s11, 49152  ;;  %p6950_p11 = scmp.lt.s32.totalorder %s47_s11, %s47_s11 }
  0x1c   :  { %p6946_p10 = scmp.ne.s32.totalorder %s47_s11, %s6945_s13  ;;  %p6951_p12 = scmp.lt.s32.totalorder %s6945_s13, %s6945_s13 }
  0x1e   :  { %p6952_p13 = por %p6951_p12, %p6950_p11 }
  0x20   :  { %p6953_p0 = pnand %p6952_p13, %p6946_p10 }
  0x22   :  { %6956 = shalt.err (!%p6953_p0)
}
  0x23   :  { %52 = dma.hbm_to_vmem [thread:$0]  %s8898_s4, 49152, %s47_s11, [#allocation6], %s7007_s30, %s7007_s30, %s7008_s7  }
  0x24   :  { %s6965_s1 = scalar_lea.vmem %s60_s2, 16  ;;  %s6969_s16 = scalar_lea.vmem %s60_s2, 32 }
  0x25   :  { %p6966_p1 = scmp.ne.s32.totalorder %s60_s2, %s6965_s1  ;;  %p6970_p2 = scmp.lt.s32.totalorder %s60_s2, %s60_s2 }
  0x26   :  { %p6971_p3 = scmp.lt.s32.totalorder %s6969_s16, %s6965_s1 }
  0x28   :  { %p6972_p4 = por %p6971_p3, %p6970_p2 }
  0x2a   :  { %p6973_p5 = pnand %p6972_p4, %p6966_p1 }
  0x2c   :  { %6976 = shalt.err (!%p6973_p5)
}
  0x2d   :  { %62 = dma.hbm_to_vmem [thread:$0]  %s8899_s5, 16, %s60_s2, [#allocation9]  }
  0x2e   :  { %6997 = dma.done.wait [#allocation3], 18432  }
  0x2f   :  { %6998 = vsyncadd [#allocation3], 4294948864 }
  0x30   :  { %6999 = dma.done.wait [#allocation6], 49168  }
  0x31   :  { %7000 = vsyncadd [#allocation6], 4294918128 }
  0x32   :  { %7001 = dma.done.wait [#allocation9], 16  }
  0x33   :  { %7002 = vsyncadd [#allocation9], 4294967280  ;;  %v139_v0 = vld [vmem:[#allocation2 + $0xf8] sm:$0xff]  ;;  %v138_v2 = vld [vmem:[#allocation2 + $0xf0] sm:$0xff]  ;;  %vm2138_vm0 = vcmask 130048   ;;  %vm3026_vm1 = vcmask 1040384  }
  0x34   :  { %v106_v1 = vld [vmem:[#allocation2 + $0x78] sm:$0xff]  ;;  %6379 = vmatprep.subr.mxu0 %v139_v0  ;;  %v105_v3 = vld [vmem:[#allocation2 + $0x70] sm:$0xff]  ;;  %v137_v4 = vld [vmem:[#allocation2 + $0xe8] sm:$0xff]  ;;  %vm3027_vm2 = vcmask 1042434   ;;  %vm3029_vm3 = vcmask 1044484   ;;  %vm3031_vm4 = vcmask 1046534  }
  0x35   :  { %6435 = vmatprep.subr.mxu1 %v106_v1  ;;  %6380 = vmatpush3.msra.mxu0 %v139_v0  ;;  %v104_v5 = vld [vmem:[#allocation2 + $0x68] sm:$0xff]  ;;  %v136_v6 = vld [vmem:[#allocation2 + $0xe0] sm:$0xff]  ;;  %v135_v8 = vld [vmem:[#allocation2 + $0xd8] sm:$0xff] }
  0x36   :  { %6436 = vmatpush3.msra.mxu1 %v106_v1  ;;  %6381 = vmatprep.subr.mxu0 %v138_v2  ;;  %v103_v7 = vld [vmem:[#allocation2 + $0x60] sm:$0xff]  ;;  %v102_v9 = vld [vmem:[#allocation2 + $0x58] sm:$0xff]  ;;  %v134_v10 = vld [vmem:[#allocation2 + $0xd0] sm:$0xff] }
  0x37   :  { %6437 = vmatprep.subr.mxu1 %v105_v3  ;;  %6382 = vmatpush3.msra.mxu0 %v138_v2  ;;  %v101_v11 = vld [vmem:[#allocation2 + $0x50] sm:$0xff]  ;;  %v133_v12 = vld [vmem:[#allocation2 + $0xc8] sm:$0xff]  ;;  %v132_v14 = vld [vmem:[#allocation2 + $0xc0] sm:$0xff] }
  0x38   :  { %6438 = vmatpush3.msra.mxu1 %v105_v3  ;;  %6383 = vmatprep.subr.mxu0 %v137_v4  ;;  %v100_v13 = vld [vmem:[#allocation2 + $0x48] sm:$0xff]  ;;  %v99_v15 = vld [vmem:[#allocation2 + $0x40] sm:$0xff]  ;;  %v131_v16 = vld [vmem:[#allocation2 + $0xb8] sm:$0xff] }
  0x39   :  { %6439 = vmatprep.subr.mxu1 %v104_v5  ;;  %6384 = vmatpush3.msra.mxu0 %v137_v4  ;;  %v98_v17 = vld [vmem:[#allocation2 + $0x38] sm:$0xff]  ;;  %v130_v18 = vld [vmem:[#allocation2 + $0xb0] sm:$0xff]  ;;  %v129_v20 = vld [vmem:[#allocation2 + $0xa8] sm:$0xff] }
  0x3a   :  { %6440 = vmatpush3.msra.mxu1 %v104_v5  ;;  %6385 = vmatprep.subr.mxu0 %v136_v6  ;;  %v97_v19 = vld [vmem:[#allocation2 + $0x30] sm:$0xff]  ;;  %v96_v21 = vld [vmem:[#allocation2 + $0x28] sm:$0xff]  ;;  %v128_v22 = vld [vmem:[#allocation2 + $0xa0] sm:$0xff] }
  0x3b   :  { %6441 = vmatprep.subr.mxu1 %v103_v7  ;;  %6386 = vmatpush3.msra.mxu0 %v136_v6  ;;  %v95_v23 = vld [vmem:[#allocation2 + $0x20] sm:$0xff]  ;;  %v127_v24 = vld [vmem:[#allocation2 + $0x98] sm:$0xff]  ;;  %v126_v26 = vld [vmem:[#allocation2 + $0x90] sm:$0xff] }
  0x3c   :  { %6442 = vmatpush3.msra.mxu1 %v103_v7  ;;  %6387 = vmatprep.subr.mxu0 %v135_v8  ;;  %v94_v25 = vld [vmem:[#allocation2 + $0x18] sm:$0xff]  ;;  %v93_v27 = vld [vmem:[#allocation2 + $0x10] sm:$0xff]  ;;  %v125_v28 = vld [vmem:[#allocation2 + $0x88] sm:$0xff] }
  0x3d   :  { %6443 = vmatprep.subr.mxu1 %v102_v9  ;;  %6388 = vmatpush3.msra.mxu0 %v135_v8  ;;  %v92_v29 = vld [vmem:[#allocation2 + $0x8] sm:$0xff]  ;;  %v124_v30 = vld [vmem:[#allocation2 + $0x80] sm:$0xff]  ;;  %v7077_v34 = vld [vmem:[%s8894_s0 + $0x11] sm:$0xff] }
  0x3e   :  { %6444 = vmatpush3.msra.mxu1 %v102_v9  ;;  %6389 = vmatprep.subr.mxu0 %v134_v10  ;;  %v91_v31 = vld [vmem:[#allocation2] sm:$0xff]  ;;  %v7082_v35 = vld [vmem:[%s8894_s0 + $0x10] sm:$0xff]  ;;  %v462_v36 = vld [vmem:[#allocation2 + $0x178] sm:$0xff] }
  0x3f   :  { %6445 = vmatprep.subr.mxu1 %v101_v11  ;;  %6390 = vmatpush3.msra.mxu0 %v134_v10  ;;  %v107_v32 = vld [vmem:[%s8894_s0 + $0x1] sm:$0xff]  ;;  %v657_v37 = vld [vmem:[#allocation2 + $0x1f8] sm:$0xff]  ;;  %v461_v39 = vld [vmem:[#allocation2 + $0x170] sm:$0xff] }
  0x40   :  { %6446 = vmatpush3.msra.mxu1 %v101_v11  ;;  %6391 = vmatprep.subr.mxu0 %v133_v12  ;;  %v75_v33 = vld [vmem:[%s8894_s0] sm:$0xff]  ;;  %v7100_v41 = vld [vmem:[%s8894_s0 + $0x31] sm:$0xff]  ;;  %v460_v43 = vld [vmem:[#allocation2 + $0x168] sm:$0xff] }
  0x41   :  { %6447 = vmatprep.subr.mxu1 %v100_v13  ;;  %6392 = vmatpush3.msra.mxu0 %v133_v12  ;;  %v7087_v38 = vld [vmem:[%s8894_s0 + $0x21] sm:$0xff]  ;;  %v7105_v42 = vld [vmem:[%s8894_s0 + $0x30] sm:$0xff]  ;;  %v458_v51 = vld [vmem:[#allocation2 + $0x158] sm:$0xff] }
  0x42   :  { %6448 = vmatpush3.msra.mxu1 %v100_v13  ;;  %6393 = vmatprep.subr.mxu0 %v132_v14  ;;  %v7094_v40 = vld [vmem:[%s8894_s0 + $0x20] sm:$0xff]  ;;  %v656_v44 = vld [vmem:[#allocation2 + $0x1f0] sm:$0xff]  ;;  %v655_v46 = vld [vmem:[#allocation2 + $0x1e8] sm:$0xff] }
  0x43   :  { %6449 = vmatprep.subr.mxu1 %v99_v15  ;;  %6394 = vmatpush3.msra.mxu0 %v132_v14  ;;  %v459_v45 = vld [vmem:[#allocation2 + $0x160] sm:$0xff]  ;;  %v7123_v49 = vld [vmem:[%s8894_s0 + $0x51] sm:$0xff]  ;;  %v456_v59 = vld [vmem:[#allocation2 + $0x148] sm:$0xff] }
  0x44   :  { %6450 = vmatpush3.msra.mxu1 %v99_v15  ;;  %6395 = vmatprep.subr.mxu0 %v131_v16  ;;  %v7113_v47 = vld [vmem:[%s8894_s0 + $0x41] sm:$0xff]  ;;  %v7128_v50 = vld [vmem:[%s8894_s0 + $0x50] sm:$0xff]  ;;  %v653_v54 = vld [vmem:[#allocation2 + $0x1d8] sm:$0xff] }
  0x45   :  { %6451 = vmatprep.subr.mxu1 %v98_v17  ;;  %6396 = vmatpush3.msra.mxu0 %v131_v16  ;;  %v7118_v48 = vld [vmem:[%s8894_s0 + $0x40] sm:$0xff]  ;;  %v457_v53 = vld [vmem:[#allocation2 + $0x150] sm:$0xff]  ;;  %v651_v62 = vld [vmem:[#allocation2 + $0x1c8] sm:$0xff] }
  0x46   :  { %6452 = vmatpush3.msra.mxu1 %v98_v17  ;;  %6397 = vmatprep.subr.mxu0 %v130_v18  ;;  %v654_v52 = vld [vmem:[#allocation2 + $0x1e0] sm:$0xff]  ;;  %v7147_v57 = vld [vmem:[%s8894_s0 + $0x71] sm:$0xff]  ;;  %v452_v11 = vld [vmem:[#allocation2 + $0x128] sm:$0xff] }
  0x47   :  { %6453 = vmatprep.subr.mxu1 %v97_v19  ;;  %6398 = vmatpush3.msra.mxu0 %v130_v18  ;;  %v7137_v55 = vld [vmem:[%s8894_s0 + $0x61] sm:$0xff]  ;;  %v7152_v58 = vld [vmem:[%s8894_s0 + $0x70] sm:$0xff]  ;;  %v454_v3 = vld [vmem:[#allocation2 + $0x138] sm:$0xff] }
  0x48   :  { %6454 = vmatpush3.msra.mxu1 %v97_v19  ;;  %6399 = vmatprep.subr.mxu0 %v129_v20  ;;  %v7142_v56 = vld [vmem:[%s8894_s0 + $0x60] sm:$0xff]  ;;  %v652_v60 = vld [vmem:[#allocation2 + $0x1d0] sm:$0xff]  ;;  %v649_v6 = vld [vmem:[#allocation2 + $0x1b8] sm:$0xff] }
  0x49   :  { %6455 = vmatprep.subr.mxu1 %v96_v21  ;;  %6400 = vmatpush3.msra.mxu0 %v129_v20  ;;  %v455_v61 = vld [vmem:[#allocation2 + $0x140] sm:$0xff]  ;;  %v7167_v1 = vld [vmem:[%s8894_s0 + $0xb1] sm:$0xff]  ;;  %v647_v14 = vld [vmem:[#allocation2 + $0x1a8] sm:$0xff] }
  0x4a   :  { %6456 = vmatpush3.msra.mxu1 %v96_v21  ;;  %6401 = vmatprep.subr.mxu0 %v128_v22  ;;  %v115_v63 = vld [vmem:[%s8894_s0 + $0xa1] sm:$0xff]  ;;  %v7172_v2 = vld [vmem:[%s8894_s0 + $0xb0] sm:$0xff]  ;;  %v450_v19 = vld [vmem:[#allocation2 + $0x118] sm:$0xff] }
  0x4b   :  { %6457 = vmatprep.subr.mxu1 %v95_v23  ;;  %6402 = vmatpush3.msra.mxu0 %v128_v22  ;;  %v83_v0 = vld [vmem:[%s8894_s0 + $0xa0] sm:$0xff]  ;;  %v453_v5 = vld [vmem:[#allocation2 + $0x130] sm:$0xff]  ;;  %v645_v22 = vld [vmem:[#allocation2 + $0x198] sm:$0xff] }
  0x4c   :  { %6458 = vmatpush3.msra.mxu1 %v95_v23  ;;  %6403 = vmatprep.subr.mxu0 %v127_v24  ;;  %v650_v4 = vld [vmem:[#allocation2 + $0x1c0] sm:$0xff]  ;;  %v7189_v9 = vld [vmem:[%s8894_s0 + $0xd1] sm:$0xff]  ;;  %vm7946_vm5 = vmor %vm3026_vm1, %vm3027_vm2 }
  0x4d   :  { %6459 = vmatprep.subr.mxu1 %v94_v25  ;;  %6404 = vmatpush3.msra.mxu0 %v127_v24  ;;  %v7179_v7 = vld [vmem:[%s8894_s0 + $0xc1] sm:$0xff]  ;;  %v7194_v10 = vld [vmem:[%s8894_s0 + $0xd0] sm:$0xff]  ;;  %vm7977_vm6 = vmor %vm7946_vm5, %vm3029_vm3 }
  0x4e   :  { %6460 = vmatpush3.msra.mxu1 %v94_v25  ;;  %6405 = vmatprep.subr.mxu0 %v126_v26  ;;  %v7184_v8 = vld [vmem:[%s8894_s0 + $0xc0] sm:$0xff]  ;;  %v648_v12 = vld [vmem:[#allocation2 + $0x1b0] sm:$0xff]  ;;  %vm8010_vm7 = vmor %vm7977_vm6, %vm3031_vm4 }
  0x4f   :  { %6461 = vmatprep.subr.mxu1 %v93_v27  ;;  %6406 = vmatpush3.msra.mxu0 %v126_v26  ;;  %v451_v13 = vld [vmem:[#allocation2 + $0x120] sm:$0xff]  ;;  %v7213_v17 = vld [vmem:[%s8894_s0 + $0xf1] sm:$0xff] }
  0x50   :  { %6462 = vmatpush3.msra.mxu1 %v93_v27  ;;  %6407 = vmatprep.subr.mxu0 %v125_v28  ;;  %v7203_v15 = vld [vmem:[%s8894_s0 + $0xe1] sm:$0xff]  ;;  %v7218_v18 = vld [vmem:[%s8894_s0 + $0xf0] sm:$0xff] }
  0x51   :  { %6463 = vmatprep.subr.mxu1 %v92_v29  ;;  %6408 = vmatpush3.msra.mxu0 %v125_v28  ;;  %v7208_v16 = vld [vmem:[%s8894_s0 + $0xe0] sm:$0xff]  ;;  %v449_v21 = vld [vmem:[#allocation2 + $0x110] sm:$0xff]  ;;  %v448_v27 = vld [vmem:[#allocation2 + $0x108] sm:$0xff] }
  0x52   :  { %6464 = vmatpush3.msra.mxu1 %v92_v29  ;;  %6409 = vmatprep.subr.mxu0 %v124_v30  ;;  %v646_v20 = vld [vmem:[#allocation2 + $0x1a0] sm:$0xff]  ;;  %v7237_v25 = vld [vmem:[%s8894_s0 + $0x111] sm:$0xff] }
  0x53   :  { %6465 = vmatprep.subr.mxu1 %v91_v31  ;;  %6410 = vmatpush3.msra.mxu0 %v124_v30  ;;  %v7227_v23 = vld [vmem:[%s8894_s0 + $0x101] sm:$0xff]  ;;  %v7242_v26 = vld [vmem:[%s8894_s0 + $0x110] sm:$0xff] }
  0x54   :  { %6411 = vmatprep.mubr.f32.mxu0 %v107_v32  ;;  %6466 = vmatpush3.msra.mxu1 %v91_v31  ;;  %v7232_v24 = vld [vmem:[%s8894_s0 + $0x100] sm:$0xff]  ;;  %v644_v28 = vld [vmem:[#allocation2 + $0x190] sm:$0xff]  ;;  %v643_v30 = vld [vmem:[#allocation2 + $0x188] sm:$0xff] }
  0x55   :  { %6467 = vmatprep.mubr.f32.mxu1 %v75_v33  ;;  %6412 = vmatmul.mubr.f32.vlgmr.msra.gmra.mxu0 %v7077_v34  ;;  %v447_v29 = vld [vmem:[#allocation2 + $0x100] sm:$0xff]  ;;  %v7254_v32 = vld [vmem:[%s8894_s0 + $0x12] sm:$0xff] }
  0x56   :  { %6468 = vmatmul.mubr.f32.vlgmr.msra.gmra.mxu1 %v7082_v35  ;;  %6491 = vmatprep.subr.mxu0 %v462_v36  ;;  %v430_v31 = vld [vmem:[%s8894_s0 + $0x2] sm:$0xff] }
  0x57   :  { %6547 = vmatprep.subr.mxu1 %v657_v37  ;;  %6492 = vmatpush3.msra.mxu0 %v462_v36  ;;  %v642_v33 = vld [vmem:[#allocation2 + $0x180] sm:$0xff]  ;;  %v851_v36 = vld [vmem:[#allocation2 + $0x278] sm:$0xff] }
  0x58   :  { %6414 = vmatprep.mubr.f32.mxu0 %v7087_v38  ;;  %6493 = vmatprep.subr.mxu0 %v461_v39 }
  0x59   :  { %6470 = vmatprep.mubr.f32.mxu1 %v7094_v40  ;;  %6494 = vmatpush3.msra.mxu0 %v461_v39  ;;  %v1045_v39 = vld [vmem:[#allocation2 + $0x2f8] sm:$0xff] }
  0x5a   :  { %6548 = vmatpush3.msra.mxu1 %v657_v37  ;;  %6415 = vmatmul.mubr.f32.gmra.mxu0 %v7100_v41  ;;  %v850_v37 = vld [vmem:[#allocation2 + $0x270] sm:$0xff] }
  0x5b   :  { %6471 = vmatmul.mubr.f32.gmra.mxu1 %v7105_v42  ;;  %6495 = vmatprep.subr.mxu0 %v460_v43 }
  0x5c   :  { %6549 = vmatprep.subr.mxu1 %v656_v44  ;;  %6496 = vmatpush3.msra.mxu0 %v460_v43  ;;  %v7261_v43 = vld [vmem:[%s8894_s0 + $0x22] sm:$0xff] }
  0x5d   :  { %6550 = vmatpush3.msra.mxu1 %v656_v44  ;;  %6497 = vmatprep.subr.mxu0 %v459_v45  ;;  %v7267_v44 = vld [vmem:[%s8894_s0 + $0x32] sm:$0xff] }
  0x5e   :  { %6551 = vmatprep.subr.mxu1 %v655_v46  ;;  %6417 = vmatprep.mubr.f32.mxu0 %v7113_v47 }
  0x5f   :  { %6473 = vmatprep.mubr.f32.mxu1 %v7118_v48  ;;  %6498 = vmatpush3.msra.mxu0 %v459_v45  ;;  %v849_v45 = vld [vmem:[#allocation2 + $0x268] sm:$0xff] }
  0x60   :  { %6552 = vmatpush3.msra.mxu1 %v655_v46  ;;  %6418 = vmatmul.mubr.f32.gmra.mxu0 %v7123_v49  ;;  %v1044_v46 = vld [vmem:[#allocation2 + $0x2f0] sm:$0xff] }
  0x61   :  { %6474 = vmatmul.mubr.f32.gmra.mxu1 %v7128_v50  ;;  %6499 = vmatprep.subr.mxu0 %v458_v51 }
  0x62   :  { %6553 = vmatprep.subr.mxu1 %v654_v52  ;;  %6500 = vmatpush3.msra.mxu0 %v458_v51  ;;  %v1043_v51 = vld [vmem:[#allocation2 + $0x2e8] sm:$0xff] }
  0x63   :  { %6554 = vmatpush3.msra.mxu1 %v654_v52  ;;  %6501 = vmatprep.subr.mxu0 %v457_v53  ;;  %v7275_v52 = vld [vmem:[%s8894_s0 + $0x42] sm:$0xff] }
  0x64   :  { %6555 = vmatprep.subr.mxu1 %v653_v54  ;;  %6420 = vmatprep.mubr.f32.mxu0 %v7137_v55 }
  0x65   :  { %6476 = vmatprep.mubr.f32.mxu1 %v7142_v56  ;;  %6502 = vmatpush3.msra.mxu0 %v457_v53  ;;  %v7280_v53 = vld [vmem:[%s8894_s0 + $0x52] sm:$0xff] }
  0x66   :  { %6556 = vmatpush3.msra.mxu1 %v653_v54  ;;  %6421 = vmatmul.mubr.f32.gmra.mxu0 %v7147_v57  ;;  %v847_v54 = vld [vmem:[#allocation2 + $0x258] sm:$0xff] }
  0x67   :  { %6477 = vmatmul.mubr.f32.gmra.mxu1 %v7152_v58  ;;  %6503 = vmatprep.subr.mxu0 %v456_v59 }
  0x68   :  { %6557 = vmatprep.subr.mxu1 %v652_v60  ;;  %6504 = vmatpush3.msra.mxu0 %v456_v59  ;;  %v1042_v59 = vld [vmem:[#allocation2 + $0x2e0] sm:$0xff] }
  0x69   :  { %6558 = vmatpush3.msra.mxu1 %v652_v60  ;;  %6505 = vmatprep.subr.mxu0 %v455_v61  ;;  %v846_v60 = vld [vmem:[#allocation2 + $0x250] sm:$0xff] }
  0x6a   :  { %6559 = vmatprep.subr.mxu1 %v651_v62  ;;  %6423 = vmatprep.mubr.f32.mxu0 %v115_v63  ;;  %v7294_v63 = vld [vmem:[%s8894_s0 + $0x72] sm:$0xff] }
  0x6b   :  { %6479 = vmatprep.mubr.f32.mxu1 %v83_v0  ;;  %6506 = vmatpush3.msra.mxu0 %v455_v61  ;;  %v1041_v61 = vld [vmem:[#allocation2 + $0x2d8] sm:$0xff]  ;;  %v845_v0 = vld [vmem:[#allocation2 + $0x248] sm:$0xff] }
  0x6c   :  { %6560 = vmatpush3.msra.mxu1 %v651_v62  ;;  %6424 = vmatmul.mubr.f32.gmra.mxu0 %v7167_v1  ;;  %v7289_v62 = vld [vmem:[%s8894_s0 + $0x62] sm:$0xff] }
  0x6d   :  { %6480 = vmatmul.mubr.f32.gmra.mxu1 %v7172_v2  ;;  %6507 = vmatprep.subr.mxu0 %v454_v3 }
  0x6e   :  { %6561 = vmatprep.subr.mxu1 %v650_v4  ;;  %6508 = vmatpush3.msra.mxu0 %v454_v3  ;;  %v1040_v3 = vld [vmem:[#allocation2 + $0x2d0] sm:$0xff] }
  0x6f   :  { %6562 = vmatpush3.msra.mxu1 %v650_v4  ;;  %6509 = vmatprep.subr.mxu0 %v453_v5  ;;  %v844_v4 = vld [vmem:[#allocation2 + $0x240] sm:$0xff] }
  0x70   :  { %6563 = vmatprep.subr.mxu1 %v649_v6  ;;  %6426 = vmatprep.mubr.f32.mxu0 %v7179_v7 }
  0x71   :  { %6482 = vmatprep.mubr.f32.mxu1 %v7184_v8  ;;  %6510 = vmatpush3.msra.mxu0 %v453_v5  ;;  %v7302_v5 = vld [vmem:[%s8894_s0 + $0x80] sm:$0xff] }
  0x72   :  { %6564 = vmatpush3.msra.mxu1 %v649_v6  ;;  %6427 = vmatmul.mubr.f32.gmra.mxu0 %v7189_v9  ;;  %v1039_v6 = vld [vmem:[#allocation2 + $0x2c8] sm:$0xff] }
  0x73   :  { %6483 = vmatmul.mubr.f32.gmra.mxu1 %v7194_v10  ;;  %6511 = vmatprep.subr.mxu0 %v452_v11 }
  0x74   :  { %6565 = vmatprep.subr.mxu1 %v648_v12  ;;  %6512 = vmatpush3.msra.mxu0 %v452_v11  ;;  %v438_v11 = vld [vmem:[%s8894_s0 + $0xa2] sm:$0xff] }
  0x75   :  { %6566 = vmatpush3.msra.mxu1 %v648_v12  ;;  %6513 = vmatprep.subr.mxu0 %v451_v13  ;;  %v7311_v12 = vld [vmem:[%s8894_s0 + $0xb2] sm:$0xff] }
  0x76   :  { %6567 = vmatprep.subr.mxu1 %v647_v14  ;;  %6429 = vmatprep.mubr.f32.mxu0 %v7203_v15 }
  0x77   :  { %6485 = vmatprep.mubr.f32.mxu1 %v7208_v16  ;;  %6514 = vmatpush3.msra.mxu0 %v451_v13  ;;  %v843_v13 = vld [vmem:[#allocation2 + $0x238] sm:$0xff] }
  0x78   :  { %6568 = vmatpush3.msra.mxu1 %v647_v14  ;;  %6430 = vmatmul.mubr.f32.gmra.mxu0 %v7213_v17  ;;  %v1038_v14 = vld [vmem:[#allocation2 + $0x2c0] sm:$0xff] }
  0x79   :  { %6486 = vmatmul.mubr.f32.gmra.mxu1 %v7218_v18  ;;  %6515 = vmatprep.subr.mxu0 %v450_v19 }
  0x7a   :  { %6569 = vmatprep.subr.mxu1 %v646_v20  ;;  %6516 = vmatpush3.msra.mxu0 %v450_v19  ;;  %v842_v19 = vld [vmem:[#allocation2 + $0x230] sm:$0xff] }
  0x7b   :  { %6570 = vmatpush3.msra.mxu1 %v646_v20  ;;  %6517 = vmatprep.subr.mxu0 %v449_v21  ;;  %v1037_v20 = vld [vmem:[#allocation2 + $0x2b8] sm:$0xff] }
  0x7c   :  { %6571 = vmatprep.subr.mxu1 %v645_v22  ;;  %6432 = vmatprep.mubr.f32.mxu0 %v7227_v23 }
  0x7d   :  { %6488 = vmatprep.mubr.f32.mxu1 %v7232_v24  ;;  %6518 = vmatpush3.msra.mxu0 %v449_v21  ;;  %v7319_v21 = vld [vmem:[%s8894_s0 + $0xc2] sm:$0xff] }
  0x7e   :  { %6572 = vmatpush3.msra.mxu1 %v645_v22  ;;  %6433 = vmatmul.mubr.f32.gmra.mxu0 %v7237_v25  ;;  %v7324_v22 = vld [vmem:[%s8894_s0 + $0xd2] sm:$0xff] }
  0x7f   :  { %6489 = vmatmul.mubr.f32.gmra.mxu1 %v7242_v26  ;;  %6519 = vmatprep.subr.mxu0 %v448_v27 }
  0x80   :  { %6573 = vmatprep.subr.mxu1 %v644_v28  ;;  %6520 = vmatpush3.msra.mxu0 %v448_v27  ;;  %v841_v27 = vld [vmem:[#allocation2 + $0x228] sm:$0xff] }
  0x81   :  { %6574 = vmatpush3.msra.mxu1 %v644_v28  ;;  %6521 = vmatprep.subr.mxu0 %v447_v29  ;;  %v1036_v28 = vld [vmem:[#allocation2 + $0x2b0] sm:$0xff] }
  0x82   :  { %6575 = vmatprep.subr.mxu1 %v643_v30  ;;  %6522 = vmatpush3.msra.mxu0 %v447_v29  ;;  %v1035_v29 = vld [vmem:[#allocation2 + $0x2a8] sm:$0xff] }
  0x83   :  { %6523 = vmatprep.mubr.f32.mxu0 %v430_v31  ;;  %6576 = vmatpush3.msra.mxu1 %v643_v30  ;;  %v7333_v30 = vld [vmem:[%s8894_s0 + $0xe2] sm:$0xff]  ;;  %v7338_v31 = vld [vmem:[%s8894_s0 + $0xf2] sm:$0xff] }
  0x84   :  { %6524 = vmatmul.mubr.f32.vlgmr.msra.gmra.mxu0 %v7254_v32  ;;  %6577 = vmatprep.subr.mxu1 %v642_v33 }
  0x85   :  { %6603 = vmatprep.subr.mxu0 %v851_v36  ;;  %6578 = vmatpush3.msra.mxu1 %v642_v33  ;;  %v839_v33 = vld [vmem:[#allocation2 + $0x218] sm:$0xff] }
  0x86   :  { %6579 = vmatprep.mubr.f32.mxu1 %v7082_v35  ;;  %6604 = vmatpush3.msra.mxu0 %v851_v36  ;;  %v848_v35 = vld [vmem:[#allocation2 + $0x260] sm:$0xff] }
  0x87   :  { %6580 = vmatmul.mubr.f32.vlgmr.msra.gmra.mxu1 %v7094_v40  ;;  %6605 = vmatprep.subr.mxu0 %v850_v37  ;;  %v1034_v36 = vld [vmem:[#allocation2 + $0x2a0] sm:$0xff] }
  0x88   :  { %6659 = vmatprep.subr.mxu1 %v1045_v39  ;;  %6526 = vmatprep.mubr.f32.mxu0 %v7261_v43 }
  0x89   :  { %6606 = vmatpush3.msra.mxu0 %v850_v37  ;;  %6660 = vmatpush3.msra.mxu1 %v1045_v39  ;;  %v838_v37 = vld [vmem:[#allocation2 + $0x210] sm:$0xff]  ;;  %v1033_v39 = vld [vmem:[#allocation2 + $0x298] sm:$0xff] }
  0x8a   :  { %6527 = vmatmul.mubr.f32.gmra.mxu0 %v7267_v44  ;;  %6607 = vmatprep.subr.mxu0 %v849_v45 }
  0x8b   :  { %6661 = vmatprep.subr.mxu1 %v1044_v46  ;;  %6582 = vmatprep.mubr.f32.mxu1 %v7105_v42 }
  0x8c   :  { %6608 = vmatpush3.msra.mxu0 %v849_v45  ;;  %6662 = vmatpush3.msra.mxu1 %v1044_v46  ;;  %v7347_v45 = vld [vmem:[%s8894_s0 + $0x102] sm:$0xff]  ;;  %v7352_v46 = vld [vmem:[%s8894_s0 + $0x112] sm:$0xff] }
  0x8d   :  { %6609 = vmatprep.subr.mxu0 %v848_v35  ;;  %6583 = vmatmul.mubr.f32.gmra.mxu1 %v7118_v48 }
  0x8e   :  { %6663 = vmatprep.subr.mxu1 %v1043_v51  ;;  %6529 = vmatprep.mubr.f32.mxu0 %v7275_v52 }
  0x8f   :  { %6610 = vmatpush3.msra.mxu0 %v848_v35  ;;  %6664 = vmatpush3.msra.mxu1 %v1043_v51  ;;  %v837_v35 = vld [vmem:[#allocation2 + $0x208] sm:$0xff]  ;;  %v1032_v51 = vld [vmem:[#allocation2 + $0x290] sm:$0xff] }
  0x90   :  { %6530 = vmatmul.mubr.f32.gmra.mxu0 %v7280_v53  ;;  %6611 = vmatprep.subr.mxu0 %v847_v54 }
  0x91   :  { %6665 = vmatprep.subr.mxu1 %v1042_v59  ;;  %6585 = vmatprep.mubr.f32.mxu1 %v7128_v50 }
  0x92   :  { %6612 = vmatpush3.msra.mxu0 %v847_v54  ;;  %6666 = vmatpush3.msra.mxu1 %v1042_v59  ;;  %v836_v54 = vld [vmem:[#allocation2 + $0x200] sm:$0xff] }
  0x93   :  { %6613 = vmatprep.subr.mxu0 %v846_v60  ;;  %6586 = vmatmul.mubr.f32.gmra.mxu1 %v7142_v56  ;;  %v7360_v59 = vld [vmem:[%s8894_s0 + $0x120] sm:$0xff] }
  0x94   :  { %6667 = vmatprep.subr.mxu1 %v1041_v61  ;;  %6532 = vmatprep.mubr.f32.mxu0 %v7289_v62 }
  0x95   :  { %6614 = vmatpush3.msra.mxu0 %v846_v60  ;;  %6668 = vmatpush3.msra.mxu1 %v1041_v61  ;;  %v1031_v60 = vld [vmem:[#allocation2 + $0x288] sm:$0xff]  ;;  %v1030_v61 = vld [vmem:[#allocation2 + $0x280] sm:$0xff] }
  0x96   :  { %6533 = vmatmul.mubr.f32.gmra.mxu0 %v7294_v63  ;;  %6615 = vmatprep.subr.mxu0 %v845_v0 }
  0x97   :  { %6669 = vmatprep.subr.mxu1 %v1040_v3  ;;  %6588 = vmatprep.mubr.f32.mxu1 %v7152_v58 }
  0x98   :  { %6616 = vmatpush3.msra.mxu0 %v845_v0  ;;  %6670 = vmatpush3.msra.mxu1 %v1040_v3  ;;  %v1240_v0 = vld [vmem:[#allocation2 + $0x378] sm:$0xff]  ;;  %v1239_v3 = vld [vmem:[#allocation2 + $0x370] sm:$0xff] }
  0x99   :  { %6617 = vmatprep.subr.mxu0 %v844_v4  ;;  %6589 = vmatmul.mubr.f32.gmra.mxu1 %v7302_v5 }
  0x9a   :  { %6671 = vmatprep.subr.mxu1 %v1039_v6  ;;  %6535 = vmatprep.mubr.f32.mxu0 %v438_v11  ;;  %v1433_v11 = vld [vmem:[#allocation2 + $0x3f0] sm:$0xff] }
  0x9b   :  { %6618 = vmatpush3.msra.mxu0 %v844_v4  ;;  %6672 = vmatpush3.msra.mxu1 %v1039_v6  ;;  %v1434_v4 = vld [vmem:[#allocation2 + $0x3f8] sm:$0xff]  ;;  %v1238_v6 = vld [vmem:[#allocation2 + $0x368] sm:$0xff] }
  0x9c   :  { %6536 = vmatmul.mubr.f32.gmra.mxu0 %v7311_v12  ;;  %6619 = vmatprep.subr.mxu0 %v843_v13 }
  0x9d   :  { %6673 = vmatprep.subr.mxu1 %v1038_v14  ;;  %6591 = vmatprep.mubr.f32.mxu1 %v7172_v2  ;;  %v840_v2 = vld [vmem:[#allocation2 + $0x220] sm:$0xff] }
  0x9e   :  { %6620 = vmatpush3.msra.mxu0 %v843_v13  ;;  %6674 = vmatpush3.msra.mxu1 %v1038_v14  ;;  %v1432_v13 = vld [vmem:[#allocation2 + $0x3e8] sm:$0xff]  ;;  %v1431_v14 = vld [vmem:[#allocation2 + $0x3e0] sm:$0xff] }
  0x9f   :  { %6621 = vmatprep.subr.mxu0 %v842_v19  ;;  %6592 = vmatmul.mubr.f32.gmra.mxu1 %v7184_v8 }
  0xa0   :  { %6675 = vmatprep.subr.mxu1 %v1037_v20  ;;  %6538 = vmatprep.mubr.f32.mxu0 %v7319_v21 }
  0xa1   :  { %6622 = vmatpush3.msra.mxu0 %v842_v19  ;;  %6676 = vmatpush3.msra.mxu1 %v1037_v20  ;;  %v1235_v19 = vld [vmem:[#allocation2 + $0x350] sm:$0xff]  ;;  %v1430_v20 = vld [vmem:[#allocation2 + $0x3d8] sm:$0xff] }
  0xa2   :  { %6539 = vmatmul.mubr.f32.gmra.mxu0 %v7324_v22  ;;  %6623 = vmatprep.subr.mxu0 %v841_v27 }
  0xa3   :  { %6677 = vmatprep.subr.mxu1 %v1036_v28  ;;  %6594 = vmatprep.mubr.f32.mxu1 %v7194_v10 }
  0xa4   :  { %6624 = vmatpush3.msra.mxu0 %v841_v27  ;;  %6678 = vmatpush3.msra.mxu1 %v1036_v28  ;;  %v7378_v27 = vld [vmem:[%s8894_s0 + $0x81] sm:$0xff] }
  0xa5   :  { %6625 = vmatprep.subr.mxu0 %v840_v2  ;;  %6595 = vmatmul.mubr.f32.gmra.mxu1 %v7208_v16  ;;  %v1234_v28 = vld [vmem:[#allocation2 + $0x348] sm:$0xff] }
  0xa6   :  { %6679 = vmatprep.subr.mxu1 %v1035_v29  ;;  %6541 = vmatprep.mubr.f32.mxu0 %v7333_v30 }
  0xa7   :  { %6626 = vmatpush3.msra.mxu0 %v840_v2  ;;  %6680 = vmatpush3.msra.mxu1 %v1035_v29  ;;  %v1429_v2 = vld [vmem:[#allocation2 + $0x3d0] sm:$0xff]  ;;  %v1233_v29 = vld [vmem:[#allocation2 + $0x340] sm:$0xff] }
  0xa8   :  { %6542 = vmatmul.mubr.f32.gmra.mxu0 %v7338_v31  ;;  %6627 = vmatprep.subr.mxu0 %v839_v33 }
  0xa9   :  { %6681 = vmatprep.subr.mxu1 %v1034_v36  ;;  %6597 = vmatprep.mubr.f32.mxu1 %v7218_v18 }
  0xaa   :  { %6628 = vmatpush3.msra.mxu0 %v839_v33  ;;  %6682 = vmatpush3.msra.mxu1 %v1034_v36  ;;  %v7386_v33 = vld [vmem:[%s8894_s0 + $0x82] sm:$0xff] }
  0xab   :  { %6629 = vmatprep.subr.mxu0 %v838_v37  ;;  %6598 = vmatmul.mubr.f32.gmra.mxu1 %v7232_v24  ;;  %v1428_v36 = vld [vmem:[#allocation2 + $0x3c8] sm:$0xff] }
  0xac   :  { %6683 = vmatprep.subr.mxu1 %v1033_v39  ;;  %6544 = vmatprep.mubr.f32.mxu0 %v7347_v45 }
  0xad   :  { %6630 = vmatpush3.msra.mxu0 %v838_v37  ;;  %6684 = vmatpush3.msra.mxu1 %v1033_v39  ;;  %v1232_v37 = vld [vmem:[#allocation2 + $0x338] sm:$0xff]  ;;  %v1427_v39 = vld [vmem:[#allocation2 + $0x3c0] sm:$0xff] }
  0xae   :  { %6545 = vmatmul.mubr.f32.gmra.mxu0 %v7352_v46  ;;  %6631 = vmatprep.subr.mxu0 %v837_v35 }
  0xaf   :  { %6685 = vmatprep.subr.mxu1 %v1032_v51  ;;  %6600 = vmatprep.mubr.f32.mxu1 %v7242_v26 }
  0xb0   :  { %6632 = vmatpush3.msra.mxu0 %v837_v35  ;;  %6686 = vmatpush3.msra.mxu1 %v1032_v51  ;;  %v1231_v35 = vld [vmem:[#allocation2 + $0x330] sm:$0xff]  ;;  %v1426_v51 = vld [vmem:[#allocation2 + $0x3b8] sm:$0xff] }
  0xb1   :  { %6633 = vmatprep.subr.mxu0 %v836_v54  ;;  %6601 = vmatmul.mubr.f32.gmra.mxu1 %v7360_v59 }
  0xb2   :  { %6687 = vmatprep.subr.mxu1 %v1031_v60  ;;  %6634 = vmatpush3.msra.mxu0 %v836_v54  ;;  %v1230_v54 = vld [vmem:[#allocation2 + $0x328] sm:$0xff] }
  0xb3   :  { %6635 = vmatprep.mubr.f32.mxu0 %v7077_v34  ;;  %6688 = vmatpush3.msra.mxu1 %v1031_v60  ;;  %v1237_v34 = vld [vmem:[#allocation2 + $0x360] sm:$0xff]  ;;  %v1425_v60 = vld [vmem:[#allocation2 + $0x3b0] sm:$0xff] }
  0xb4   :  { %6636 = vmatmul.mubr.f32.vlgmr.msra.gmra.mxu0 %v7087_v38  ;;  %6689 = vmatprep.subr.mxu1 %v1030_v61 }
  0xb5   :  { %6715 = vmatprep.subr.mxu0 %v1240_v0  ;;  %6690 = vmatpush3.msra.mxu1 %v1030_v61  ;;  %v1424_v61 = vld [vmem:[#allocation2 + $0x3a8] sm:$0xff] }
  0xb6   :  { %6691 = vmatprep.mubr.f32.mxu1 %v7254_v32  ;;  %6716 = vmatpush3.msra.mxu0 %v1240_v0  ;;  %v1236_v32 = vld [vmem:[#allocation2 + $0x358] sm:$0xff]  ;;  %v1423_v0 = vld [vmem:[#allocation2 + $0x3a0] sm:$0xff] }
  0xb7   :  { %6692 = vmatmul.mubr.f32.vlgmr.msra.gmra.mxu1 %v7261_v43  ;;  %6717 = vmatprep.subr.mxu0 %v1239_v3 }
  0xb8   :  { %6771 = vmatprep.subr.mxu1 %v1434_v4  ;;  %6638 = vmatprep.mubr.f32.mxu0 %v7100_v41 }
  0xb9   :  { %6718 = vmatpush3.msra.mxu0 %v1239_v3  ;;  %6772 = vmatpush3.msra.mxu1 %v1434_v4  ;;  %v1227_v3 = vld [vmem:[#allocation2 + $0x310] sm:$0xff]  ;;  %v1422_v4 = vld [vmem:[#allocation2 + $0x398] sm:$0xff] }
  0xba   :  { %6639 = vmatmul.mubr.f32.gmra.mxu0 %v7113_v47  ;;  %6719 = vmatprep.subr.mxu0 %v1238_v6 }
  0xbb   :  { %6773 = vmatprep.subr.mxu1 %v1433_v11  ;;  %6694 = vmatprep.mubr.f32.mxu1 %v7267_v44 }
  0xbc   :  { %6720 = vmatpush3.msra.mxu0 %v1238_v6  ;;  %6774 = vmatpush3.msra.mxu1 %v1433_v11  ;;  %v7404_v6 = vld [vmem:[%s8894_s0 + $0x121] sm:$0xff] }
  0xbd   :  { %6721 = vmatprep.subr.mxu0 %v1237_v34  ;;  %6695 = vmatmul.mubr.f32.gmra.mxu1 %v7275_v52  ;;  %v1226_v11 = vld [vmem:[#allocation2 + $0x308] sm:$0xff] }
  0xbe   :  { %6775 = vmatprep.subr.mxu1 %v1432_v13  ;;  %6641 = vmatprep.mubr.f32.mxu0 %v7123_v49 }
  0xbf   :  { %6722 = vmatpush3.msra.mxu0 %v1237_v34  ;;  %6776 = vmatpush3.msra.mxu1 %v1432_v13  ;;  %v1421_v34 = vld [vmem:[#allocation2 + $0x390] sm:$0xff]  ;;  %v1225_v13 = vld [vmem:[#allocation2 + $0x300] sm:$0xff] }
  0xc0   :  { %6642 = vmatmul.mubr.f32.gmra.mxu0 %v7137_v55  ;;  %6723 = vmatprep.subr.mxu0 %v1236_v32 }
  0xc1   :  { %6777 = vmatprep.subr.mxu1 %v1431_v14  ;;  %6697 = vmatprep.mubr.f32.mxu1 %v7280_v53 }
  0xc2   :  { %6724 = vmatpush3.msra.mxu0 %v1236_v32  ;;  %6778 = vmatpush3.msra.mxu1 %v1431_v14  ;;  %v7412_v32 = vld [vmem:[%s8894_s0 + $0x122] sm:$0xff] }
  0xc3   :  { %6725 = vmatprep.subr.mxu0 %v1235_v19  ;;  %6698 = vmatmul.mubr.f32.gmra.mxu1 %v7289_v62  ;;  %v1420_v14 = vld [vmem:[#allocation2 + $0x388] sm:$0xff] }
  0xc4   :  { %6779 = vmatprep.subr.mxu1 %v1430_v20  ;;  %6644 = vmatprep.mubr.f32.mxu0 %v7147_v57 }
  0xc5   :  { %6726 = vmatpush3.msra.mxu0 %v1235_v19  ;;  %6780 = vmatpush3.msra.mxu1 %v1430_v20  ;;  %v1419_v19 = vld [vmem:[#allocation2 + $0x380] sm:$0xff]  ;;  %v1628_v20 = vld [vmem:[#allocation2 + $0x478] sm:$0xff] }
  0xc6   :  { %6645 = vmatmul.mubr.f32.gmra.mxu0 %v7378_v27  ;;  %6727 = vmatprep.subr.mxu0 %v1234_v28 }
  0xc7   :  { %6781 = vmatprep.subr.mxu1 %v1429_v2  ;;  %6700 = vmatprep.mubr.f32.mxu1 %v7294_v63 }
  0xc8   :  { %6728 = vmatpush3.msra.mxu0 %v1234_v28  ;;  %6782 = vmatpush3.msra.mxu1 %v1429_v2  ;;  %v1627_v28 = vld [vmem:[#allocation2 + $0x470] sm:$0xff]  ;;  %v1626_v2 = vld [vmem:[#allocation2 + $0x468] sm:$0xff] }
  0xc9   :  { %6729 = vmatprep.subr.mxu0 %v1233_v29  ;;  %6701 = vmatmul.mubr.f32.gmra.mxu1 %v7386_v33 }
  0xca   :  { %6783 = vmatprep.subr.mxu1 %v1428_v36  ;;  %6647 = vmatprep.mubr.f32.mxu0 %v7167_v1  ;;  %v1229_v1 = vld [vmem:[#allocation2 + $0x320] sm:$0xff] }
  0xcb   :  { %6730 = vmatpush3.msra.mxu0 %v1233_v29  ;;  %6784 = vmatpush3.msra.mxu1 %v1428_v36 }
  0xcc   :  { %6648 = vmatmul.mubr.f32.gmra.mxu0 %v7179_v7  ;;  %6731 = vmatprep.subr.mxu0 %v1232_v37 }
  0xcd   :  { %6785 = vmatprep.subr.mxu1 %v1427_v39  ;;  %6703 = vmatprep.mubr.f32.mxu1 %v7311_v12  ;;  %v1228_v12 = vld [vmem:[#allocation2 + $0x318] sm:$0xff] }
  0xce   :  { %6732 = vmatpush3.msra.mxu0 %v1232_v37  ;;  %6786 = vmatpush3.msra.mxu1 %v1427_v39 }
  0xcf   :  { %6733 = vmatprep.subr.mxu0 %v1231_v35  ;;  %6704 = vmatmul.mubr.f32.gmra.mxu1 %v7319_v21 }
  0xd0   :  { %6787 = vmatprep.subr.mxu1 %v1426_v51  ;;  %6650 = vmatprep.mubr.f32.mxu0 %v7189_v9 }
  0xd1   :  { %6734 = vmatpush3.msra.mxu0 %v1231_v35  ;;  %6788 = vmatpush3.msra.mxu1 %v1426_v51 }
  0xd2   :  { %6651 = vmatmul.mubr.f32.gmra.mxu0 %v7203_v15  ;;  %6735 = vmatprep.subr.mxu0 %v1230_v54 }
  0xd3   :  { %6789 = vmatprep.subr.mxu1 %v1425_v60  ;;  %6706 = vmatprep.mubr.f32.mxu1 %v7324_v22 }
  0xd4   :  { %6736 = vmatpush3.msra.mxu0 %v1230_v54  ;;  %6790 = vmatpush3.msra.mxu1 %v1425_v60 }
  0xd5   :  { %6737 = vmatprep.subr.mxu0 %v1229_v1  ;;  %6707 = vmatmul.mubr.f32.gmra.mxu1 %v7333_v30 }
  0xd6   :  { %6791 = vmatprep.subr.mxu1 %v1424_v61  ;;  %6653 = vmatprep.mubr.f32.mxu0 %v7213_v17 }
  0xd7   :  { %6738 = vmatpush3.msra.mxu0 %v1229_v1  ;;  %6792 = vmatpush3.msra.mxu1 %v1424_v61 }
  0xd8   :  { %6654 = vmatmul.mubr.f32.gmra.mxu0 %v7227_v23  ;;  %6739 = vmatprep.subr.mxu0 %v1228_v12 }
  0xd9   :  { %6793 = vmatprep.subr.mxu1 %v1423_v0  ;;  %6709 = vmatprep.mubr.f32.mxu1 %v7338_v31 }
  0xda   :  { %6740 = vmatpush3.msra.mxu0 %v1228_v12  ;;  %6794 = vmatpush3.msra.mxu1 %v1423_v0 }
  0xdb   :  { %6741 = vmatprep.subr.mxu0 %v1227_v3  ;;  %6710 = vmatmul.mubr.f32.gmra.mxu1 %v7347_v45 }
  0xdc   :  { %6795 = vmatprep.subr.mxu1 %v1422_v4  ;;  %6656 = vmatprep.mubr.f32.mxu0 %v7237_v25 }
  0xdd   :  { %6742 = vmatpush3.msra.mxu0 %v1227_v3  ;;  %6796 = vmatpush3.msra.mxu1 %v1422_v4 }
  0xde   :  { %6657 = vmatmul.mubr.f32.gmra.mxu0 %v7404_v6  ;;  %6743 = vmatprep.subr.mxu0 %v1226_v11 }
  0xdf   :  { %6797 = vmatprep.subr.mxu1 %v1421_v34  ;;  %6712 = vmatprep.mubr.f32.mxu1 %v7352_v46 }
  0xe0   :  { %6744 = vmatpush3.msra.mxu0 %v1226_v11  ;;  %6798 = vmatpush3.msra.mxu1 %v1421_v34 }
  0xe1   :  { %6745 = vmatprep.subr.mxu0 %v1225_v13  ;;  %6713 = vmatmul.mubr.f32.gmra.mxu1 %v7412_v32 }
  0xe2   :  { %6799 = vmatprep.subr.mxu1 %v1420_v14  ;;  %6746 = vmatpush3.msra.mxu0 %v1225_v13 }
  0xe3   :  { %6747 = vmatprep.mubr.f32.mxu0 %v7094_v40  ;;  %6800 = vmatpush3.msra.mxu1 %v1420_v14  ;;  %v1625_v40 = vld [vmem:[#allocation2 + $0x460] sm:$0xff] }
  0xe4   :  { %6748 = vmatmul.mubr.f32.vlgmr.msra.gmra.mxu0 %v7105_v42  ;;  %6801 = vmatprep.subr.mxu1 %v1419_v19  ;;  %v1624_v42 = vld [vmem:[#allocation2 + $0x458] sm:$0xff] }
  0xe5   :  { %6827 = vmatprep.subr.mxu0 %v1628_v20  ;;  %6802 = vmatpush3.msra.mxu1 %v1419_v19 }
  0xe6   :  { %6803 = vmatprep.mubr.f32.mxu1 %v7087_v38  ;;  %6828 = vmatpush3.msra.mxu0 %v1628_v20  ;;  %v1623_v38 = vld [vmem:[#allocation2 + $0x450] sm:$0xff] }
  0xe7   :  { %6804 = vmatmul.mubr.f32.vlgmr.msra.gmra.mxu1 %v7100_v41  ;;  %6829 = vmatprep.subr.mxu0 %v1627_v28  ;;  %v5464_v41 = vld [vmem:[%s8894_s0 + $0x90] sm:$0xff] }
  0xe8   :  { %6750 = vmatprep.mubr.f32.mxu0 %v7118_v48  ;;  %6830 = vmatpush3.msra.mxu0 %v1627_v28  ;;  %v5480_v48 = vld [vmem:[%s8894_s0 + $0x91] sm:$0xff] }
  0xe9   :  { %6806 = vmatprep.mubr.f32.mxu1 %v7113_v47  ;;  %6751 = vmatmul.mubr.f32.gmra.mxu0 %v7128_v50  ;;  %v1622_v47 = vld [vmem:[#allocation2 + $0x448] sm:$0xff]  ;;  %v1620_v50 = vld [vmem:[#allocation2 + $0x438] sm:$0xff] }
  0xea   :  { %6831 = vmatprep.subr.mxu0 %v1626_v2  ;;  %6753 = vmatprep.mubr.f32.mxu0 %v7142_v56  ;;  %v1618_v56 = vld [vmem:[#allocation2 + $0x428] sm:$0xff] }
  0xeb   :  { %6832 = vmatpush3.msra.mxu0 %v1626_v2  ;;  %6807 = vmatmul.mubr.f32.gmra.mxu1 %v7123_v49  ;;  %v1621_v49 = vld [vmem:[#allocation2 + $0x440] sm:$0xff] }
  0xec   :  { %6833 = vmatprep.subr.mxu0 %v1625_v40  ;;  %6809 = vmatprep.mubr.f32.mxu1 %v7137_v55  ;;  %v1619_v55 = vld [vmem:[#allocation2 + $0x430] sm:$0xff] }
  0xed   :  { %6834 = vmatpush3.msra.mxu0 %v1625_v40 }
  0xee   :  { %6754 = vmatmul.mubr.f32.gmra.mxu0 %v7152_v58  ;;  %6835 = vmatprep.subr.mxu0 %v1624_v42  ;;  %v1616_v58 = vld [vmem:[#allocation2 + $0x418] sm:$0xff] }
  0xef   :  { %6836 = vmatpush3.msra.mxu0 %v1624_v42  ;;  %6810 = vmatmul.mubr.f32.gmra.mxu1 %v7147_v57  ;;  %v1617_v57 = vld [vmem:[#allocation2 + $0x420] sm:$0xff] }
  0xf0   :  { %6837 = vmatprep.subr.mxu0 %v1623_v38  ;;  %6756 = vmatprep.mubr.f32.mxu0 %v7302_v5 }
  0xf1   :  { %6838 = vmatpush3.msra.mxu0 %v1623_v38  ;;  %6812 = vmatprep.mubr.f32.mxu1 %v7378_v27 }
  0xf2   :  { %6757 = vmatmul.mubr.f32.gmra.mxu0 %v5464_v41  ;;  %6839 = vmatprep.subr.mxu0 %v1622_v47 }
  0xf3   :  { %6840 = vmatpush3.msra.mxu0 %v1622_v47  ;;  %6813 = vmatmul.mubr.f32.gmra.mxu1 %v5480_v48 }
  0xf4   :  { %6841 = vmatprep.subr.mxu0 %v1621_v49  ;;  %6759 = vmatprep.mubr.f32.mxu0 %v7184_v8  ;;  %v5472_v8 = vld [vmem:[%s8894_s0 + $0x130] sm:$0xff] }
  0xf5   :  { %6842 = vmatpush3.msra.mxu0 %v1621_v49  ;;  %6815 = vmatprep.mubr.f32.mxu1 %v7179_v7  ;;  %v1615_v7 = vld [vmem:[#allocation2 + $0x410] sm:$0xff] }
  0xf6   :  { %6760 = vmatmul.mubr.f32.gmra.mxu0 %v7194_v10  ;;  %6843 = vmatprep.subr.mxu0 %v1620_v50  ;;  %v5488_v10 = vld [vmem:[%s8894_s0 + $0x131] sm:$0xff] }
  0xf7   :  { %6844 = vmatpush3.msra.mxu0 %v1620_v50  ;;  %6816 = vmatmul.mubr.f32.gmra.mxu1 %v7189_v9  ;;  %v1614_v9 = vld [vmem:[#allocation2 + $0x408] sm:$0xff] }
  0xf8   :  { %6845 = vmatprep.subr.mxu0 %v1619_v55  ;;  %6762 = vmatprep.mubr.f32.mxu0 %v7208_v16  ;;  %v5496_v16 = vld [vmem:[%s8894_s0 + $0x92] sm:$0xff] }
  0xf9   :  { %6846 = vmatpush3.msra.mxu0 %v1619_v55  ;;  %6818 = vmatprep.mubr.f32.mxu1 %v7203_v15  ;;  %v1613_v15 = vld [vmem:[#allocation2 + $0x400] sm:$0xff] }
  0xfa   :  { %6763 = vmatmul.mubr.f32.gmra.mxu0 %v7218_v18  ;;  %6847 = vmatprep.subr.mxu0 %v1618_v56 }
  0xfb   :  { %6848 = vmatpush3.msra.mxu0 %v1618_v56  ;;  %6819 = vmatmul.mubr.f32.gmra.mxu1 %v7213_v17 }
  0xfc   :  { %6849 = vmatprep.subr.mxu0 %v1617_v57  ;;  %6765 = vmatprep.mubr.f32.mxu0 %v7232_v24 }
  0xfd   :  { %6850 = vmatpush3.msra.mxu0 %v1617_v57  ;;  %6821 = vmatprep.mubr.f32.mxu1 %v7227_v23 }
  0xfe   :  { %6766 = vmatmul.mubr.f32.gmra.mxu0 %v7242_v26  ;;  %6851 = vmatprep.subr.mxu0 %v1616_v58 }
  0xff   :  { %6852 = vmatpush3.msra.mxu0 %v1616_v58  ;;  %6822 = vmatmul.mubr.f32.gmra.mxu1 %v7237_v25 }
 0x100   :  { %6853 = vmatprep.subr.mxu0 %v1615_v7  ;;  %6768 = vmatprep.mubr.f32.mxu0 %v7360_v59 }
 0x101   :  { %6854 = vmatpush3.msra.mxu0 %v1615_v7  ;;  %6824 = vmatprep.mubr.f32.mxu1 %v7404_v6 }
 0x102   :  { %6769 = vmatmul.mubr.f32.gmra.mxu0 %v5472_v8  ;;  %6855 = vmatprep.subr.mxu0 %v1614_v9 }
 0x103   :  { %6856 = vmatpush3.msra.mxu0 %v1614_v9  ;;  %6825 = vmatmul.mubr.f32.gmra.mxu1 %v5488_v10 }
 0x104   :  { %6857 = vmatprep.subr.mxu0 %v1613_v15  ;;  %6859 = vmatprep.mubr.f32.mxu0 %v7261_v43 }
 0x105   :  { %6858 = vmatpush3.msra.mxu0 %v1613_v15 }
 0x106   :  { %6860 = vmatmul.mubr.f32.vlgmr.msra.gmra.mxu0 %v7267_v44 }
 0x107   :  { %6862 = vmatprep.mubr.f32.mxu0 %v7275_v52 }
 0x10a   :  { %6863 = vmatmul.mubr.f32.gmra.mxu0 %v7280_v53 }
 0x10b   :  { %6865 = vmatprep.mubr.f32.mxu0 %v7289_v62  ;;  %v5504_v62 = vld [vmem:[%s8894_s0 + $0x132] sm:$0xff] }
 0x10e   :  { %6866 = vmatmul.mubr.f32.gmra.mxu0 %v7294_v63 }
 0x10f   :  { %6868 = vmatprep.mubr.f32.mxu0 %v7386_v33 }
 0x112   :  { %6869 = vmatmul.mubr.f32.gmra.mxu0 %v5496_v16 }
 0x113   :  { %6871 = vmatprep.mubr.f32.mxu0 %v7319_v21 }
 0x115   :  { %v6413_v17 = vpop.f32.mrf.mxu0 }
 0x116   :  { %6872 = vmatmul.mubr.f32.gmra.mxu0 %v7324_v22  ;;  %v6469_v18 = vpop.f32.mrf.mxu1 }
 0x117   :  { %6874 = vmatprep.mubr.f32.mxu0 %v7333_v30  ;;  %v357_v23 = vadd.f32 %v6469_v18, %v6413_v17  ;;  %v7469_v24 = vpop.f32.mrf.mxu0 }
 0x118   :  { %v7471_v25 = vpop.f32.mrf.mxu1 }
 0x11a   :  { %6875 = vmatmul.mubr.f32.gmra.mxu0 %v7338_v31  ;;  %v6416_v26 = vpop.f32.mrf.mxu0 }
 0x11b   :  { %6877 = vmatprep.mubr.f32.mxu0 %v7347_v45  ;;  %v6472_v43 = vpop.f32.mrf.mxu1 }
 0x11c   :  { %v367_v44 = vadd.f32 %v6472_v43, %v6416_v26  ;;  %v7475_v52 = vpop.f32.mrf.mxu0 }
 0x11d   :  { %v7477_v53 = vpop.f32.mrf.mxu1 }
 0x11e   :  { %6878 = vmatmul.mubr.f32.gmra.mxu0 %v7352_v46 }
 0x11f   :  { %6880 = vmatprep.mubr.f32.mxu0 %v7412_v32 }
 0x120   :  { %v6419_v63 = vpop.f32.mrf.mxu0 }
 0x121   :  { %v6475_v5 = vpop.f32.mrf.mxu1 }
 0x122   :  { %6881 = vmatmul.mubr.f32.gmra.mxu0 %v5504_v62  ;;  %v377_v21 = vadd.f32 %v6475_v5, %v6419_v63  ;;  %v7484_v22 = vpop.f32.mrf.mxu0 }
 0x123   :  { %v7486_v30 = vpop.f32.mrf.mxu1 }
 0x126   :  { %v6422_v31 = vpop.f32.mrf.mxu0 }
 0x127   :  { %v6478_v45 = vpop.f32.mrf.mxu1 }
 0x128   :  { %v387_v59 = vadd.f32 %v6478_v45, %v6422_v31  ;;  %v7488_v27 = vpop.f32.mrf.mxu0 }
 0x129   :  { %v7490_v46 = vpop.f32.mrf.mxu1 }
 0x12c   :  { %v6425_v29 = vpop.f32.mrf.mxu0 }
 0x12d   :  { %v6481_v33 = vpop.f32.mrf.mxu1 }
 0x12e   :  { %v397_v36 = vadd.f32 %v6481_v33, %v6425_v29  ;;  %v7492_v37 = vpop.f32.mrf.mxu0 }
 0x12f   :  { %v7494_v39 = vpop.f32.mrf.mxu1 }
 0x132   :  { %v6428_v35 = vpop.f32.mrf.mxu0 }
 0x133   :  { %v6484_v51 = vpop.f32.mrf.mxu1 }
 0x134   :  { %v407_v54 = vadd.f32 %v6484_v51, %v6428_v35  ;;  %v7496_v60 = vpop.f32.mrf.mxu0 }
 0x135   :  { %v7498_v1 = vpop.f32.mrf.mxu1 }
 0x138   :  { %v6431_v61 = vpop.f32.mrf.mxu0 }
 0x139   :  { %v6487_v12 = vpop.f32.mrf.mxu1 }
 0x13a   :  { %v417_v0 = vadd.f32 %v6487_v12, %v6431_v61  ;;  %v7500_v3 = vpop.f32.mrf.mxu0 }
 0x13b   :  { %v7502_v4 = vpop.f32.mrf.mxu1 }
 0x13e   :  { %v6434_v6 = vpop.f32.mrf.mxu0 }
 0x13f   :  { %v6490_v11 = vpop.f32.mrf.mxu1 }
 0x140   :  { %v427_v34 = vadd.f32 %v6490_v11, %v6434_v6  ;;  %v7504_v13 = vpop.f32.mrf.mxu0 }
 0x141   :  { %v7506_v14 = vpop.f32.mrf.mxu1 }
 0x144   :  { %v6525_v32 = vpop.f32.mrf.mxu0 }
 0x145   :  { %v609_v19 = vadd.f32 %v6525_v32, %v357_v23 }
 0x146   :  { %v7508_v20 = vpop.f32.mrf.mxu0 }
 0x147   :  { %v6581_v28 = vpop.f32.mrf.mxu1 }
 0x148   :  { %v804_v2 = vadd.f32 %v6581_v28, %v609_v19 }
 0x149   :  { %v7510_v42 = vpop.f32.mrf.mxu1 }
 0x14a   :  { %v6528_v40 = vpop.f32.mrf.mxu0 }
 0x14b   :  { %v611_v38 = vadd.f32 %v6528_v40, %v367_v44  ;;  %v8901_v40 = vmov 0.0  }
 0x14c   :  { %v7512_v41 = vpop.f32.mrf.mxu0  ;;  %2224 = vmatprep.mubr.f32.mxu1 %v8901_v40  ;;  %2218 = vmatprep.mubr.f32.mxu0 %v8901_v40 }
 0x14d   :  { %v6584_v47 = vpop.f32.mrf.mxu1 }
 0x14e   :  { %v806_v48 = vadd.f32 %v6584_v47, %v611_v38 }
 0x14f   :  { %v7514_v50 = vpop.f32.mrf.mxu1 }
 0x150   :  { %v6531_v49 = vpop.f32.mrf.mxu0 }
 0x151   :  { %v613_v55 = vadd.f32 %v6531_v49, %v377_v21 }
 0x152   :  { %v7516_v56 = vpop.f32.mrf.mxu0 }
 0x153   :  { %v6587_v57 = vpop.f32.mrf.mxu1 }
 0x154   :  { %v808_v58 = vadd.f32 %v6587_v57, %v613_v55 }
 0x155   :  { %v7518_v8 = vpop.f32.mrf.mxu1 }
 0x156   :  { %v6534_v7 = vpop.f32.mrf.mxu0 }
 0x157   :  { %v615_v9 = vadd.f32 %v6534_v7, %v387_v59 }
 0x158   :  { %v7520_v10 = vpop.f32.mrf.mxu0 }
 0x159   :  { %v6590_v15 = vpop.f32.mrf.mxu1 }
 0x15a   :  { %v810_v16 = vadd.f32 %v6590_v15, %v615_v9 }
 0x15b   :  { %v7522_v18 = vpop.f32.mrf.mxu1 }
 0x15c   :  { %v6537_v17 = vpop.f32.mrf.mxu0 }
 0x15d   :  { %v617_v23 = vadd.f32 %v6537_v17, %v397_v36 }
 0x15e   :  { %v7524_v26 = vpop.f32.mrf.mxu0 }
 0x15f   :  { %v6593_v43 = vpop.f32.mrf.mxu1 }
 0x160   :  { %v812_v44 = vadd.f32 %v6593_v43, %v617_v23 }
 0x161   :  { %v7526_v63 = vpop.f32.mrf.mxu1 }
 0x162   :  { %v6540_v62 = vpop.f32.mrf.mxu0 }
 0x163   :  { %v619_v5 = vadd.f32 %v6540_v62, %v407_v54 }
 0x164   :  { %v7528_v21 = vpop.f32.mrf.mxu0 }
 0x165   :  { %v6596_v31 = vpop.f32.mrf.mxu1 }
 0x166   :  { %v814_v45 = vadd.f32 %v6596_v31, %v619_v5 }
 0x167   :  { %v7530_v29 = vpop.f32.mrf.mxu1 }
 0x168   :  { %v6543_v59 = vpop.f32.mrf.mxu0 }
 0x169   :  { %v7532_v33 = vadd.f32 %v6543_v59, %v417_v0 }
 0x16a   :  { %v7534_v35 = vpop.f32.mrf.mxu0 }
 0x16b   :  { %v7536_v36 = vpop.f32.mrf.mxu1 }
 0x16d   :  { %v7538_v61 = vpop.f32.mrf.mxu1 }
 0x16e   :  { %v6546_v51 = vpop.f32.mrf.mxu0 }
 0x16f   :  { %v7540_v12 = vadd.f32 %v6546_v51, %v427_v34 }
 0x170   :  { %v7542_v6 = vpop.f32.mrf.mxu0 }
 0x171   :  { %v7544_v54 = vpop.f32.mrf.mxu1 }
 0x173   :  { %v7546_v11 = vpop.f32.mrf.mxu1 }
 0x174   :  { %v6637_v32 = vpop.f32.mrf.mxu0 }
 0x175   :  { %v7548_v19 = vadd.f32 %v6637_v32, %v804_v2 }
 0x176   :  { %v7550_v0 = vpop.f32.mrf.mxu0 }
 0x177   :  { %v7552_v28 = vpop.f32.mrf.mxu1 }
 0x179   :  { %v7556_v38 = vpop.f32.mrf.mxu1 }
 0x17a   :  { %v6640_v34 = vpop.f32.mrf.mxu0 }
 0x17b   :  { %v7558_v47 = vadd.f32 %v6640_v34, %v806_v48 }
 0x17c   :  { %v7560_v49 = vpop.f32.mrf.mxu0 }
 0x17d   :  { %v7562_v55 = vpop.f32.mrf.mxu1 }
 0x17f   :  { %v7564_v57 = vpop.f32.mrf.mxu1 }
 0x180   :  { %v6643_v2 = vpop.f32.mrf.mxu0 }
 0x181   :  { %v7566_v7 = vadd.f32 %v6643_v2, %v808_v58 }
 0x182   :  { %v7568_v9 = vpop.f32.mrf.mxu0 }
 0x183   :  { %v7570_v15 = vpop.f32.mrf.mxu1 }
 0x184   :  { %8956 = vst [vmem:[#allocation15_spill] sm:$0xff] %v7570_v15  ;;  %v1861_v15 = vlaneseq }
 0x185   :  { %v7572_v23 = vpop.f32.mrf.mxu1 }
 0x186   :  { %v6646_v17 = vpop.f32.mrf.mxu0  ;;  %8957 = vst [vmem:[#allocation16_spill] sm:$0xff] %v7572_v23 }
 0x187   :  { %v7574_v43 = vadd.f32 %v6646_v17, %v810_v16 }
 0x188   :  { %v7576_v48 = vpop.f32.mrf.mxu0 }
 0x189   :  { %8958 = vst [vmem:[#allocation17_spill] sm:$0xff] %v7574_v43  ;;  %v7578_v62 = vpop.f32.mrf.mxu1 }
 0x18a   :  { %8959 = vst [vmem:[#allocation18_spill] sm:$0xff] %v7578_v62 }
 0x18b   :  { %v7580_v31 = vpop.f32.mrf.mxu1 }
 0x18c   :  { %v6649_v5 = vpop.f32.mrf.mxu0  ;;  %8960 = vst [vmem:[#allocation19_spill] sm:$0xff] %v7580_v31 }
 0x18d   :  { %v7582_v59 = vadd.f32 %v6649_v5, %v812_v44 }
 0x18e   :  { %v7584_v58 = vpop.f32.mrf.mxu0 }
 0x18f   :  { %8961 = vst [vmem:[#allocation20_spill] sm:$0xff] %v7582_v59  ;;  %v7586_v51 = vpop.f32.mrf.mxu1 }
 0x190   :  { %8962 = vst [vmem:[#allocation21_spill] sm:$0xff] %v7586_v51 }
 0x191   :  { %v7588_v34 = vpop.f32.mrf.mxu1 }
 0x192   :  { %v6652_v32 = vpop.f32.mrf.mxu0  ;;  %8963 = vst [vmem:[#allocation22_spill] sm:$0xff] %v7588_v34 }
 0x193   :  { %v7590_v2 = vadd.f32 %v6652_v32, %v814_v45 }
 0x194   :  { %v7592_v16 = vpop.f32.mrf.mxu0 }
 0x195   :  { %8964 = vst [vmem:[#allocation23_spill] sm:$0xff] %v7590_v2  ;;  %v7594_v17 = vpop.f32.mrf.mxu1 }
 0x196   :  { %8965 = vst [vmem:[#allocation24_spill] sm:$0xff] %v7594_v17 }
 0x197   :  { %v7598_v62 = vpop.f32.mrf.mxu1 }
 0x198   :  { %v7596_v40 = vpop.f32.mrf.mxu0  ;;  %8967 = vst [vmem:[#allocation26_spill] sm:$0xff] %v7598_v62 }
 0x199   :  { %8966 = vst [vmem:[#allocation25_spill] sm:$0xff] %v7596_v40 }
 0x19a   :  { %v7600_v31 = vpop.f32.mrf.mxu0 }
 0x19b   :  { %8968 = vst [vmem:[#allocation27_spill] sm:$0xff] %v7600_v31  ;;  %v7602_v44 = vpop.f32.mrf.mxu1 }
 0x19c   :  { %8969 = vst [vmem:[#allocation28_spill] sm:$0xff] %v7602_v44 }
 0x19d   :  { %v7606_v51 = vpop.f32.mrf.mxu1 }
 0x19e   :  { %v7604_v5 = vpop.f32.mrf.mxu0  ;;  %8971 = vst [vmem:[#allocation30_spill] sm:$0xff] %v7606_v51 }
 0x19f   :  { %8970 = vst [vmem:[#allocation29_spill] sm:$0xff] %v7604_v5 }
 0x1a0   :  { %v7608_v59 = vpop.f32.mrf.mxu0 }
 0x1a1   :  { %8972 = vst [vmem:[#allocation31_spill] sm:$0xff] %v7608_v59  ;;  %v7610_v45 = vpop.f32.mrf.mxu1 }
 0x1a2   :  { %8973 = vst [vmem:[#allocation32_spill] sm:$0xff] %v7610_v45 }
 0x1a3   :  { %v7612_v32 = vpop.f32.mrf.mxu1 }
 0x1a4   :  { %8974 = vst [vmem:[#allocation33_spill] sm:$0xff] %v7612_v32  ;;  %v6749_v2 = vpop.f32.mrf.mxu0 }
 0x1a6   :  { %v1307_v17 = vpop.f32.mrf.mxu0 }
 0x1a7   :  { %v7614_v34 = vpop.f32.mrf.mxu1 }
 0x1a9   :  { %v7616_v43 = vpop.f32.mrf.mxu1  ;;  %v7618_v62 = vpop.f32.mrf.mxu0 }
 0x1aa   :  { %8975 = vst [vmem:[#allocation34_spill] sm:$0xff] %v7616_v43 }
 0x1ab   :  { %v7620_v31 = vpop.f32.mrf.mxu1  ;;  %v7622_v44 = vpop.f32.mrf.mxu0 }
 0x1ac   :  { %8976 = vst [vmem:[#allocation35_spill] sm:$0xff] %v7620_v31  ;;  %8977 = vst [vmem:[#allocation36_spill] sm:$0xff] %v7622_v44  ;;  %v352_v31 = vadd.f32 %v7471_v25, %v7469_v24 }
 0x1ad   :  { %v7624_v5 = vpop.f32.mrf.mxu1 }
 0x1ae   :  { %8978 = vst [vmem:[#allocation37_spill] sm:$0xff] %v7624_v5  ;;  %v7626_v51 = vpop.f32.mrf.mxu0  ;;  %v608_v5 = vadd.f32 %v7508_v20, %v352_v31  ;;  %v382_v20 = vadd.f32 %v7490_v46, %v7488_v27  ;;  %v392_v31 = vadd.f32 %v7494_v39, %v7492_v37  ;;  %v412_v27 = vadd.f32 %v7502_v4, %v7500_v3 }
 0x1af   :  { %8979 = vst [vmem:[#allocation38_spill] sm:$0xff] %v7626_v51  ;;  %v7628_v59 = vpop.f32.mrf.mxu1 }
 0x1b0   :  { %8980 = vst [vmem:[#allocation39_spill] sm:$0xff] %v7628_v59  ;;  %v7630_v45 = vpop.f32.mrf.mxu0  ;;  %v803_v24 = vadd.f32 %v7510_v42, %v608_v5  ;;  %v7669_v5 = vshrl.u32 %v1861_v15, 7  ;;  %v614_v46 = vadd.f32 %v7520_v10, %v382_v20  ;;  %v616_v37 = vadd.f32 %v7524_v26, %v392_v31 }
 0x1b1   :  { %8981 = vst [vmem:[#allocation40_spill] sm:$0xff] %v7630_v45  ;;  %v7632_v32 = vpop.f32.mrf.mxu1  ;;  %v7012_v45 = vmov 1966171168   ;;  %v620_v3 = vadd.f32 %v7534_v35, %v412_v27  ;;  %v8996_v27 = vld [vmem:[#allocation22_spill] sm:$0xff] }
 0x1b2   :  { %8982 = vst [vmem:[#allocation41_spill] sm:$0xff] %v7632_v32  ;;  %v7634_v40 = vpop.f32.mrf.mxu0  ;;  %v362_v32 = vadd.f32 %v7477_v53, %v7475_v52 }
 0x1b3   :  { %8983 = vst [vmem:[#allocation42_spill] sm:$0xff] %v7634_v40  ;;  %v7638_v43 = vpop.f32.mrf.mxu1  ;;  %v1859_v40 = vunpack.c.l.s4 %v7012_v45 }
 0x1b4   :  { %v7636_v23 = vpop.f32.mrf.mxu0  ;;  %8985 = vst [vmem:[#allocation44_spill] sm:$0xff] %v7638_v43  ;;  %v372_v43 = vadd.f32 %v7486_v30, %v7484_v22  ;;  %v610_v25 = vadd.f32 %v7512_v41, %v362_v32  ;;  %v402_v22 = vadd.f32 %v7498_v1, %v7496_v60  ;;  %v997_v30 = vadd.f32 %v7550_v0, %v803_v24  ;;  %v7723_v24 = vld [vmem:[#allocation5] ss:$0 sm:$0xff] }
 0x1b5   :  { %8984 = vst [vmem:[#allocation43_spill] sm:$0xff] %v7636_v23  ;;  %v7645_v51 = vpop.f32.mrf.mxu1  ;;  %v1860_v42 = vunpack.c.0.s8 %v1859_v40  ;;  %v1192_v60 = vadd.f32 %v7552_v28, %v7548_v19  ;;  %v422_v1 = vadd.f32 %v7506_v14, %v7504_v13  ;;  %v809_v19 = vadd.f32 %v7522_v18, %v614_v46 }
 0x1b6   :  { %v7642_v44 = vpop.f32.mrf.mxu0  ;;  %v612_v52 = vadd.f32 %v7516_v56, %v372_v43  ;;  %v805_v41 = vadd.f32 %v7514_v50, %v610_v25  ;;  %v618_v56 = vadd.f32 %v7528_v21, %v402_v22  ;;  %v1191_v26 = vadd.f32 %v7556_v38, %v997_v30  ;;  %v8989_v25 = vld [vmem:[#allocation17_spill] sm:$0xff]  ;;  %v8993_v22 = vld [vmem:[#allocation19_spill] sm:$0xff]  ;;  %v8994_v30 = vld [vmem:[#allocation20_spill] sm:$0xff] }
 0x1b7   :  { %v7662_v53 = vpop.f32.mrf.mxu1  ;;  %v1387_v40 = vadd.f32 %v6749_v2, %v1192_v60  ;;  %v7692_v21 = vsub.s32 %v1860_v42, %v7669_v5  ;;  %v811_v13 = vadd.f32 %v7526_v63, %v616_v37  ;;  %v622_v14 = vadd.f32 %v7542_v6, %v422_v1  ;;  %v8995_v42 = vld [vmem:[#allocation21_spill] sm:$0xff]  ;;  %v8997_v37 = vld [vmem:[#allocation23_spill] sm:$0xff] }
 0x1b8   :  { %v7647_v59 = vpop.f32.mrf.mxu0  ;;  %v807_v0 = vadd.f32 %v7518_v8, %v612_v52  ;;  %v999_v50 = vadd.f32 %v7560_v49, %v805_v41  ;;  %v813_v28 = vadd.f32 %v7530_v29, %v618_v56  ;;  %v816_v38 = vadd.f32 %v7536_v36, %v7532_v33  ;;  %v8998_v41 = vld [vmem:[#allocation24_spill] sm:$0xff] }
 0x1b9   :  { %v7685_v4 = vpop.f32.mrf.mxu1  ;;  %v1194_v49 = vadd.f32 %v7562_v55, %v7558_v47  ;;  %v1386_v15 = vadd.f32 %v1307_v17, %v1191_v26  ;;  %v815_v43 = vadd.f32 %v7538_v61, %v620_v3  ;;  %v818_v18 = vadd.f32 %v7544_v54, %v7540_v12  ;;  %v8986_v12 = vld [vmem:[#allocation15_spill] sm:$0xff]  ;;  %v8987_v55 = vld [vmem:[#allocation16_spill] sm:$0xff] }
 0x1ba   :  { %v7653_v23 = vpop.f32.mrf.mxu0  ;;  %v1001_v8 = vadd.f32 %v7568_v9, %v807_v0  ;;  %v1003_v63 = vadd.f32 %v7576_v48, %v809_v19  ;;  %v1005_v6 = vadd.f32 %v7584_v58, %v811_v13  ;;  %v1193_v29 = vadd.f32 %v7564_v57, %v999_v50  ;;  %v8988_v58 = vld [vmem:[#allocation25_spill] sm:$0xff]  ;;  %v8990_v57 = vld [vmem:[#allocation18_spill] sm:$0xff]  ;;  %v9000_v26 = vld [vmem:[#allocation35_spill] sm:$0xff] }
 0x1bb   :  { %v7710_v9 = vpop.f32.mrf.mxu1  ;;  %v1007_v33 = vadd.f32 %v7592_v16, %v813_v28  ;;  %v1581_v36 = vadd.f32 %v7614_v34, %v1387_v40  ;;  %v1389_v47 = vadd.f32 %v7618_v62, %v1194_v49  ;;  %v817_v61 = vadd.f32 %v7546_v11, %v622_v14  ;;  %v8991_v16 = vld [vmem:[#allocation34_spill] sm:$0xff]  ;;  %v8992_v34 = vld [vmem:[#allocation36_spill] sm:$0xff]  ;;  %v9001_v13 = vld [vmem:[#allocation27_spill] sm:$0xff] }
 0x1bc   :  { %v7664_v45 = vpop.f32.mrf.mxu0  ;;  %v1196_v54 = vadd.f32 %v8986_v12, %v7566_v7  ;;  %v1195_v48 = vadd.f32 %v8987_v55, %v1001_v8  ;;  %v1010_v17 = vadd.f32 %v8988_v58, %v816_v38  ;;  %v1198_v20 = vadd.f32 %v8990_v57, %v8989_v25  ;;  %v8999_v0 = vld [vmem:[#allocation26_spill] sm:$0xff]  ;;  %v9002_v8 = vld [vmem:[#allocation28_spill] sm:$0xff]  ;;  %v9003_v38 = vld [vmem:[#allocation29_spill] sm:$0xff] }
 0x1bd   :  { %v1580_v31 = vadd.f32 %v8991_v16, %v1386_v15  ;;  %v1388_v52 = vadd.f32 %v8992_v34, %v1193_v29  ;;  %v1197_v11 = vadd.f32 %v8993_v22, %v1003_v63  ;;  %v1200_v7 = vadd.f32 %v8995_v42, %v8994_v30  ;;  %v7735_v60 = vpop.f32.mrf.mxu1  ;;  %v9004_v15 = vld [vmem:[#allocation38_spill] sm:$0xff]  ;;  %v9005_v29 = vld [vmem:[#allocation37_spill] sm:$0xff]  ;;  %v9006_v12 = vld [vmem:[#allocation40_spill] sm:$0xff] }
 0x1be   :  { %v7675_v39 = vpop.f32.mrf.mxu0  ;;  %v1199_v46 = vadd.f32 %v8996_v27, %v1005_v6  ;;  %v1202_v56 = vadd.f32 %v8998_v41, %v8997_v37  ;;  %v1201_v3 = vadd.f32 %v8999_v0, %v1007_v33  ;;  %v1583_v50 = vadd.f32 %v9000_v26, %v1389_v47  ;;  %v9007_v47 = vld [vmem:[#allocation31_spill] sm:$0xff]  ;;  %v9008_v25 = vld [vmem:[#allocation42_spill] sm:$0xff]  ;;  %v9011_v30 = vld [vmem:[#allocation32_spill] sm:$0xff] }
 0x1bf   :  { %v1009_v14 = vadd.f32 %v9001_v13, %v815_v43  ;;  %v1204_v28 = vadd.f32 %v9002_v8, %v1010_v17  ;;  %v1012_v49 = vadd.f32 %v9003_v38, %v818_v18  ;;  %v1391_v63 = vadd.f32 %v9004_v15, %v1196_v54  ;;  %v9009_v16 = vld [vmem:[#allocation43_spill] sm:$0xff]  ;;  %v9010_v22 = vld [vmem:[#allocation30_spill] sm:$0xff]  ;;  %v9013_v41 = vld [vmem:[#allocation41_spill] sm:$0xff] }
 0x1c0   :  { %v7687_v10 = vpop.f32.mrf.mxu0  ;;  %v1390_v55 = vadd.f32 %v9006_v12, %v1195_v48  ;;  %v1393_v57 = vadd.f32 %v9008_v25, %v1198_v20  ;;  %v1392_v43 = vadd.f32 %v9009_v16, %v1197_v11  ;;  %v1395_v17 = vadd.f32 %v7642_v44, %v1200_v7  ;;  %v9012_v27 = vld [vmem:[#allocation39_spill] sm:$0xff]  ;;  %v9014_v0 = vld [vmem:[#allocation33_spill] sm:$0xff] }
 0x1c1   :  { %v1203_v48 = vadd.f32 %v9010_v22, %v1009_v14  ;;  %v1206_v42 = vadd.f32 %v9011_v30, %v1012_v49  ;;  %v1585_v37 = vadd.f32 %v9012_v27, %v1391_v63  ;;  %v1397_v15 = vadd.f32 %v7653_v23, %v1202_v56 }
 0x1c2   :  { %v7698_v35 = vpop.f32.mrf.mxu0  ;;  %v1584_v11 = vadd.f32 %v9013_v41, %v1390_v55  ;;  %v1589_v38 = vadd.f32 %v7662_v53, %v1395_v17 }
 0x1c3   :  { %v1398_v53 = vadd.f32 %v7687_v10, %v1203_v48 }
 0x1c4   :  { %v7712_v2 = vpop.f32.mrf.mxu0 }
 0x1c6   :  { %v6861_v32 = vpop.f32.mrf.mxu0 }
 0x1c7   :  { %v1775_v62 = vadd.f32 %v6861_v32, %v1581_v36  ;;  %v1582_v36 = vadd.f32 %v9005_v29, %v1388_v52  ;;  %v1011_v32 = vadd.f32 %v9007_v47, %v817_v61  ;;  %v1394_v61 = vadd.f32 %v7647_v59, %v1199_v46 }
 0x1c8   :  { %v1695_v1 = vpop.f32.mrf.mxu0 }
 0x1c9   :  { %v1798_v40 = vadd.f32 %v7723_v24, %v1775_v62  ;;  %v1774_v19 = vadd.f32 %v1695_v1, %v1580_v31  ;;  %v6823_v31 = vpop.f32.mrf.mxu1  ;;  %v1205_v26 = vadd.f32 %v9014_v0, %v1011_v32  ;;  %v1588_v63 = vadd.f32 %v7685_v4, %v1394_v61 }
 0x1ca   :  { %v6864_v6 = vpop.f32.mrf.mxu0 }
 0x1cb   :  { %v1797_v33 = vadd.f32 %v7723_v24, %v1774_v19  ;;  %v1777_v58 = vadd.f32 %v6864_v6, %v1583_v50  ;;  %v1814_v34 = vmax.f32 %v1798_v40, 0.0  ;;  %v9015_v50 = vld [vmem:[#allocation44_spill] sm:$0xff]  ;;  %v1586_v19 = vadd.f32 %v7645_v51, %v1392_v43  ;;  %v1561_v13 = vpop.f32.mrf.mxu1 }
 0x1cc   :  { %v1705_v18 = vpop.f32.mrf.mxu0  ;;  %v1587_v40 = vadd.f32 %v9015_v50, %v1393_v57  ;;  %v1396_v6 = vadd.f32 %v7664_v45, %v1201_v3  ;;  %v1401_v57 = vadd.f32 %v7698_v35, %v1206_v42  ;;  %v1592_v42 = vadd.f32 %v1561_v13, %v1398_v53 }
 0x1cd   :  { %v1813_v54 = vmax.f32 %v1797_v33, 0.0  ;;  %v1800_v62 = vadd.f32 %v7723_v24, %v1777_v58  ;;  %v1776_v52 = vadd.f32 %v1705_v18, %v1582_v36  ;;  %v1399_v58 = vadd.f32 %v7675_v39, %v1204_v28  ;;  %v6826_v47 = vpop.f32.mrf.mxu1 }
 0x1ce   :  { %v6867_v20 = vpop.f32.mrf.mxu0  ;;  %v1400_v39 = vadd.f32 %v7712_v2, %v1205_v26  ;;  %v1590_v2 = vadd.f32 %v7735_v60, %v1396_v6 }
 0x1cf   :  { %v1850_v1 = vcombine.low %v1813_v54, %v1814_v34  ;;  %v1851_v44 = vcombine.high %v1813_v54, %v1814_v34  ;;  %v1799_v7 = vadd.f32 %v7723_v24, %v1776_v52  ;;  %v1779_v14 = vadd.f32 %v6867_v20, %v1585_v37 }
 0x1d0   :  { %v1715_v8 = vpop.f32.mrf.mxu0  ;;  %v1816_v49 = vmax.f32 %v1800_v62, 0.0  ;;  %v1591_v54 = vadd.f32 %v7710_v9, %v1397_v15  ;;  %v1571_v62 = vpop.f32.mrf.mxu1  ;;  %v1593_v30 = vadd.f32 %v6823_v31, %v1399_v58  ;;  %v1595_v9 = vadd.f32 %v6826_v47, %v1401_v57 }
 0x1d1   :  { %v1815_v59 = vmax.f32 %v1799_v7, 0.0  ;;  %v1778_v46 = vadd.f32 %v1715_v8, %v1584_v11  ;;  %v1802_v29 = vadd.f32 %v7723_v24, %v1779_v14  ;;  %v1864_v32 = vrot.slane %v1850_v1, %v7692_v21 }
 0x1d2   :  { %v6870_v36 = vpop.f32.mrf.mxu0  ;;  %v7771_v23 = vrot.slane %v1851_v44, %v7692_v21  ;;  %v1594_v1 = vadd.f32 %v1571_v62, %v1400_v39 }
 0x1d3   :  { %v1852_v12 = vcombine.low %v1815_v59, %v1816_v49  ;;  %v1853_v55 = vcombine.high %v1815_v59, %v1816_v49  ;;  %v1801_v51 = vadd.f32 %v7723_v24, %v1778_v46  ;;  %v1781_v33 = vadd.f32 %v6870_v36, %v1587_v40 }
 0x1d4   :  { %v1725_v4 = vpop.f32.mrf.mxu0  ;;  %v1818_v3 = vmax.f32 %v1802_v29, 0.0 }
 0x1d5   :  { %v1878_v45 = vrot.slane %v1852_v12, %v7692_v21  ;;  %v7775_v56 = vrot.slane %v1853_v55, %v7692_v21  ;;  %v1817_v25 = vmax.f32 %v1801_v51, 0.0  ;;  %v1804_v10 = vadd.f32 %v7723_v24, %v1781_v33 }
 0x1d6   :  { %v1780_v28 = vadd.f32 %v1725_v4, %v1586_v19  ;;  %v6873_v16 = vpop.f32.mrf.mxu0 }
 0x1d7   :  { %v1914_v43 = vcombine.low %v1864_v32, %v1878_v45  ;;  %v1916_v17 = vcombine.low %v7771_v23, %v7775_v56  ;;  %v1854_v18 = vcombine.low %v1817_v25, %v1818_v3  ;;  %v1855_v34 = vcombine.high %v1817_v25, %v1818_v3 }
 0x1d8   :  { %v1803_v52 = vadd.f32 %v7723_v24, %v1780_v28  ;;  %v1783_v22 = vadd.f32 %v6873_v16, %v1589_v38  ;;  %v1735_v48 = vpop.f32.mrf.mxu0  ;;  %v1915_v35 = vcombine.high %v1864_v32, %v1878_v45  ;;  %v1820_v37 = vmax.f32 %v1804_v10, 0.0 }
 0x1d9   :  { %v1782_v27 = vadd.f32 %v1735_v48, %v1588_v63  ;;  %v1917_v11 = vcombine.high %v7771_v23, %v7775_v56  ;;  %v1892_v0 = vrot.slane %v1854_v18, %v7692_v21  ;;  %v1899_v60 = vrot.slane %v1855_v34, %v7692_v21 }
 0x1da   :  { %v1819_v61 = vmax.f32 %v1803_v52, 0.0  ;;  %v1806_v20 = vadd.f32 %v7723_v24, %v1783_v22  ;;  %v6876_v41 = vpop.f32.mrf.mxu0  ;;  %v7795_v59 = vrot.slane %v1915_v35, %v7692_v21  ;;  %v7798_v46 = vrot.slane %v1914_v43, %v7692_v21 }
 0x1db   :  { %v1805_v44 = vadd.f32 %v7723_v24, %v1782_v27  ;;  %v1785_v7 = vadd.f32 %v6876_v41, %v1591_v54 }
 0x1dc   :  { %v1856_v31 = vcombine.low %v1819_v61, %v1820_v37  ;;  %v1857_v26 = vcombine.high %v1819_v61, %v1820_v37  ;;  %v1745_v50 = vpop.f32.mrf.mxu0  ;;  %v1822_v40 = vmax.f32 %v1806_v20, 0.0 }
 0x1dd   :  { %v1821_v19 = vmax.f32 %v1805_v44, 0.0  ;;  %v1808_v13 = vadd.f32 %v7723_v24, %v1785_v7  ;;  %v1784_v14 = vadd.f32 %v1745_v50, %v1590_v2 }
 0x1de   :  { %v1906_v8 = vrot.slane %v1856_v31, %v7692_v21  ;;  %v1913_v38 = vrot.slane %v1857_v26, %v7692_v21  ;;  %v6879_v49 = vpop.f32.mrf.mxu0 }
 0x1df   :  { %v1986_v15 = vcombine.low %v1821_v19, %v1822_v40  ;;  %v1987_v63 = vcombine.high %v1821_v19, %v1822_v40  ;;  %v1824_v6 = vmax.f32 %v1808_v13, 0.0  ;;  %v1807_v29 = vadd.f32 %v7723_v24, %v1784_v14 }
 0x1e0   :  { %v1918_v36 = vcombine.low %v1892_v0, %v1906_v8  ;;  %v1920_v12 = vcombine.low %v1899_v60, %v1913_v38  ;;  %v1787_v55 = vadd.f32 %v6879_v49, %v1593_v30  ;;  %v1755_v51 = vpop.f32.mrf.mxu0  ;;  %v1919_v33 = vcombine.high %v1892_v0, %v1906_v8 }
 0x1e1   :  { %v2000_v58 = vrot.slane %v1986_v15, %v7692_v21  ;;  %v2007_v53 = vrot.slane %v1987_v63, %v7692_v21  ;;  %v1823_v47 = vmax.f32 %v1807_v29, 0.0  ;;  %v1786_v32 = vadd.f32 %v1755_v51, %v1592_v42 }
 0x1e2   :  { %v1810_v4 = vadd.f32 %v7723_v24, %v1787_v55  ;;  %v6882_v45 = vpop.f32.mrf.mxu0  ;;  %v7805_v3 = vrot.slane %v1919_v33, %v7692_v21  ;;  %v7808_v25 = vrot.slane %v1918_v36, %v7692_v21  ;;  %v1921_v57 = vcombine.high %v1899_v60, %v1913_v38 }
 0x1e3   :  { %v1988_v39 = vcombine.low %v1823_v47, %v1824_v6  ;;  %v1989_v10 = vcombine.high %v1823_v47, %v1824_v6  ;;  %v1809_v28 = vadd.f32 %v7723_v24, %v1786_v32  ;;  %v1789_v16 = vadd.f32 %v6882_v45, %v1595_v9 }
 0x1e4   :  { %v1826_v43 = vmax.f32 %v1810_v4, 0.0  ;;  %v1765_v18 = vpop.f32.mrf.mxu0  ;;  %v1982_v34 = vcombine.low %v7795_v59, %v7805_v3  ;;  %v1978_v54 = vcombine.low %v7798_v46, %v7808_v25  ;;  %v1983_v62 = vcombine.high %v7795_v59, %v7805_v3  ;;  %v1833_v59 = vld [vmem:[%s8897_s3 + $0x20] sm:$0xf] }
 0x1e5   :  { %v2014_v52 = vrot.slane %v1988_v39, %v7692_v21  ;;  %v2021_v22 = vrot.slane %v1989_v10, %v7692_v21  ;;  %v1825_v48 = vmax.f32 %v1809_v28, 0.0  ;;  %v1812_v35 = vadd.f32 %v7723_v24, %v1789_v16  ;;  %v1830_v39 = vld [vmem:[%s8897_s3 + $0x8] sm:$0xff]  ;;  %v1831_v10 = vld [vmem:[%s8897_s3 + $0x10] sm:$0xff]  ;;  %v1832_v16 = vld [vmem:[%s8897_s3 + $0x18] sm:$0xff] }
 0x1e6   :  { %v1788_v2 = vadd.f32 %v1765_v18, %v1594_v1  ;;  %v7821_v30 = vrot.slane %v1921_v57, %v7692_v21  ;;  %v1979_v42 = vcombine.high %v7798_v46, %v7808_v25  ;;  %v7826_v27 = vrot.slane %v1920_v12, %v7692_v21  ;;  %v3165_v46 = vld [vmem:[#allocation7 + $0x4f8] sm:$0xff]  ;;  %v3164_v18 = vld [vmem:[#allocation7 + $0x4f0] sm:$0xff] }
 0x1e7   :  { %v2050_v37 = vcombine.low %v2000_v58, %v2014_v52  ;;  %v2052_v61 = vcombine.low %v2007_v53, %v2021_v22  ;;  %v1990_v20 = vcombine.low %v1825_v48, %v1826_v43  ;;  %v1991_v41 = vcombine.high %v1825_v48, %v1826_v43  ;;  %v3197_v3 = vld [vmem:[#allocation7 + $0x5f8] sm:$0xff]  ;;  %v3147_v48 = vld [vmem:[#allocation7 + $0x468] sm:$0xff] }
 0x1e8   :  { %v1811_v9 = vadd.f32 %v7723_v24, %v1788_v2  ;;  %v2051_v44 = vcombine.high %v2000_v58, %v2014_v52  ;;  %v2053_v7 = vcombine.high %v2007_v53, %v2021_v22  ;;  %v7830_v0 = vrot.slane %v1917_v11, %v7692_v21  ;;  %v3149_v25 = vld [vmem:[#allocation7 + $0x478] sm:$0xff]  ;;  %v3163_v52 = vld [vmem:[#allocation7 + $0x4e8] sm:$0xff]  ;;  %v3162_v2 = vld [vmem:[#allocation7 + $0x4e0] sm:$0xff] }
 0x1e9   :  { %v7836_v1 = vrot.slane %v1916_v17, %v7692_v21  ;;  %v1828_v60 = vmax.f32 %v1812_v35, 0.0  ;;  %v2028_v23 = vrot.slane %v1990_v20, %v7692_v21  ;;  %v2035_v56 = vrot.slane %v1991_v41, %v7692_v21  ;;  %v3181_v43 = vld [vmem:[#allocation7 + $0x578] sm:$0xff]  ;;  %v3195_v22 = vld [vmem:[#allocation7 + $0x5e8] sm:$0xff] }
 0x1ea   :  { %v1827_v31 = vmax.f32 %v1811_v9, 0.0  ;;  %v1984_v26 = vcombine.low %v7830_v0, %v7821_v30  ;;  %v1985_v24 = vcombine.high %v7830_v0, %v7821_v30  ;;  %v2078_v15 = vrot.slane %v2051_v44, %v7692_v21  ;;  %v3179_v35 = vld [vmem:[#allocation7 + $0x568] sm:$0xff]  ;;  %v3194_v30 = vld [vmem:[#allocation7 + $0x5e0] sm:$0xff]  ;;  %v3145_v20 = vld [vmem:[#allocation7 + $0x458] sm:$0xff] }
 0x1eb   :  { %v1980_v50 = vcombine.low %v7836_v1, %v7826_v27  ;;  %v1981_v11 = vcombine.high %v7836_v1, %v7826_v27  ;;  %v2064_v63 = vrot.slane %v2050_v37, %v7692_v21  ;;  %v2085_v6 = vrot.slane %v2053_v7, %v7692_v21  ;;  %v3178_v27 = vld [vmem:[#allocation7 + $0x560] sm:$0xff]  ;;  %v3161_v37 = vld [vmem:[#allocation7 + $0x4d8] sm:$0xff]  ;;  %v3160_v9 = vld [vmem:[#allocation7 + $0x4d0] sm:$0xff] }
 0x1ec   :  { %v1992_v40 = vcombine.low %v1827_v31, %v1828_v60  ;;  %v1993_v19 = vcombine.high %v1827_v31, %v1828_v60  ;;  %v2071_v51 = vrot.slane %v2052_v61, %v7692_v21  ;;  %v9016_v28 = vmov 0.0   ;;  %v3193_v61 = vld [vmem:[#allocation7 + $0x5d8] sm:$0xff]  ;;  %v3192_v44 = vld [vmem:[#allocation7 + $0x5d0] sm:$0xff]  ;;  %v3159_v1 = vld [vmem:[#allocation7 + $0x4c8] sm:$0xff] }
 0x1ed   :  { %v3177_v41 = vld [vmem:[#allocation7 + $0x558] sm:$0xff]  ;;  %v3144_v7 = vld [vmem:[#allocation7 + $0x450] sm:$0xff]  ;;  %v3191_v60 = vld [vmem:[#allocation7 + $0x5c8] sm:$0xff] }
 0x1ee   :  { %v2042_v17 = vrot.slane %v1992_v40, %v7692_v21  ;;  %v2049_v13 = vrot.slane %v1993_v19, %v7692_v21  ;;  %v3176_v0 = vld [vmem:[#allocation7 + $0x550] sm:$0xff]  ;;  %v3143_v31 = vld [vmem:[#allocation7 + $0x448] sm:$0xff]  ;;  %v3174_v40 = vld [vmem:[#allocation7 + $0x540] sm:$0xff] }
 0x1ef   :  { %v3157_v19 = vld [vmem:[#allocation7 + $0x4b8] sm:$0xff] }
 0x1f0   :  { %v2054_v14 = vcombine.low %v2028_v23, %v2042_v17  ;;  %v2056_v8 = vcombine.low %v2035_v56, %v2049_v13  ;;  %v2055_v38 = vcombine.high %v2028_v23, %v2042_v17  ;;  %v2057_v49 = vcombine.high %v2035_v56, %v2049_v13  ;;  %v3189_v23 = vld [vmem:[#allocation7 + $0x5b8] sm:$0xff]  ;;  %v3156_v13 = vld [vmem:[#allocation7 + $0x4b0] sm:$0xff] }
 0x1f1   :  { %v3141_v56 = vld [vmem:[#allocation7 + $0x438] sm:$0xff] }
 0x1f2   :  { %v2106_v29 = vrot.slane %v2055_v38, %v7692_v21  ;;  %v2092_v36 = vrot.slane %v2054_v14, %v7692_v21  ;;  %v2113_v12 = vrot.slane %v2057_v49, %v7692_v21  ;;  %v2099_v55 = vrot.slane %v2056_v8, %v7692_v21  ;;  %v1829_v21 = vld [vmem:[%s8897_s3] sm:$0xff]  ;;  %v3188_v14 = vld [vmem:[#allocation7 + $0x5b0] sm:$0xff]  ;;  %v3155_v49 = vld [vmem:[#allocation7 + $0x4a8] sm:$0xff]  ;;  %s7014_s3 = smov [#allocation10]  }
 0x1f3   :  { %v3173_v17 = vld [vmem:[#allocation7 + $0x538] sm:$0xff]  ;;  %v3140_v8 = vld [vmem:[#allocation7 + $0x430] sm:$0xff]  ;;  %s5395_s18 = sshll.u32 %s7014_s3, 4  ;;  %s5396_s18 = int_to_ptr.vmem [resolvable:$true] %s5395_s18 }
 0x1f4   :  { %v2118_v33 = vcombine.low %v2078_v15, %v2106_v29  ;;  %v2114_v58 = vcombine.low %v2064_v63, %v2092_v36  ;;  %v2119_v53 = vcombine.high %v2078_v15, %v2106_v29  ;;  %v2120_v47 = vcombine.low %v2085_v6, %v2113_v12  ;;  %v3172_v38 = vld [vmem:[#allocation7 + $0x530] sm:$0xff]  ;;  %v3187_v15 = vld [vmem:[#allocation7 + $0x5a8] sm:$0xff]  ;;  %v3154_v29 = vld [vmem:[#allocation7 + $0x4a0] sm:$0xff]  ;;  %s6977_s4 = scalar_lea.vmem %s5396_s18, 512  ;;  %p6982_p7 = scmp.lt.s32.totalorder %s5396_s18, %s5396_s18 }
 0x1f5   :  { %v2115_v32 = vcombine.high %v2064_v63, %v2092_v36  ;;  %v2116_v4 = vcombine.low %v2071_v51, %v2099_v55  ;;  %v2121_v45 = vcombine.high %v2085_v6, %v2113_v12  ;;  %v2117_v57 = vcombine.high %v2071_v51, %v2099_v55  ;;  %v3139_v63 = vld [vmem:[#allocation7 + $0x428] sm:$0xff]  ;;  %v3186_v36 = vld [vmem:[#allocation7 + $0x5a0] sm:$0xff]  ;;  %v3153_v51 = vld [vmem:[#allocation7 + $0x498] sm:$0xff]  ;;  %p6978_p6 = scmp.ne.s32.totalorder %s5396_s18, %s6977_s4  ;;  %p6983_p8 = scmp.lt.s32.totalorder %s6977_s4, %s6977_s4 }
 0x1f6   :  { %2182 = vmatprep.subr.mxu0 %v2118_v33  ;;  %6883 = vmatprep.subr.mxu1 %v2118_v33  ;;  %v3171_v6 = vld [vmem:[#allocation7 + $0x528] sm:$0xff]  ;;  %v3138_v12 = vld [vmem:[#allocation7 + $0x420] sm:$0xff]  ;;  %v3185_v33 = vld [vmem:[#allocation7 + $0x598] sm:$0xff] }
 0x1f7   :  { %2183 = vmatpush1.msra.mxu0 %v2114_v58  ;;  %6885 = vmatpush1.msra.mxu1 %v2114_v58  ;;  %v3170_v55 = vld [vmem:[#allocation7 + $0x520] sm:$0xff]  ;;  %v3137_v58 = vld [vmem:[#allocation7 + $0x418] sm:$0xff]  ;;  %p6984_p9 = por %p6983_p8, %p6982_p7 }
 0x1f8   :  { %2184 = vmatprep.subr.mxu0 %v1982_v34  ;;  %6884 = vmatprep.subr.mxu1 %v1982_v34  ;;  %v3196_v34 = vld [vmem:[#allocation7 + $0x5f0] sm:$0xff] }
 0x1f9   :  { %2185 = vmatpush1.msra.mxu0 %v1978_v54  ;;  %6886 = vmatpush1.msra.mxu1 %v1978_v54  ;;  %v3148_v54 = vld [vmem:[#allocation7 + $0x470] sm:$0xff]  ;;  %p6985_p10 = pnand %p6984_p9, %p6978_p6 }
 0x1fa   :  { %5507 = vmatmul.mubr.msk.f32.vlgmr.msra.gmra.mxu1 %vm2138_vm0, %v1830_v39  ;;  %2277 = vmatprep.subr.mxu1 %v2119_v53  ;;  %v3169_v53 = vld [vmem:[#allocation7 + $0x518] sm:$0xff] }
 0x1fb   :  { %2372 = vmatprep.subr.mxu0 %v2120_v47  ;;  %5506 = vmatmul.mubr.msk.f32.vlgmr.msra.gmra.mxu0 %vm2138_vm0, %v1829_v21  ;;  %v3152_v47 = vld [vmem:[#allocation7 + $0x490] sm:$0xff] }
 0x1fc   :  { %2278 = vmatpush1.msra.mxu1 %v2115_v32  ;;  %2373 = vmatpush1.msra.mxu0 %v2116_v4  ;;  %v3184_v32 = vld [vmem:[#allocation7 + $0x590] sm:$0xff] }
 0x1fd   :  { %2279 = vmatprep.subr.mxu1 %v1983_v62  ;;  %2374 = vmatprep.subr.mxu0 %v1984_v26  ;;  %v3180_v62 = vld [vmem:[#allocation7 + $0x570] sm:$0xff]  ;;  %v3175_v26 = vld [vmem:[#allocation7 + $0x548] sm:$0xff] }
 0x1fe   :  { %2230 = vmatprep.mubr.f32.mxu1 %v9016_v28  ;;  %2280 = vmatpush1.msra.mxu1 %v1979_v42  ;;  %v3146_v42 = vld [vmem:[#allocation7 + $0x460] sm:$0xff]  ;;  %v3136_v4 = vld [vmem:[#allocation7 + $0x410] sm:$0xff] }
 0x1ff   :  { %2375 = vmatpush1.msra.mxu0 %v1980_v50  ;;  %5508 = vmatmul.mubr.msk.f32.gmra.mxu1 %vm2138_vm0, %v1831_v10  ;;  %v3158_v50 = vld [vmem:[#allocation7 + $0x4c0] sm:$0xff] }
 0x200   :  { %2467 = vmatprep.subr.mxu1 %v2121_v45  ;;  %2236 = vmatprep.mubr.f32.mxu1 %v9016_v28  ;;  %v3168_v45 = vld [vmem:[#allocation7 + $0x510] sm:$0xff] }
 0x201   :  { %2408 = vmatprep.mubr.f32.mxu0 %v9016_v28  ;;  %5851 = vmatprep.subr.mxu0 %v3165_v46  ;;  %v3166_v46 = vld [vmem:[#allocation7 + $0x500] sm:$0xff] }
 0x202   :  { %5516 = vmatmul.mubr.msk.f32.vlgmr.msra.gmra.mxu0 %vm2138_vm0, %v1829_v21 }
 0x203   :  { %5509 = vmatmul.mubr.msk.f32.gmra.mxu1 %vm2138_vm0, %v1832_v16  ;;  %2414 = vmatprep.mubr.f32.mxu0 %v9016_v28 }
 0x204   :  { %2242 = vmatprep.mubr.f32.mxu1 %v9016_v28  ;;  %5852 = vmatpush3.msra.mxu0 %v3149_v25  ;;  %v3261_v25 = vld [vmem:[#allocation7 + $0x7f8] sm:$0xff] }
 0x205   :  { %5853 = vmatprep.subr.mxu0 %v3164_v18 }
 0x206   :  { %5517 = vmatmul.mubr.msk.f32.gmra.mxu0 %vm2138_vm0, %v1830_v39 }
 0x207   :  { %5510 = vmatmul.mubr.msk.f32.gmra.mxu1 %vm2138_vm0, %v1833_v59  ;;  %2420 = vmatprep.mubr.f32.mxu0 %v9016_v28 }
 0x208   :  { %2313 = vmatprep.mubr.f32.mxu1 %v9016_v28  ;;  %5854 = vmatpush3.msra.mxu0 %v3148_v54  ;;  %v7013_v54 = vmov 1983009808  }
 0x209   :  { %5855 = vmatprep.subr.mxu0 %v3163_v52 }
 0x20a   :  { %5518 = vmatmul.mubr.msk.f32.gmra.mxu0 %vm2138_vm0, %v1831_v10 }
 0x20b   :  { %5511 = vmatmul.mubr.msk.f32.vlgmr.msra.gmra.mxu1 %vm2138_vm0, %v1829_v21  ;;  %2426 = vmatprep.mubr.f32.mxu0 %v9016_v28 }
 0x20c   :  { %2468 = vmatpush1.msra.mxu1 %v2117_v57  ;;  %2319 = vmatprep.mubr.f32.mxu1 %v9016_v28  ;;  %v3151_v57 = vld [vmem:[#allocation7 + $0x488] sm:$0xff] }
 0x20d   :  { %2469 = vmatprep.subr.mxu1 %v1985_v24  ;;  %5856 = vmatpush3.msra.mxu0 %v3147_v48  ;;  %v3190_v24 = vld [vmem:[#allocation7 + $0x5c0] sm:$0xff] }
 0x20e   :  { %2470 = vmatpush1.msra.mxu1 %v1981_v11  ;;  %5519 = vmatmul.mubr.msk.f32.gmra.mxu0 %vm2138_vm0, %v1832_v16  ;;  %v3142_v11 = vld [vmem:[#allocation7 + $0x440] sm:$0xff] }
 0x20f   :  { %5512 = vmatmul.mubr.msk.f32.gmra.mxu1 %vm2138_vm0, %v1830_v39  ;;  %2432 = vmatprep.mubr.f32.mxu0 %v9016_v28 }
 0x210   :  { %2325 = vmatprep.mubr.f32.mxu1 %v9016_v28  ;;  %5895 = vmatprep.subr.mxu1 %v3197_v3  ;;  %v3229_v3 = vld [vmem:[#allocation7 + $0x6f8] sm:$0xff] }
 0x211   :  { %5857 = vmatprep.subr.mxu0 %v3162_v2 }
 0x212   :  { %5520 = vmatmul.mubr.msk.f32.gmra.mxu0 %vm2138_vm0, %v1833_v59 }
 0x213   :  { %5513 = vmatmul.mubr.msk.f32.gmra.mxu1 %vm2138_vm0, %v1831_v10  ;;  %5858 = vmatpush3.msra.mxu0 %v3146_v42 }
 0x214   :  { %2331 = vmatprep.mubr.f32.mxu1 %v9016_v28  ;;  %5859 = vmatprep.subr.mxu0 %v3161_v37 }
 0x215   :  { %5860 = vmatpush3.msra.mxu0 %v3145_v20 }
 0x216   :  { %5861 = vmatprep.subr.mxu0 %v3160_v9 }
 0x217   :  { %5514 = vmatmul.mubr.msk.f32.gmra.mxu1 %vm2138_vm0, %v1832_v16  ;;  %5862 = vmatpush3.msra.mxu0 %v3144_v7 }
 0x218   :  { %2337 = vmatprep.mubr.f32.mxu1 %v9016_v28  ;;  %5863 = vmatprep.subr.mxu0 %v3159_v1 }
 0x219   :  { %5864 = vmatpush3.msra.mxu0 %v3143_v31 }
 0x21a   :  { %5865 = vmatprep.subr.mxu0 %v3158_v50 }
 0x21b   :  { %5515 = vmatmul.mubr.msk.f32.gmra.mxu1 %vm2138_vm0, %v1833_v59  ;;  %5866 = vmatpush3.msra.mxu0 %v3142_v11 }
 0x21c   :  { %2503 = vmatprep.mubr.f32.mxu1 %v9016_v28  ;;  %5867 = vmatprep.subr.mxu0 %v3157_v19 }
 0x21d   :  { %5868 = vmatpush3.msra.mxu0 %v3141_v56 }
 0x21e   :  { %5869 = vmatprep.subr.mxu0 %v3156_v13 }
 0x21f   :  { %5521 = vmatmul.mubr.msk.f32.vlgmr.msra.gmra.mxu1 %vm2138_vm0, %v1829_v21  ;;  %5870 = vmatpush3.msra.mxu0 %v3140_v8  ;;  %v3135_v21 = vld [vmem:[#allocation7 + $0x408] sm:$0xff] }
 0x220   :  { %2509 = vmatprep.mubr.f32.mxu1 %v9016_v28  ;;  %5896 = vmatpush3.msra.mxu1 %v3181_v43 }
 0x221   :  { %5897 = vmatprep.subr.mxu1 %v3196_v34  ;;  %5871 = vmatprep.subr.mxu0 %v3155_v49 }
 0x222   :  { %5898 = vmatpush3.msra.mxu1 %v3180_v62  ;;  %5872 = vmatpush3.msra.mxu0 %v3139_v63  ;;  %v2579_v62 = vunpack.c.l.s4 %v7013_v54 }
 0x223   :  { %5522 = vmatmul.mubr.msk.f32.gmra.mxu1 %vm2138_vm0, %v1830_v39  ;;  %5899 = vmatprep.subr.mxu1 %v3195_v22  ;;  %v3183_v39 = vld [vmem:[#allocation7 + $0x588] sm:$0xff] }
 0x224   :  { %2515 = vmatprep.mubr.f32.mxu1 %v9016_v28  ;;  %5900 = vmatpush3.msra.mxu1 %v3179_v35  ;;  %v2580_v2 = vunpack.c.0.s8 %v2579_v62 }
 0x225   :  { %5901 = vmatprep.subr.mxu1 %v3194_v30  ;;  %5873 = vmatprep.subr.mxu0 %v3154_v29 }
 0x226   :  { %5902 = vmatpush3.msra.mxu1 %v3178_v27  ;;  %5874 = vmatpush3.msra.mxu0 %v3138_v12 }
 0x227   :  { %5523 = vmatmul.mubr.msk.f32.gmra.mxu1 %vm2138_vm0, %v1831_v10  ;;  %5903 = vmatprep.subr.mxu1 %v3193_v61  ;;  %v3167_v10 = vld [vmem:[#allocation7 + $0x508] sm:$0xff]  ;;  %v7924_v61 = vsub.s32 %v2580_v2, %v7669_v5 }
 0x228   :  { %2521 = vmatprep.mubr.f32.mxu1 %v9016_v28  ;;  %5904 = vmatpush3.msra.mxu1 %v3177_v41 }
 0x229   :  { %5905 = vmatprep.subr.mxu1 %v3192_v44  ;;  %5875 = vmatprep.subr.mxu0 %v3153_v51 }
 0x22a   :  { %5906 = vmatpush3.msra.mxu1 %v3176_v0  ;;  %5876 = vmatpush3.msra.mxu0 %v3137_v58 }
 0x22b   :  { %5524 = vmatmul.mubr.msk.f32.gmra.mxu1 %vm2138_vm0, %v1832_v16  ;;  %5907 = vmatprep.subr.mxu1 %v3191_v60  ;;  %v3182_v16 = vld [vmem:[#allocation7 + $0x580] sm:$0xff] }
 0x22c   :  { %2527 = vmatprep.mubr.f32.mxu1 %v9016_v28  ;;  %5908 = vmatpush3.msra.mxu1 %v3175_v26  ;;  %v3150_v28 = vld [vmem:[#allocation7 + $0x480] sm:$0xff] }
 0x22d   :  { %5909 = vmatprep.subr.mxu1 %v3190_v24  ;;  %5877 = vmatprep.subr.mxu0 %v3152_v47 }
 0x22e   :  { %5910 = vmatpush3.msra.mxu1 %v3174_v40  ;;  %5878 = vmatpush3.msra.mxu0 %v3136_v4 }
 0x22f   :  { %5525 = vmatmul.mubr.msk.f32.gmra.mxu1 %vm2138_vm0, %v1833_v59  ;;  %5911 = vmatprep.subr.mxu1 %v3189_v23  ;;  %v3134_v59 = vld [vmem:[#allocation7 + $0x400] sm:$0xff] }
 0x230   :  { %5912 = vmatpush3.msra.mxu1 %v3173_v17  ;;  %5879 = vmatprep.subr.mxu0 %v3151_v57 }
 0x231   :  { %5913 = vmatprep.subr.mxu1 %v3188_v14  ;;  %5880 = vmatpush3.msra.mxu0 %v3135_v21 }
 0x232   :  { %5914 = vmatpush3.msra.mxu1 %v3172_v38  ;;  %5881 = vmatprep.subr.mxu0 %v3150_v28 }
 0x233   :  { %5915 = vmatprep.subr.mxu1 %v3187_v15  ;;  %5882 = vmatpush3.msra.mxu0 %v3134_v59 }
 0x234   :  { %5916 = vmatpush3.msra.mxu1 %v3171_v6  ;;  %5939 = vmatprep.subr.mxu0 %v3229_v3 }
 0x235   :  { %5917 = vmatprep.subr.mxu1 %v3186_v36 }
 0x236   :  { %5918 = vmatpush3.msra.mxu1 %v3170_v55 }
 0x237   :  { %5919 = vmatprep.subr.mxu1 %v3185_v33 }
 0x238   :  { %5920 = vmatpush3.msra.mxu1 %v3169_v53 }
 0x239   :  { %5921 = vmatprep.subr.mxu1 %v3184_v32 }
 0x23a   :  { %5922 = vmatpush3.msra.mxu1 %v3168_v45 }
 0x23b   :  { %5923 = vmatprep.subr.mxu1 %v3183_v39 }
 0x23c   :  { %5924 = vmatpush3.msra.mxu1 %v3167_v10 }
 0x23d   :  { %5925 = vmatprep.subr.mxu1 %v3182_v16 }
 0x23e   :  { %5926 = vmatpush3.msra.mxu1 %v3166_v46 }
 0x23f   :  { %5983 = vmatprep.subr.mxu1 %v3261_v25 }
 0x2ba   :  { %v2226_v43 = vpop.f32.mrf.mxu1 }
 0x2bb   :  { %v2220_v34 = vpop.f32.mrf.mxu0 }
 0x2bc   :  { %v2228_v18 = vpop.f32.mrf.mxu1 }
 0x2bd   :  { %v2222_v22 = vpop.f32.mrf.mxu0  ;;  %v2646_v20 = vcombine.low %v2226_v43, %v2228_v18  ;;  %v2647_v9 = vcombine.high %v2226_v43, %v2228_v18 }
 0x2be   :  { %v2574_v44 = vcombine.low %v2220_v34, %v2222_v22  ;;  %v2575_v60 = vcombine.high %v2220_v34, %v2222_v22 }
 0x2bf   :  { %v2232_v52 = vpop.f32.mrf.mxu1  ;;  %v7927_v24 = vrot.slane %v2646_v20, %v7924_v61  ;;  %v7930_v19 = vrot.slane %v2647_v9, %v7924_v61 }
 0x2c0   :  { %v7933_v56 = vrot.slane %v2574_v44, %v7924_v61  ;;  %v7939_v49 = vrot.slane %v2575_v60, %v7924_v61 }
 0x2c1   :  { %v2234_v48 = vpop.f32.mrf.mxu1  ;;  %9017 = vst [vmem:[#allocation15_spill] sm:$0xff] %v7927_v24  ;;  %9018 = vst [vmem:[#allocation16_spill] sm:$0xff] %v7930_v19 }
 0x2c2   :  { %v2410_v35 = vpop.f32.mrf.mxu0  ;;  %v2718_v0 = vcombine.low %v2232_v52, %v2234_v48  ;;  %v2719_v31 = vcombine.high %v2232_v52, %v2234_v48 }
 0x2c3   :  { %v2238_v30 = vpop.f32.mrf.mxu1 }
 0x2c4   :  { %v2412_v42 = vpop.f32.mrf.mxu0  ;;  %v7936_v14 = vrot.slane %v2718_v0, %v7924_v61  ;;  %v7942_v63 = vrot.slane %v2719_v31, %v7924_v61 }
 0x2c5   :  { %v2240_v27 = vpop.f32.mrf.mxu1  ;;  %v2610_v26 = vcombine.low %v2410_v35, %v2412_v42  ;;  %v2611_v40 = vcombine.high %v2410_v35, %v2412_v42 }
 0x2c6   :  { %v2416_v37 = vpop.f32.mrf.mxu0  ;;  %v2790_v11 = vcombine.low %v2238_v30, %v2240_v27  ;;  %v2791_v23 = vcombine.high %v2238_v30, %v2240_v27  ;;  %9019 = vst [vmem:[#allocation25_spill] sm:$0xff] %v7936_v14 }
 0x2c7   :  { %v2244_v41 = vpop.f32.mrf.mxu1  ;;  %v7951_v12 = vrot.slane %v2610_v26, %v7924_v61  ;;  %v7957_v58 = vrot.slane %v2611_v40, %v7924_v61 }
 0x2c8   :  { %v2418_v7 = vpop.f32.mrf.mxu0  ;;  %v7954_v51 = vrot.slane %v2790_v11, %v7924_v61  ;;  %v7960_v32 = vrot.slane %v2791_v23, %v7924_v61 }
 0x2c9   :  { %v2246_v1 = vpop.f32.mrf.mxu1  ;;  %v2682_v17 = vcombine.low %v2416_v37, %v2418_v7  ;;  %v2683_v15 = vcombine.high %v2416_v37, %v2418_v7  ;;  %9022 = vst [vmem:[#allocation17_spill] sm:$0xff] %v7951_v12  ;;  %9023 = vst [vmem:[#allocation18_spill] sm:$0xff] %v7957_v58 }
 0x2ca   :  { %v2422_v50 = vpop.f32.mrf.mxu0  ;;  %v2862_v8 = vcombine.low %v2244_v41, %v2246_v1 }
 0x2cb   :  { %v2315_v5 = vpop.f32.mrf.mxu1  ;;  %v7969_v57 = vrot.slane %v2682_v17, %v7924_v61  ;;  %v7982_v16 = vrot.slane %v2683_v15, %v7924_v61 }
 0x2cc   :  { %v2424_v13 = vpop.f32.mrf.mxu0  ;;  %v7972_v21 = vrot.slane %v2862_v8, %v7924_v61 }
 0x2cd   :  { %v2317_v38 = vpop.f32.mrf.mxu1  ;;  %v2754_v53 = vcombine.low %v2422_v50, %v2424_v13  ;;  %v2755_v47 = vcombine.high %v2422_v50, %v2424_v13  ;;  %9024 = vst [vmem:[#allocation34_spill] sm:$0xff] %v7969_v57  ;;  %9027 = vst [vmem:[#allocation36_spill] sm:$0xff] %v7982_v16 }
 0x2ce   :  { %v2576_v6 = vcombine.low %v2315_v5, %v2317_v38  ;;  %v2577_v29 = vcombine.high %v2315_v5, %v2317_v38  ;;  %v2428_v55 = vpop.f32.mrf.mxu0 }
 0x2cf   :  { %v2321_v33 = vpop.f32.mrf.mxu1  ;;  %v8001_v22 = vrot.slane %v2754_v53, %v7924_v61  ;;  %v8004_v48 = vrot.slane %v2755_v47, %v7924_v61 }
 0x2d0   :  { %v7963_v4 = vrot.slane %v2576_v6, %v7924_v61  ;;  %v7966_v45 = vrot.slane %v2577_v29, %v7924_v61  ;;  %v2430_v39 = vpop.f32.mrf.mxu0 }
 0x2d1   :  { %v2323_v10 = vpop.f32.mrf.mxu1  ;;  %v2826_v59 = vcombine.low %v2428_v55, %v2430_v39  ;;  %v2827_v46 = vcombine.high %v2428_v55, %v2430_v39  ;;  %9031 = vst [vmem:[#allocation22_spill] sm:$0xff] %v8001_v22 }
 0x2d2   :  { %v2606_v3 = vcombine.low %v7933_v56, %v7963_v4  ;;  %v7988_v25 = vcombine.high %v7933_v56, %v7963_v4  ;;  %v7992_v43 = vcombine.low %v7939_v49, %v7966_v45  ;;  %v7996_v18 = vcombine.high %v7939_v49, %v7966_v45  ;;  %v7998_v34 = vpop.f32.mrf.mxu0 }
 0x2d3   :  { %v2648_v54 = vcombine.low %v2321_v33, %v2323_v10  ;;  %v2649_v62 = vcombine.high %v2321_v33, %v2323_v10  ;;  %v2327_v52 = vpop.f32.mrf.mxu1  ;;  %v8016_v27 = vrot.slane %v2826_v59, %v7924_v61  ;;  %v8028_v7 = vrot.slane %v2827_v46, %v7924_v61 }
 0x2d4   :  { %9028 = vst [vmem:[#allocation19_spill] sm:$0xff] %v7988_v25  ;;  %9029 = vst [vmem:[#allocation20_spill] sm:$0xff] %v7992_v43  ;;  %v5526_v35 = vrot.slane %v2606_v3, 9  ;;  %v3035_v2 = vrot.slane %v7988_v25, 7  ;;  %v3042_v42 = vrot.slane %v7992_v43, 7  ;;  %v8018_v37 = vpop.f32.mrf.mxu0  ;;  %v3048_v44 = vrot.slane %v7996_v18, 7 }
 0x2d5   :  { %9030 = vst [vmem:[#allocation21_spill] sm:$0xff] %v7996_v18  ;;  %v8021_v20 = vrot.slane %v2648_v54, %v7924_v61  ;;  %v8024_v41 = vrot.slane %v2649_v62, %v7924_v61  ;;  %v2329_v9 = vpop.f32.mrf.mxu1  ;;  %9036 = vst [vmem:[#allocation26_spill] sm:$0xff] %v8028_v7  ;;  %v3245_v62 = vld [vmem:[#allocation7 + $0x778] sm:$0xff] }
 0x2d6   :  { %v3041_v0 = vrot.slane %v3035_v2, 2  ;;  %v2720_v1 = vcombine.low %v2327_v52, %v2329_v9  ;;  %v2721_v60 = vcombine.high %v2327_v52, %v2329_v9  ;;  %v3036_v40 = vsel %vm8010_vm7, %v5526_v35, %v3035_v2 }
 0x2d7   :  { %9034 = vst [vmem:[#allocation23_spill] sm:$0xff] %v8021_v20  ;;  %9035 = vst [vmem:[#allocation24_spill] sm:$0xff] %v8024_v41  ;;  %v8034_v26 = vcombine.low %v7927_v24, %v8021_v20  ;;  %v8038_v50 = vcombine.high %v7927_v24, %v8021_v20  ;;  %v8042_v11 = vcombine.low %v7930_v19, %v8024_v41  ;;  %v2333_v5 = vpop.f32.mrf.mxu1  ;;  %v3047_v8 = vrot.slane %v3042_v42, 2  ;;  %v3223_v24 = vld [vmem:[#allocation7 + $0x6c8] sm:$0xff] }
 0x2d8   :  { %v8047_v23 = vrot.slane %v2720_v1, %v7924_v61  ;;  %v8050_v17 = vrot.slane %v2721_v60, %v7924_v61  ;;  %v3043_v13 = vsel %vm8010_vm7, %v3041_v0, %v3042_v42  ;;  %v8056_v38 = vcombine.high %v7930_v19, %v8024_v41 }
 0x2d9   :  { %9037 = vst [vmem:[#allocation35_spill] sm:$0xff] %v8034_v26  ;;  %9038 = vst [vmem:[#allocation27_spill] sm:$0xff] %v8038_v50  ;;  %v2335_v15 = vpop.f32.mrf.mxu1  ;;  %v3053_v6 = vrot.slane %v3048_v44, 2  ;;  %v3054_v29 = vrot.slane %v8034_v26, 7  ;;  %v3262_v36 = vcombine.low %v3036_v40, %v3043_v13  ;;  %v3263_v47 = vcombine.high %v3036_v40, %v3043_v13  ;;  %v3211_v26 = vld [vmem:[#allocation7 + $0x668] sm:$0xff] }
 0x2da   :  { %9039 = vst [vmem:[#allocation28_spill] sm:$0xff] %v8042_v11  ;;  %9040 = vst [vmem:[#allocation29_spill] sm:$0xff] %v8056_v38  ;;  %v8061_v55 = vcombine.low %v7936_v14, %v8047_v23  ;;  %v8065_v33 = vcombine.high %v7936_v14, %v8047_v23  ;;  %v8069_v53 = vcombine.low %v7942_v63, %v8050_v17 }
 0x2db   :  { %v2792_v39 = vcombine.low %v2333_v5, %v2335_v15  ;;  %v2793_v10 = vcombine.high %v2333_v5, %v2335_v15  ;;  %v2339_v28 = vpop.f32.mrf.mxu1  ;;  %v3049_v59 = vsel %vm8010_vm7, %v3047_v8, %v3048_v44  ;;  %v3055_v46 = vsel %vm8010_vm7, %v3053_v6, %v3054_v29 }
 0x2dc   :  { %9041 = vst [vmem:[#allocation38_spill] sm:$0xff] %v8061_v55  ;;  %v8077_v3 = vcombine.high %v7942_v63, %v8050_v17  ;;  %v3078_v54 = vrot.slane %v8061_v55, 7  ;;  %v3264_v52 = vcombine.low %v3049_v59, %v3055_v46  ;;  %v3272_v9 = vrot.slane %v3262_v36, %v7924_v61 }
 0x2dd   :  { %v8082_v35 = vrot.slane %v2792_v39, %v7924_v61  ;;  %v8085_v2 = vrot.slane %v2793_v10, %v7924_v61  ;;  %v2341_v42 = vpop.f32.mrf.mxu1  ;;  %v3265_v44 = vcombine.high %v3049_v59, %v3055_v46  ;;  %v3059_v60 = vrot.slane %v3054_v29, 2 }
 0x2de   :  { %v2863_v0 = vcombine.low %v2339_v28, %v2341_v42  ;;  %v3286_v1 = vrot.slane %v3264_v52, %v7924_v61  ;;  %v3060_v5 = vrot.slane %v8038_v50, 7  ;;  %v3279_v15 = vrot.slane %v3263_v47, %v7924_v61  ;;  %v3213_v28 = vld [vmem:[#allocation7 + $0x678] sm:$0xff] }
 0x2df   :  { %9042 = vst [vmem:[#allocation37_spill] sm:$0xff] %v8085_v2  ;;  %v8092_v40 = vcombine.low %v7954_v51, %v8082_v35  ;;  %v8096_v13 = vcombine.high %v7954_v51, %v8082_v35  ;;  %v8100_v8 = vcombine.low %v7960_v32, %v8085_v2  ;;  %v2505_v6 = vpop.f32.mrf.mxu1  ;;  %v3293_v10 = vrot.slane %v3265_v44, %v7924_v61 }
 0x2e0   :  { %v8104_v36 = vrot.slane %v2863_v0, %v7924_v61  ;;  %v3294_v29 = vcombine.low %v3272_v9, %v3286_v1  ;;  %v3295_v39 = vcombine.high %v3272_v9, %v3286_v1  ;;  %v3061_v59 = vsel %vm8010_vm7, %v3059_v60, %v3060_v5  ;;  %v3228_v1 = vld [vmem:[#allocation7 + $0x6f0] sm:$0xff] }
 0x2e1   :  { %v3065_v46 = vrot.slane %v3060_v5, 2  ;;  %v3066_v52 = vrot.slane %v8042_v11, 7  ;;  %v3072_v42 = vrot.slane %v8056_v38, 7  ;;  %v2507_v31 = vpop.f32.mrf.mxu1  ;;  %v3296_v9 = vcombine.low %v3279_v15, %v3293_v10  ;;  %v3212_v60 = vld [vmem:[#allocation7 + $0x670] sm:$0xff] }
 0x2e2   :  { %9043 = vst [vmem:[#allocation40_spill] sm:$0xff] %v8104_v36  ;;  %v8113_v47 = vcombine.low %v7972_v21, %v8104_v36  ;;  %v2879_v0 = vcombine.high %v7972_v21, %v8104_v36  ;;  %3646 = vmatprep.mubr.f32.mxu0 %v3295_v39  ;;  %v3297_v44 = vcombine.high %v3279_v15, %v3293_v10  ;;  %v3260_v15 = vld [vmem:[#allocation7 + $0x7f0] sm:$0xff]  ;;  %v3227_v36 = vld [vmem:[#allocation7 + $0x6e8] sm:$0xff]  ;;  %v3085_v25 = vrot.slane %v8069_v53, 7 }
 0x2e3   :  { %3647 = vmatmul.mubr.f32.vlgmr.msra.gmra.mxu0 %v3294_v29  ;;  %v3067_v5 = vsel %vm8010_vm7, %v3065_v46, %v3066_v52  ;;  %v3071_v11 = vrot.slane %v3066_v52, 2  ;;  %v3077_v55 = vrot.slane %v3072_v42, 2  ;;  %v2612_v38 = vcombine.low %v2505_v6, %v2507_v31  ;;  %v8119_v14 = vpop.f32.mrf.mxu1  ;;  %v3244_v46 = vld [vmem:[#allocation7 + $0x770] sm:$0xff] }
 0x2e4   :  { %v8123_v50 = vcombine.high %v7960_v32, %v8085_v2  ;;  %3731 = vmatprep.mubr.f32.mxu1 %v3297_v44  ;;  %5940 = vmatpush3.msra.mxu0 %v3213_v28  ;;  %v3334_v29 = vcombine.low %v3061_v59, %v3067_v5  ;;  %v3335_v10 = vcombine.high %v3061_v59, %v3067_v5  ;;  %v9044_v28 = vrot.slane %v8113_v47, 7 }
 0x2e5   :  { %3732 = vmatmul.mubr.f32.vlgmr.msra.gmra.mxu1 %v3296_v9  ;;  %5941 = vmatprep.subr.mxu0 %v3228_v1  ;;  %v3073_v52 = vsel %vm8010_vm7, %v3071_v11, %v3072_v42  ;;  %v3079_v43 = vsel %vm8010_vm7, %v3077_v55, %v3078_v54  ;;  %v2613_v18 = vcombine.high %v2505_v6, %v2507_v31  ;;  %v8131_v39 = vpop.f32.mrf.mxu1  ;;  %v8137_v59 = vrot.slane %v2879_v0, 7  ;;  %v3259_v11 = vld [vmem:[#allocation7 + $0x7e8] sm:$0xff]  ;;  %v3226_v42 = vld [vmem:[#allocation7 + $0x6e0] sm:$0xff] }
 0x2e6   :  { %v8135_v44 = vrot.slane %v9044_v28, 2  ;;  %5984 = vmatpush3.msra.mxu1 %v3245_v62  ;;  %5942 = vmatpush3.msra.mxu0 %v3212_v60  ;;  %v3336_v9 = vcombine.low %v3073_v52, %v3079_v43  ;;  %v3337_v1 = vcombine.high %v3073_v52, %v3079_v43  ;;  %v3344_v55 = vrot.slane %v3334_v29, %v7924_v61  ;;  %v3243_v31 = vld [vmem:[#allocation7 + $0x768] sm:$0xff] }
 0x2e7   :  { %5985 = vmatprep.subr.mxu1 %v3260_v15  ;;  %5943 = vmatprep.subr.mxu0 %v3227_v36  ;;  %v8141_v54 = vrot.slane %v2612_v38, %v7924_v61  ;;  %v8144_v6 = vrot.slane %v2613_v18, %v7924_v61  ;;  %v3091_v5 = vrot.slane %v3085_v25, 2  ;;  %v8146_v0 = vpop.f32.mrf.mxu1  ;;  %v3351_v43 = vrot.slane %v3335_v10, %v7924_v61  ;;  %v3258_v15 = vld [vmem:[#allocation7 + $0x7e0] sm:$0xff] }
 0x2e8   :  { %5986 = vmatpush3.msra.mxu1 %v3244_v46  ;;  %v3358_v62 = vrot.slane %v3336_v9, %v7924_v61  ;;  %v3365_v60 = vrot.slane %v3337_v1, %v7924_v61  ;;  %5944 = vmatpush3.msra.mxu0 %v3211_v26  ;;  %v3210_v36 = vld [vmem:[#allocation7 + $0x660] sm:$0xff]  ;;  %v3092_v29 = vrot.slane %v8077_v3, 7  ;;  %v9048_v46 = vrot.slane %v8065_v33, 9 }
 0x2e9   :  { %9045 = vst [vmem:[#allocation31_spill] sm:$0xff] %v8141_v54  ;;  %9046 = vst [vmem:[#allocation42_spill] sm:$0xff] %v8144_v6  ;;  %5987 = vmatprep.subr.mxu1 %v3259_v11  ;;  %5945 = vmatprep.subr.mxu0 %v3226_v42  ;;  %v8156_v38 = vcombine.high %v7951_v12, %v8141_v54  ;;  %v3098_v26 = vrot.slane %v8092_v40, 7  ;;  %v3242_v11 = vld [vmem:[#allocation7 + $0x760] sm:$0xff]  ;;  %v3225_v42 = vld [vmem:[#allocation7 + $0x6d8] sm:$0xff]  ;;  %v8165_v18 = vcombine.low %v7957_v58, %v8144_v6  ;;  %v8173_v20 = vpop.f32.mrf.mxu1 }
 0x2ea   :  { %v3086_v10 = vsel %vm8010_vm7, %v9048_v46, %v3085_v25  ;;  %v3367_v52 = vcombine.high %v3344_v55, %v3358_v62  ;;  %v3369_v28 = vcombine.high %v3351_v43, %v3365_v60  ;;  %v3366_v9 = vcombine.low %v3344_v55, %v3358_v62  ;;  %5988 = vmatpush3.msra.mxu1 %v3243_v31  ;;  %v3257_v55 = vld [vmem:[#allocation7 + $0x7d8] sm:$0xff] }
 0x2eb   :  { %9047 = vst [vmem:[#allocation43_spill] sm:$0xff] %v8156_v38  ;;  %v3368_v1 = vcombine.low %v3351_v43, %v3365_v60  ;;  %5989 = vmatprep.subr.mxu1 %v3258_v15  ;;  %5946 = vmatpush3.msra.mxu0 %v3210_v36  ;;  %9049 = vst [vmem:[#allocation30_spill] sm:$0xff] %v8165_v18  ;;  %v8169_v41 = vcombine.high %v7957_v58, %v8144_v6  ;;  %v3097_v46 = vrot.slane %v3092_v29, 2  ;;  %v3209_v31 = vld [vmem:[#allocation7 + $0x658] sm:$0xff]  ;;  %v3224_v6 = vld [vmem:[#allocation7 + $0x6d0] sm:$0xff] }
 0x2ec   :  { %v3093_v25 = vsel %vm8010_vm7, %v3091_v5, %v3092_v29  ;;  %3651 = vmatprep.mubr.f32.mxu0 %v3367_v52  ;;  %3736 = vmatprep.mubr.f32.mxu1 %v3369_v28  ;;  %v3103_v62 = vrot.slane %v3098_v26, 2  ;;  %v3104_v43 = vrot.slane %v8096_v13, 7  ;;  %v3241_v36 = vld [vmem:[#allocation7 + $0x758] sm:$0xff]  ;;  %v2684_v5 = vcombine.low %v8119_v14, %v8131_v39  ;;  %v8183_v28 = vpop.f32.mrf.mxu1 }
 0x2ed   :  { %9050 = vst [vmem:[#allocation32_spill] sm:$0xff] %v8169_v41  ;;  %v3406_v60 = vcombine.low %v3086_v10, %v3093_v25  ;;  %v3407_v15 = vcombine.high %v3086_v10, %v3093_v25  ;;  %3652 = vmatmul.mubr.f32.gmra.mxu0 %v3366_v9  ;;  %3737 = vmatmul.mubr.f32.gmra.mxu1 %v3368_v1  ;;  %v3110_v52 = vrot.slane %v8100_v8, 7  ;;  %v3256_v1 = vld [vmem:[#allocation7 + $0x7d0] sm:$0xff] }
 0x2ee   :  { %v3099_v58 = vsel %vm8010_vm7, %v3097_v46, %v3098_v26  ;;  %v2685_v29 = vcombine.high %v8119_v14, %v8131_v39  ;;  %5990 = vmatpush3.msra.mxu1 %v3242_v11  ;;  %5947 = vmatprep.subr.mxu0 %v3225_v42  ;;  %v3105_v10 = vsel %vm8010_vm7, %v3103_v62, %v3104_v43  ;;  %v3208_v25 = vld [vmem:[#allocation7 + $0x650] sm:$0xff]  ;;  %v3109_v46 = vrot.slane %v3104_v43, 2  ;;  %v3255_v42 = vld [vmem:[#allocation7 + $0x7c8] sm:$0xff] }
 0x2ef   :  { %v3416_v9 = vrot.slane %v3406_v60, %v7924_v61  ;;  %v3423_v26 = vrot.slane %v3407_v15, %v7924_v61  ;;  %5991 = vmatprep.subr.mxu1 %v3257_v55  ;;  %5948 = vmatpush3.msra.mxu0 %v3209_v31  ;;  %v3408_v19 = vcombine.low %v3099_v58, %v3105_v10  ;;  %v3240_v39 = vld [vmem:[#allocation7 + $0x750] sm:$0xff]  ;;  %v3115_v11 = vrot.slane %v3110_v52, 2  ;;  %v3207_v15 = vld [vmem:[#allocation7 + $0x648] sm:$0xff] }
 0x2f0   :  { %v3409_v14 = vcombine.high %v3099_v58, %v3105_v10  ;;  %v8190_v2 = vrot.slane %v2684_v5, %v7924_v61  ;;  %5992 = vmatpush3.msra.mxu1 %v3241_v36  ;;  %5949 = vmatprep.subr.mxu0 %v3224_v6  ;;  %v8193_v62 = vrot.slane %v2685_v29, %v7924_v61  ;;  %v3116_v55 = vrot.slane %v8123_v50, 7  ;;  %v3239_v36 = vld [vmem:[#allocation7 + $0x748] sm:$0xff]  ;;  %v8208_v5 = vpop.f32.mrf.mxu1 }
 0x2f1   :  { %v3111_v60 = vsel %vm8010_vm7, %v3109_v46, %v3110_v52  ;;  %v3129_v58 = vsel %vm8010_vm7, %v8135_v44, %v8137_v59  ;;  %v3430_v31 = vrot.slane %v3408_v19, %v7924_v61  ;;  %5993 = vmatprep.subr.mxu1 %v3256_v1  ;;  %5950 = vmatpush3.msra.mxu0 %v3208_v25  ;;  %v9058_v29 = vrot.slane %v8113_v47, 7 }
 0x2f2   :  { %9051 = vst [vmem:[#allocation39_spill] sm:$0xff] %v8190_v2  ;;  %9052 = vst [vmem:[#allocation41_spill] sm:$0xff] %v8193_v62  ;;  %v3437_v43 = vrot.slane %v3409_v14, %v7924_v61  ;;  %v8206_v6 = vcombine.low %v7969_v57, %v8190_v2  ;;  %5994 = vmatpush3.msra.mxu1 %v3240_v39  ;;  %5951 = vmatprep.subr.mxu0 %v3223_v24  ;;  %v3121_v52 = vrot.slane %v3116_v55, 2 }
 0x2f3   :  { %v8213_v44 = vcombine.high %v7969_v57, %v8190_v2  ;;  %v8217_v19 = vcombine.low %v7982_v16, %v8193_v62  ;;  %v8221_v59 = vcombine.high %v7982_v16, %v8193_v62  ;;  %v3439_v10 = vcombine.high %v3416_v9, %v3430_v31  ;;  %5995 = vmatprep.subr.mxu1 %v3255_v42  ;;  %v3222_v62 = vld [vmem:[#allocation7 + $0x6c0] sm:$0xff] }
 0x2f4   :  { %9053 = vst [vmem:[#allocation33_spill] sm:$0xff] %v8206_v6  ;;  %v3441_v1 = vcombine.high %v3423_v26, %v3437_v43  ;;  %v3438_v25 = vcombine.low %v3416_v9, %v3430_v31  ;;  %v3440_v46 = vcombine.low %v3423_v26, %v3437_v43  ;;  %v9057_v24 = vcombine.low %v7951_v12, %v8141_v54  ;;  %v3254_v2 = vld [vmem:[#allocation7 + $0x7c0] sm:$0xff] }
 0x2f5   :  { %9054 = vst [vmem:[#allocation44_spill] sm:$0xff] %v8213_v44  ;;  %9055 = vst [vmem:[#allocation45_spill] sm:$0xff] %v8217_v19  ;;  %5952 = vmatpush3.msra.mxu0 %v3207_v15  ;;  %5996 = vmatpush3.msra.mxu1 %v3239_v36  ;;  %v3117_v39 = vsel %vm8010_vm7, %v3115_v11, %v3116_v55  ;;  %v3123_v57 = vsel %vm8010_vm7, %v3121_v52, %v9058_v29  ;;  %v3206_v43 = vld [vmem:[#allocation7 + $0x640] sm:$0xff]  ;;  %v8236_v36 = vpop.f32.mrf.mxu1  ;;  %v3045_v11 = vrot.slane %v8165_v18, 7  ;;  %v3221_v29 = vld [vmem:[#allocation7 + $0x6b8] sm:$0xff] }
 0x2f6   :  { %9056 = vst [vmem:[#allocation46_spill] sm:$0xff] %v8221_v59  ;;  %v8226_v14 = vrot.slane %v9057_v24, 9  ;;  %v2756_v9 = vcombine.low %v8146_v0, %v8173_v20  ;;  %3656 = vmatprep.mubr.f32.mxu0 %v3439_v10  ;;  %3741 = vmatprep.mubr.f32.mxu1 %v3441_v1  ;;  %v3478_v26 = vcombine.low %v3111_v60, %v3117_v39  ;;  %v3238_v15 = vld [vmem:[#allocation7 + $0x740] sm:$0xff]  ;;  %v3253_v52 = vld [vmem:[#allocation7 + $0x7b8] sm:$0xff]  ;;  %v3051_v1 = vrot.slane %v8169_v41, 7  ;;  %v3216_v18 = vld [vmem:[#allocation7 + $0x690] sm:$0xff] }
 0x2f7   :  { %v3480_v42 = vcombine.low %v3123_v57, %v3129_v58  ;;  %v3479_v31 = vcombine.high %v3111_v60, %v3117_v39  ;;  %3657 = vmatmul.mubr.f32.gmra.mxu0 %v3438_v25  ;;  %3742 = vmatmul.mubr.f32.gmra.mxu1 %v3440_v46  ;;  %v3481_v55 = vcombine.high %v3123_v57, %v3129_v58  ;;  %v3205_v25 = vld [vmem:[#allocation7 + $0x638] sm:$0xff]  ;;  %v9059_v57 = vrot.slane %v8156_v38, 7 }
 0x2f8   :  { %v2757_v24 = vcombine.high %v8146_v0, %v8173_v20  ;;  %v8242_v10 = vrot.slane %v2756_v9, %v7924_v61  ;;  %v3488_v60 = vrot.slane %v3478_v26, %v7924_v61  ;;  %5953 = vmatprep.subr.mxu0 %v3222_v62  ;;  %5997 = vmatprep.subr.mxu1 %v3254_v2  ;;  %v3237_v9 = vld [vmem:[#allocation7 + $0x738] sm:$0xff]  ;;  %v3050_v26 = vrot.slane %v3045_v11, 2 }
 0x2f9   :  { %v3502_v39 = vrot.slane %v3480_v42, %v7924_v61  ;;  %v3495_v12 = vrot.slane %v3479_v31, %v7924_v61  ;;  %v3044_v58 = vrot.slane %v9059_v57, 2  ;;  %v3509_v46 = vrot.slane %v3481_v55, %v7924_v61  ;;  %5954 = vmatpush3.msra.mxu0 %v3206_v43  ;;  %5998 = vmatpush3.msra.mxu1 %v3238_v15  ;;  %v2531_v31 = vpop.f32.mrf.mxu1  ;;  %v3220_v57 = vld [vmem:[#allocation7 + $0x6b0] sm:$0xff] }
 0x2fa   :  { %v8252_v20 = vrot.slane %v2757_v24, %v7924_v61  ;;  %v8256_v0 = vcombine.low %v8001_v22, %v8242_v10  ;;  %5955 = vmatprep.subr.mxu0 %v3221_v29  ;;  %5999 = vmatprep.subr.mxu1 %v3253_v52  ;;  %v8260_v2 = vcombine.high %v8001_v22, %v8242_v10  ;;  %v3056_v43 = vrot.slane %v3051_v1, 2  ;;  %v3252_v52 = vld [vmem:[#allocation7 + $0x7b0] sm:$0xff] }
 0x2fb   :  { %v3511_v42 = vcombine.high %v3488_v60, %v3502_v39  ;;  %v3510_v62 = vcombine.low %v3488_v60, %v3502_v39  ;;  %v3513_v15 = vcombine.high %v3495_v12, %v3509_v46  ;;  %v3512_v55 = vcombine.low %v3495_v12, %v3509_v46  ;;  %5956 = vmatpush3.msra.mxu0 %v3205_v25  ;;  %v3204_v60 = vld [vmem:[#allocation7 + $0x630] sm:$0xff]  ;;  %v3219_v46 = vld [vmem:[#allocation7 + $0x6a8] sm:$0xff] }
 0x2fc   :  { %9060 = vst [vmem:[#allocation47_spill] sm:$0xff] %v8252_v20  ;;  %9061 = vst [vmem:[#allocation48_spill] sm:$0xff] %v8256_v0  ;;  %v8264_v24 = vcombine.low %v8004_v48, %v8252_v20  ;;  %v3057_v41 = vrot.slane %v8206_v6, 7  ;;  %v8269_v29 = vcombine.high %v8004_v48, %v8252_v20  ;;  %6000 = vmatpush3.msra.mxu1 %v3237_v9  ;;  %v3236_v25 = vld [vmem:[#allocation7 + $0x730] sm:$0xff]  ;;  %v9063_v16 = vrot.slane %v8156_v38, 7 }
 0x2fd   :  { %3661 = vmatprep.mubr.f32.mxu0 %v3511_v42  ;;  %v2828_v39 = vcombine.low %v8183_v28, %v8208_v5  ;;  %v2829_v12 = vcombine.high %v8183_v28, %v8208_v5  ;;  %3746 = vmatprep.mubr.f32.mxu1 %v3513_v15  ;;  %v9062_v42 = vcombine.low %v7998_v34, %v8018_v37  ;;  %v3251_v28 = vld [vmem:[#allocation7 + $0x7a8] sm:$0xff] }
 0x2fe   :  { %3662 = vmatmul.mubr.f32.gmra.mxu0 %v3510_v62  ;;  %v2881_v9 = vcombine.low %v8236_v36, %v2531_v31  ;;  %v3040_v6 = vsel %vm8010_vm7, %v8226_v14, %v9063_v16  ;;  %v3062_v54 = vrot.slane %v3057_v41, 2  ;;  %3747 = vmatmul.mubr.f32.gmra.mxu1 %v3512_v55  ;;  %v3203_v34 = vld [vmem:[#allocation7 + $0x628] sm:$0xff]  ;;  %v3046_v37 = vsel %vm8010_vm7, %v3044_v58, %v3045_v11  ;;  %v3218_v16 = vld [vmem:[#allocation7 + $0x6a0] sm:$0xff] }
 0x2ff   :  { %v8279_v22 = vrot.slane %v9062_v42, %v7924_v61  ;;  %5957 = vmatprep.subr.mxu0 %v3220_v57  ;;  %v8288_v5 = vrot.slane %v2828_v39, %v7924_v61  ;;  %v8291_v62 = vrot.slane %v2829_v12, %v7924_v61  ;;  %v3063_v36 = vrot.slane %v8213_v44, 7  ;;  %6001 = vmatprep.subr.mxu1 %v3252_v52  ;;  %v3235_v31 = vld [vmem:[#allocation7 + $0x728] sm:$0xff]  ;;  %v3234_v52 = vld [vmem:[#allocation7 + $0x720] sm:$0xff]  ;;  %v3249_v42 = vld [vmem:[#allocation7 + $0x798] sm:$0xff] }
 0x300   :  { %5958 = vmatpush3.msra.mxu0 %v3204_v60  ;;  %v8297_v14 = vrot.slane %v2881_v9, %v7924_v61  ;;  %v3052_v15 = vsel %vm8010_vm7, %v3050_v26, %v3051_v1  ;;  %v3058_v55 = vsel %vm8010_vm7, %v3056_v43, %v3057_v41  ;;  %v3069_v57 = vrot.slane %v8217_v19, 7  ;;  %6002 = vmatpush3.msra.mxu1 %v3236_v25  ;;  %v3250_v26 = vld [vmem:[#allocation7 + $0x7a0] sm:$0xff]  ;;  %v3217_v60 = vld [vmem:[#allocation7 + $0x698] sm:$0xff] }
 0x301   :  { %9064 = vst [vmem:[#allocation49_spill] sm:$0xff] %v8288_v5  ;;  %9065 = vst [vmem:[#allocation50_spill] sm:$0xff] %v8291_v62  ;;  %v3081_v39 = vrot.slane %v8256_v0, 7  ;;  %5959 = vmatprep.subr.mxu0 %v3219_v46  ;;  %v8307_v11 = vcombine.low %v8016_v27, %v8288_v5  ;;  %v8311_v58 = vcombine.high %v8016_v27, %v8288_v5  ;;  %v3202_v41 = vld [vmem:[#allocation7 + $0x620] sm:$0xff]  ;;  %6003 = vmatprep.subr.mxu1 %v3251_v28  ;;  %v3201_v9 = vld [vmem:[#allocation7 + $0x618] sm:$0xff] }
 0x302   :  { %9066 = vst [vmem:[#allocation51_spill] sm:$0xff] %v8297_v14  ;;  %v8315_v1 = vcombine.low %v8028_v7, %v8291_v62  ;;  %v8319_v43 = vcombine.high %v8028_v7, %v8291_v62  ;;  %5960 = vmatpush3.msra.mxu0 %v3203_v34  ;;  %v8323_v12 = vcombine.low %v8279_v22, %v8297_v14  ;;  %v3068_v25 = vrot.slane %v3063_v36, 2  ;;  %v3233_v44 = vld [vmem:[#allocation7 + $0x718] sm:$0xff]  ;;  %v3198_v34 = vld [vmem:[#allocation7 + $0x600] sm:$0xff] }
 0x303   :  { %v3074_v46 = vrot.slane %v3069_v57, 2  ;;  %6004 = vmatpush3.msra.mxu1 %v3235_v31  ;;  %5961 = vmatprep.subr.mxu0 %v3218_v16  ;;  %v3298_v38 = vcombine.low %v3040_v6, %v3046_v37  ;;  %v3300_v0 = vcombine.low %v3052_v15, %v3058_v55  ;;  %v3299_v28 = vcombine.high %v3040_v6, %v3046_v37  ;;  %v3248_v31 = vld [vmem:[#allocation7 + $0x790] sm:$0xff] }
 0x304   :  { %v3075_v19 = vrot.slane %v8221_v59, 7  ;;  %6005 = vmatprep.subr.mxu1 %v3250_v26  ;;  %5962 = vmatpush3.msra.mxu0 %v3202_v41  ;;  %v3301_v62 = vcombine.high %v3052_v15, %v3058_v55  ;;  %v3064_v5 = vsel %vm8010_vm7, %v3062_v54, %v3063_v36  ;;  %v3200_v16 = vld [vmem:[#allocation7 + $0x610] sm:$0xff]  ;;  %v5529_v41 = vrot.slane %v8260_v2, 9  ;;  %v3215_v54 = vld [vmem:[#allocation7 + $0x688] sm:$0xff] }
 0x305   :  { %6006 = vmatpush3.msra.mxu1 %v3234_v52  ;;  %5963 = vmatprep.subr.mxu0 %v3217_v60  ;;  %v8331_v7 = vrot.slane %v3298_v38, %v7924_v61  ;;  %v8334_v6 = vrot.slane %v3300_v0, %v7924_v61  ;;  %v8337_v37 = vrot.slane %v3299_v28, %v7924_v61  ;;  %v3232_v15 = vld [vmem:[#allocation7 + $0x710] sm:$0xff]  ;;  %v3247_v52 = vld [vmem:[#allocation7 + $0x788] sm:$0xff]  ;;  %v3246_v28 = vld [vmem:[#allocation7 + $0x780] sm:$0xff]  ;;  %v3101_v20 = vrot.slane %v8307_v11, 7 }
 0x306   :  { %v3080_v26 = vrot.slane %v3075_v19, 2  ;;  %6007 = vmatprep.subr.mxu1 %v3249_v42  ;;  %5964 = vmatpush3.msra.mxu0 %v3201_v9  ;;  %v8341_v36 = vrot.slane %v3301_v62, %v7924_v61  ;;  %v3070_v38 = vsel %vm8010_vm7, %v3068_v25, %v3069_v57  ;;  %v3076_v0 = vsel %vm8010_vm7, %v3074_v46, %v3075_v19  ;;  %v3199_v60 = vld [vmem:[#allocation7 + $0x608] sm:$0xff]  ;;  %v3214_v25 = vld [vmem:[#allocation7 + $0x680] sm:$0xff] }
 0x307   :  { %6008 = vmatpush3.msra.mxu1 %v3233_v44  ;;  %5965 = vmatprep.subr.mxu0 %v3216_v18  ;;  %v3330_v42 = vcombine.low %v8331_v7, %v8334_v6  ;;  %v3089_v62 = vrot.slane %v8264_v24, 7  ;;  %v3231_v57 = vld [vmem:[#allocation7 + $0x708] sm:$0xff]  ;;  %v3331_v19 = vcombine.high %v8331_v7, %v8334_v6  ;;  %v3370_v44 = vcombine.low %v3064_v5, %v3070_v38 }
 0x308   :  { %v3082_v9 = vsel %vm8010_vm7, %v3080_v26, %v3081_v39  ;;  %6009 = vmatprep.subr.mxu1 %v3248_v31  ;;  %5966 = vmatpush3.msra.mxu0 %v3200_v16  ;;  %v3333_v18 = vcombine.high %v8337_v37, %v8341_v36  ;;  %v3095_v46 = vrot.slane %v8269_v29, 7  ;;  %v3371_v26 = vcombine.high %v3064_v5, %v3070_v38  ;;  %v3230_v16 = vld [vmem:[#allocation7 + $0x700] sm:$0xff] }
 0x309   :  { %6010 = vmatpush3.msra.mxu1 %v3232_v15  ;;  %5967 = vmatprep.subr.mxu0 %v3215_v54  ;;  %v3372_v39 = vcombine.low %v3076_v0, %v3082_v9  ;;  %v3373_v55 = vcombine.high %v3076_v0, %v3082_v9  ;;  %v3094_v31 = vrot.slane %v3089_v62, 2  ;;  %v8359_v59 = vrot.slane %v3370_v44, %v7924_v61  ;;  %v2929_v0 = vld [vmem:[#allocation7 + $0xf8] sm:$0xff] }
 0x30a   :  { %6011 = vmatprep.subr.mxu1 %v3247_v52  ;;  %5968 = vmatpush3.msra.mxu0 %v3199_v60  ;;  %v3090_v7 = vsel %vm8010_vm7, %v5529_v41, %v3089_v62  ;;  %v3100_v6 = vrot.slane %v3095_v46, 2  ;;  %v8366_v5 = vrot.slane %v3371_v26, %v7924_v61  ;;  %v3107_v38 = vrot.slane %v8311_v58, 7  ;;  %v2961_v44 = vld [vmem:[#allocation7 + $0x1f8] sm:$0xff] }
 0x30b   :  { %6012 = vmatpush3.msra.mxu1 %v3231_v57  ;;  %5969 = vmatprep.subr.mxu0 %v3214_v25  ;;  %v3394_v15 = vrot.slane %v3372_v39, %v7924_v61  ;;  %v8369_v54 = vrot.slane %v3373_v55, %v7924_v61  ;;  %v3096_v41 = vsel %vm8010_vm7, %v3094_v31, %v3095_v46  ;;  %v3106_v60 = vrot.slane %v3101_v20, 2  ;;  %v2913_v46 = vld [vmem:[#allocation7 + $0x78] sm:$0xff]  ;;  %v2928_v39 = vld [vmem:[#allocation7 + $0xf0] sm:$0xff] }
 0x30c   :  { %6013 = vmatprep.subr.mxu1 %v3246_v28  ;;  %5970 = vmatpush3.msra.mxu0 %v3198_v34  ;;  %v3102_v52 = vsel %vm8010_vm7, %v3100_v6, %v3101_v20  ;;  %v3113_v9 = vrot.slane %v8315_v1, 7  ;;  %v9067_v62 = vrot.slane %v8323_v12, 7  ;;  %v9068_v55 = vcombine.high %v8279_v22, %v8297_v14  ;;  %v2945_v20 = vld [vmem:[#allocation7 + $0x178] sm:$0xff] }
 0x30d   :  { %3816 = vmatprep.mubr.f32.mxu0 %v3331_v19  ;;  %6014 = vmatpush3.msra.mxu1 %v3230_v16  ;;  %v3332_v34 = vcombine.low %v8337_v37, %v8341_v36  ;;  %v3112_v28 = vrot.slane %v3107_v38, 2  ;;  %v3403_v26 = vcombine.high %v8359_v59, %v3394_v15  ;;  %v3108_v31 = vsel %vm8010_vm7, %v3106_v60, %v3107_v38  ;;  %v2960_v19 = vld [vmem:[#allocation7 + $0x1f0] sm:$0xff] }
 0x30e   :  { %v3130_v57 = vrot.slane %v9067_v62, 2  ;;  %v3131_v25 = vrot.slane %v9068_v55, 7  ;;  %3901 = vmatprep.mubr.f32.mxu1 %v3333_v18  ;;  %3817 = vmatmul.mubr.f32.vlgmr.msra.gmra.mxu0 %v3330_v42  ;;  %v3442_v6 = vcombine.low %v3090_v7, %v3096_v41  ;;  %v3118_v62 = vrot.slane %v3113_v9, 2  ;;  %v2912_v18 = vld [vmem:[#allocation7 + $0x70] sm:$0xff] }
 0x30f   :  { %3902 = vmatmul.mubr.f32.vlgmr.msra.gmra.mxu1 %v3332_v34  ;;  %6027 = vmatprep.subr.mxu0 %v2929_v0  ;;  %v3444_v16 = vcombine.low %v3102_v52, %v3108_v31  ;;  %v3443_v55 = vcombine.high %v3090_v7, %v3096_v41  ;;  %v3445_v37 = vcombine.high %v3102_v52, %v3108_v31  ;;  %v3119_v36 = vrot.slane %v8319_v43, 7  ;;  %v2944_v0 = vld [vmem:[#allocation7 + $0x170] sm:$0xff] }
 0x310   :  { %6071 = vmatprep.subr.mxu1 %v2961_v44  ;;  %6028 = vmatpush3.msra.mxu0 %v2913_v46  ;;  %v3405_v42 = vcombine.high %v8366_v5, %v8369_v54  ;;  %v3452_v14 = vrot.slane %v3442_v6, %v7924_v61  ;;  %v3114_v38 = vsel %vm8010_vm7, %v3112_v28, %v3113_v9  ;;  %v2927_v44 = vld [vmem:[#allocation7 + $0xe8] sm:$0xff] }
 0x311   :  { %6072 = vmatpush3.msra.mxu1 %v2945_v20  ;;  %6029 = vmatprep.subr.mxu0 %v2928_v39  ;;  %v3466_v60 = vrot.slane %v3444_v16, %v7924_v61  ;;  %v3459_v7 = vrot.slane %v3443_v55, %v7924_v61  ;;  %v3473_v41 = vrot.slane %v3445_v37, %v7924_v61  ;;  %v3124_v52 = vrot.slane %v3119_v36, 2  ;;  %v2959_v20 = vld [vmem:[#allocation7 + $0x1e8] sm:$0xff] }
 0x312   :  { %6073 = vmatprep.subr.mxu1 %v2960_v19  ;;  %3821 = vmatprep.mubr.f32.mxu0 %v3403_v26  ;;  %v3402_v34 = vcombine.low %v8359_v59, %v3394_v15  ;;  %v3120_v46 = vsel %vm8010_vm7, %v3118_v62, %v3119_v36  ;;  %v3132_v9 = vsel %vm8010_vm7, %v3130_v57, %v3131_v25  ;;  %v2911_v39 = vld [vmem:[#allocation7 + $0x68] sm:$0xff]  ;;  %v2926_v15 = vld [vmem:[#allocation7 + $0xe0] sm:$0xff]  ;;  %v9069_v62 = vrot.slane %v8323_v12, 7 }
 0x313   :  { %3906 = vmatprep.mubr.f32.mxu1 %v3405_v42  ;;  %6030 = vmatpush3.msra.mxu0 %v2912_v18  ;;  %v3404_v28 = vcombine.low %v8366_v5, %v8369_v54  ;;  %v3475_v31 = vcombine.high %v3452_v14, %v3466_v60  ;;  %v8405_v26 = vrot.slane %v7933_v56, %v7924_v61  ;;  %v2943_v59 = vld [vmem:[#allocation7 + $0x168] sm:$0xff]  ;;  %v2958_v5 = vld [vmem:[#allocation7 + $0x1e0] sm:$0xff] }
 0x314   :  { %6074 = vmatpush3.msra.mxu1 %v2944_v0  ;;  %3822 = vmatmul.mubr.f32.gmra.mxu0 %v3402_v34  ;;  %v3477_v6 = vcombine.high %v3459_v7, %v3473_v41  ;;  %v3126_v57 = vsel %vm8010_vm7, %v3124_v52, %v9069_v62  ;;  %v3514_v25 = vcombine.low %v3114_v38, %v3120_v46  ;;  %v2910_v56 = vld [vmem:[#allocation7 + $0x60] sm:$0xff] }
 0x315   :  { %3907 = vmatmul.mubr.f32.gmra.mxu1 %v3404_v28  ;;  %6031 = vmatprep.subr.mxu0 %v2927_v44  ;;  %v3516_v54 = vcombine.low %v3126_v57, %v3132_v9  ;;  %v3515_v19 = vcombine.high %v3114_v38, %v3120_v46  ;;  %v3517_v16 = vcombine.high %v3126_v57, %v3132_v9  ;;  %v2942_v42 = vld [vmem:[#allocation7 + $0x160] sm:$0xff]  ;;  %v2925_v38 = vld [vmem:[#allocation7 + $0xd8] sm:$0xff] }
 0x316   :  { %6075 = vmatprep.subr.mxu1 %v2959_v20  ;;  %6032 = vmatpush3.msra.mxu0 %v2911_v39  ;;  %v3474_v55 = vcombine.low %v3452_v14, %v3466_v60  ;;  %v3476_v37 = vcombine.low %v3459_v7, %v3473_v41  ;;  %v3524_v36 = vrot.slane %v3514_v25, %v7924_v61  ;;  %v2957_v7 = vld [vmem:[#allocation7 + $0x1d8] sm:$0xff]  ;;  %v2956_v39 = vld [vmem:[#allocation7 + $0x1d0] sm:$0xff] }
 0x317   :  { %6076 = vmatpush3.msra.mxu1 %v2943_v59  ;;  %6033 = vmatprep.subr.mxu0 %v2926_v15  ;;  %v3538_v30 = vrot.slane %v3516_v54, %v7924_v61  ;;  %v3531_v18 = vrot.slane %v3515_v19, %v7924_v61  ;;  %v3545_v0 = vrot.slane %v3517_v16, %v7924_v61  ;;  %v2909_v41 = vld [vmem:[#allocation7 + $0x58] sm:$0xff]  ;;  %v2955_v16 = vld [vmem:[#allocation7 + $0x1c8] sm:$0xff] }
 0x318   :  { %6077 = vmatprep.subr.mxu1 %v2958_v5  ;;  %3826 = vmatprep.mubr.f32.mxu0 %v3475_v31  ;;  %v8417_v52 = vrot.slane %v7939_v49, %v7924_v61  ;;  %v5530_v14 = vcombine.low %v8065_v33, %v7942_v63  ;;  %v5532_v60 = vcombine.low %v8077_v3, %v7954_v51  ;;  %v2941_v9 = vld [vmem:[#allocation7 + $0x158] sm:$0xff]  ;;  %v2924_v33 = vld [vmem:[#allocation7 + $0xd0] sm:$0xff] }
 0x319   :  { %3911 = vmatprep.mubr.f32.mxu1 %v3477_v6  ;;  %6034 = vmatpush3.msra.mxu0 %v2910_v56  ;;  %v3547_v34 = vcombine.high %v3524_v36, %v3538_v30  ;;  %v8425_v44 = vrot.slane %v7963_v4, %v7924_v61  ;;  %v8429_v46 = vrot.slane %v7966_v45, %v7924_v61  ;;  %v2908_v6 = vld [vmem:[#allocation7 + $0x50] sm:$0xff]  ;;  %v2907_v56 = vld [vmem:[#allocation7 + $0x48] sm:$0xff] }
 0x31a   :  { %6078 = vmatpush3.msra.mxu1 %v2942_v42  ;;  %3827 = vmatmul.mubr.f32.gmra.mxu0 %v3474_v55  ;;  %v3549_v28 = vcombine.high %v3531_v18, %v3545_v0  ;;  %v3546_v20 = vcombine.low %v3524_v36, %v3538_v30  ;;  %v3548_v3 = vcombine.low %v3531_v18, %v3545_v0  ;;  %v2940_v5 = vld [vmem:[#allocation7 + $0x150] sm:$0xff]  ;;  %v2939_v30 = vld [vmem:[#allocation7 + $0x148] sm:$0xff]  ;;  %v9079_v0 = vld [vmem:[#allocation30_spill] sm:$0xff] }
 0x31b   :  { %3912 = vmatmul.mubr.f32.gmra.mxu1 %v3476_v37  ;;  %6035 = vmatprep.subr.mxu0 %v2925_v38  ;;  %v8432_v31 = vrot.slane %v5530_v14, %v7924_v61  ;;  %v8435_v59 = vrot.slane %v5532_v60, %v7924_v61  ;;  %v5531_v15 = vcombine.high %v8047_v23, %v8069_v53  ;;  %v9070_v36 = vld [vmem:[#allocation37_spill] sm:$0xff]  ;;  %v2922_v14 = vld [vmem:[#allocation7 + $0xc0] sm:$0xff] }
 0x31c   :  { %6079 = vmatprep.subr.mxu1 %v2957_v7  ;;  %6036 = vmatpush3.msra.mxu0 %v2909_v41  ;;  %v5533_v62 = vcombine.high %v8050_v17, %v8092_v40  ;;  %v5538_v57 = vcombine.low %v8096_v13, %v7960_v32  ;;  %v5540_v25 = vcombine.low %v8123_v50, %v7972_v21  ;;  %v2923_v40 = vld [vmem:[#allocation7 + $0xc8] sm:$0xff]  ;;  %v2954_v41 = vld [vmem:[#allocation7 + $0x1c0] sm:$0xff]  ;;  %v2992_v38 = vld [vmem:[#allocation7 + $0x2f0] sm:$0xff] }
 0x31d   :  { %6080 = vmatpush3.msra.mxu1 %v2941_v9  ;;  %6037 = vmatprep.subr.mxu0 %v2924_v33  ;;  %v8448_v23 = vrot.slane %v5531_v15, %v7924_v61  ;;  %v3955_v55 = vcombine.high %v8405_v26, %v8417_v52  ;;  %v5539_v37 = vcombine.high %v8082_v35, %v8100_v8  ;;  %v2938_v9 = vld [vmem:[#allocation7 + $0x140] sm:$0xff]  ;;  %v2921_v33 = vld [vmem:[#allocation7 + $0xb8] sm:$0xff] }
 0x31e   :  { %6081 = vmatprep.subr.mxu1 %v2956_v39  ;;  %3831 = vmatprep.mubr.f32.mxu0 %v3547_v34  ;;  %v8453_v13 = vrot.slane %v5533_v62, %v7924_v61  ;;  %v8456_v50 = vrot.slane %v5538_v57, %v7924_v61  ;;  %v8459_v19 = vrot.slane %v5540_v25, %v7924_v61  ;;  %v2906_v34 = vld [vmem:[#allocation7 + $0x40] sm:$0xff]  ;;  %v2953_v39 = vld [vmem:[#allocation7 + $0x1b8] sm:$0xff]  ;;  %v2920_v62 = vld [vmem:[#allocation7 + $0xb0] sm:$0xff] }
 0x31f   :  { %3916 = vmatprep.mubr.f32.mxu1 %v3549_v28  ;;  %6038 = vmatpush3.msra.mxu0 %v2908_v6  ;;  %v5541_v42 = vcombine.high %v9070_v36, %v8113_v47  ;;  %v8474_v8 = vrot.slane %v5539_v37, %v7924_v61  ;;  %v3957_v7 = vcombine.high %v8425_v44, %v8429_v46  ;;  %v2905_v15 = vld [vmem:[#allocation7 + $0x38] sm:$0xff] }
 0x320   :  { %6082 = vmatpush3.msra.mxu1 %v2940_v5  ;;  %3832 = vmatmul.mubr.f32.gmra.mxu0 %v3546_v20  ;;  %v2937_v6 = vld [vmem:[#allocation7 + $0x138] sm:$0xff]  ;;  %v5536_v57 = vcombine.low %v8269_v29, %v8016_v27  ;;  %v2952_v5 = vld [vmem:[#allocation7 + $0x1b0] sm:$0xff]  ;;  %v2919_v29 = vld [vmem:[#allocation7 + $0xa8] sm:$0xff] }
 0x321   :  { %3917 = vmatmul.mubr.f32.gmra.mxu1 %v3548_v3  ;;  %6039 = vmatprep.subr.mxu0 %v2923_v40  ;;  %v8477_v47 = vrot.slane %v5541_v42, %v7924_v61  ;;  %v5534_v3 = vcombine.low %v8260_v2, %v8004_v48  ;;  %v2904_v40 = vld [vmem:[#allocation7 + $0x30] sm:$0xff]  ;;  %v5535_v2 = vcombine.high %v8242_v10, %v8264_v24  ;;  %v2951_v10 = vld [vmem:[#allocation7 + $0x1a8] sm:$0xff]  ;;  %v2977_v20 = vld [vmem:[#allocation7 + $0x278] sm:$0xff] }
 0x322   :  { %6083 = vmatprep.subr.mxu1 %v2955_v16  ;;  %6040 = vmatpush3.msra.mxu0 %v2907_v56  ;;  %v9071_v16 = vld [vmem:[#allocation47_spill] sm:$0xff]  ;;  %v2936_v42 = vld [vmem:[#allocation7 + $0x130] sm:$0xff]  ;;  %v3009_v28 = vld [vmem:[#allocation7 + $0x378] sm:$0xff] }
 0x323   :  { %4306 = vmatprep.mubr.f32.mxu0 %v3955_v55  ;;  %6084 = vmatpush3.msra.mxu1 %v2939_v30  ;;  %v8492_v25 = vrot.slane %v5534_v3, %v7924_v61  ;;  %v5537_v56 = vcombine.high %v9071_v16, %v8307_v11  ;;  %v9072_v55 = vld [vmem:[#allocation26_spill] sm:$0xff]  ;;  %v8501_v30 = vrot.slane %v5536_v57, %v7924_v61  ;;  %v2903_v24 = vld [vmem:[#allocation7 + $0x28] sm:$0xff] }
 0x324   :  { %4391 = vmatprep.mubr.f32.mxu1 %v3957_v7  ;;  %6041 = vmatprep.subr.mxu0 %v2922_v14  ;;  %v5542_v37 = vcombine.low %v8311_v58, %v9072_v55  ;;  %v5544_v14 = vcombine.low %v8319_v43, %v8279_v22  ;;  %v9073_v7 = vld [vmem:[#allocation49_spill] sm:$0xff]  ;;  %v8508_v11 = vrot.slane %v5535_v2, %v7924_v61  ;;  %v2918_v43 = vld [vmem:[#allocation7 + $0xa0] sm:$0xff] }
 0x325   :  { %6085 = vmatprep.subr.mxu1 %v2954_v41  ;;  %6042 = vmatpush3.msra.mxu0 %v2906_v34  ;;  %v5543_v41 = vcombine.high %v9073_v7, %v8315_v1  ;;  %v8511_v58 = vrot.slane %v5537_v56, %v7924_v61  ;;  %v9074_v57 = vld [vmem:[#allocation50_spill] sm:$0xff]  ;;  %v2900_v56 = vld [vmem:[#allocation7 + $0x10] sm:$0xff]  ;;  %v3956_v1 = vcombine.low %v8425_v44, %v8429_v46 }
 0x326   :  { %6086 = vmatpush3.msra.mxu1 %v2938_v9  ;;  %6043 = vmatprep.subr.mxu0 %v2921_v33  ;;  %v8514_v34 = vrot.slane %v5542_v37, %v7924_v61  ;;  %v2935_v9 = vld [vmem:[#allocation7 + $0x128] sm:$0xff]  ;;  %v8521_v3 = vrot.slane %v5544_v14, %v7924_v61  ;;  %v2917_v2 = vld [vmem:[#allocation7 + $0x98] sm:$0xff]  ;;  %v2898_v33 = vld [vmem:[#allocation7] sm:$0xff] }
 0x327   :  { %6087 = vmatprep.subr.mxu1 %v2953_v39  ;;  %6044 = vmatpush3.msra.mxu0 %v2905_v15  ;;  %v2950_v39 = vld [vmem:[#allocation7 + $0x1a0] sm:$0xff]  ;;  %v8532_v37 = vrot.slane %v5543_v41, %v7924_v61  ;;  %v2901_v14 = vld [vmem:[#allocation7 + $0x18] sm:$0xff] }
 0x328   :  { %6088 = vmatpush3.msra.mxu1 %v2937_v6  ;;  %6045 = vmatprep.subr.mxu0 %v2920_v62  ;;  %v2902_v15 = vld [vmem:[#allocation7 + $0x20] sm:$0xff]  ;;  %v9081_v44 = vld [vmem:[#allocation33_spill] sm:$0xff] }
 0x329   :  { %6089 = vmatprep.subr.mxu1 %v2952_v5  ;;  %6046 = vmatpush3.msra.mxu0 %v2904_v40  ;;  %v5545_v5 = vcombine.high %v9074_v57, %v8323_v12  ;;  %v2934_v40 = vld [vmem:[#allocation7 + $0x120] sm:$0xff]  ;;  %v2933_v12 = vld [vmem:[#allocation7 + $0x118] sm:$0xff] }
 0x32a   :  { %6090 = vmatpush3.msra.mxu1 %v2936_v42  ;;  %6047 = vmatprep.subr.mxu0 %v2919_v29  ;;  %v2949_v29 = vld [vmem:[#allocation7 + $0x198] sm:$0xff]  ;;  %v2915_v42 = vld [vmem:[#allocation7 + $0x88] sm:$0xff] }
 0x32b   :  { %6091 = vmatprep.subr.mxu1 %v2951_v10  ;;  %6048 = vmatpush3.msra.mxu0 %v2903_v24  ;;  %v8537_v62 = vrot.slane %v5545_v5, %v7924_v61  ;;  %v2916_v10 = vld [vmem:[#allocation7 + $0x90] sm:$0xff]  ;;  %v2931_v5 = vld [vmem:[#allocation7 + $0x108] sm:$0xff]  ;;  %v9082_v46 = vld [vmem:[#allocation42_spill] sm:$0xff] }
 0x32c   :  { %6092 = vmatpush3.msra.mxu1 %v2935_v9  ;;  %6049 = vmatprep.subr.mxu0 %v2918_v43  ;;  %v2948_v24 = vld [vmem:[#allocation7 + $0x190] sm:$0xff]  ;;  %v9075_v41 = vld [vmem:[#allocation15_spill] sm:$0xff]  ;;  %v9085_v53 = vld [vmem:[#allocation22_spill] sm:$0xff] }
 0x32d   :  { %6093 = vmatprep.subr.mxu1 %v2950_v39  ;;  %6050 = vmatpush3.msra.mxu0 %v2902_v15  ;;  %v2932_v43 = vld [vmem:[#allocation7 + $0x110] sm:$0xff]  ;;  %v2947_v39 = vld [vmem:[#allocation7 + $0x188] sm:$0xff]  ;;  %v4004_v6 = vrot.slane %v9075_v41, %v7924_v61  ;;  %v9086_v18 = vld [vmem:[#allocation46_spill] sm:$0xff] }
 0x32e   :  { %6094 = vmatpush3.msra.mxu1 %v2934_v40  ;;  %6051 = vmatprep.subr.mxu0 %v2917_v2  ;;  %v2899_v15 = vld [vmem:[#allocation7 + $0x8] sm:$0xff]  ;;  %v2914_v40 = vld [vmem:[#allocation7 + $0x80] sm:$0xff]  ;;  %v5560_v54 = vcombine.low %v9086_v18, %v9085_v53 }
 0x32f   :  { %6095 = vmatprep.subr.mxu1 %v2949_v29  ;;  %6052 = vmatpush3.msra.mxu0 %v2901_v14  ;;  %v2946_v2 = vld [vmem:[#allocation7 + $0x180] sm:$0xff]  ;;  %v9076_v29 = vld [vmem:[#allocation16_spill] sm:$0xff] }
 0x330   :  { %6096 = vmatpush3.msra.mxu1 %v2933_v12  ;;  %6053 = vmatprep.subr.mxu0 %v2916_v10  ;;  %v4018_v14 = vrot.slane %v9076_v29, %v7924_v61  ;;  %v2930_v12 = vld [vmem:[#allocation7 + $0x100] sm:$0xff]  ;;  %v3007_v53 = vld [vmem:[#allocation7 + $0x368] sm:$0xff] }
 0x331   :  { %6097 = vmatprep.subr.mxu1 %v2948_v24  ;;  %6054 = vmatpush3.msra.mxu0 %v2900_v56  ;;  %v9077_v10 = vld [vmem:[#allocation23_spill] sm:$0xff]  ;;  %v9078_v56 = vld [vmem:[#allocation24_spill] sm:$0xff] }
 0x332   :  { %6098 = vmatpush3.msra.mxu1 %v2932_v43  ;;  %6055 = vmatprep.subr.mxu0 %v2915_v42  ;;  %v4011_v9 = vrot.slane %v9077_v10, %v7924_v61  ;;  %v4025_v24 = vrot.slane %v9078_v56, %v7924_v61  ;;  %v3954_v42 = vcombine.low %v8405_v26, %v8417_v52  ;;  %v2993_v43 = vld [vmem:[#allocation7 + $0x2f8] sm:$0xff]  ;;  %v9080_v26 = vld [vmem:[#allocation31_spill] sm:$0xff] }
 0x333   :  { %6099 = vmatprep.subr.mxu1 %v2947_v39  ;;  %6056 = vmatpush3.msra.mxu0 %v2899_v15  ;;  %v3025_v39 = vld [vmem:[#allocation7 + $0x3f8] sm:$0xff]  ;;  %v4027_v15 = vcombine.high %v4004_v6, %v4018_v14  ;;  %v5551_v52 = vcombine.high %v9080_v26, %v9079_v0  ;;  %v9083_v0 = vld [vmem:[#allocation36_spill] sm:$0xff]  ;;  %v2990_v18 = vld [vmem:[#allocation7 + $0x2e0] sm:$0xff] }
 0x334   :  { %6100 = vmatpush3.msra.mxu1 %v2931_v5  ;;  %6057 = vmatprep.subr.mxu0 %v2914_v40  ;;  %v4029_v60 = vcombine.high %v4011_v9, %v4025_v24  ;;  %v3024_v5 = vld [vmem:[#allocation7 + $0x3f0] sm:$0xff] }
 0x335   :  { %6101 = vmatprep.subr.mxu1 %v2946_v2  ;;  %6058 = vmatpush3.msra.mxu0 %v2898_v33  ;;  %v2976_v40 = vld [vmem:[#allocation7 + $0x270] sm:$0xff]  ;;  %v5553_v33 = vcombine.high %v9082_v46, %v9081_v44 }
 0x336   :  { %6102 = vmatpush3.msra.mxu1 %v2930_v12  ;;  %4307 = vmatmul.mubr.f32.vlgmr.msra.gmra.mxu0 %v3954_v42  ;;  %v3008_v2 = vld [vmem:[#allocation7 + $0x370] sm:$0xff]  ;;  %v4026_v12 = vcombine.low %v4004_v6, %v4018_v14  ;;  %v2991_v42 = vld [vmem:[#allocation7 + $0x2e8] sm:$0xff] }
 0x337   :  { %4392 = vmatmul.mubr.f32.vlgmr.msra.gmra.mxu1 %v3956_v1  ;;  %6115 = vmatprep.subr.mxu0 %v2993_v43  ;;  %v8560_v1 = vrot.slane %v5551_v52, %v7924_v61  ;;  %v8563_v43 = vrot.slane %v5553_v33, %v7924_v61  ;;  %v9087_v6 = vld [vmem:[#allocation45_spill] sm:$0xff]  ;;  %v9088_v14 = vld [vmem:[#allocation39_spill] sm:$0xff] }
 0x338   :  { %6159 = vmatprep.subr.mxu1 %v3025_v39  ;;  %4311 = vmatprep.mubr.f32.mxu0 %v4027_v15  ;;  %v9084_v39 = vld [vmem:[#allocation44_spill] sm:$0xff]  ;;  %v5559_v52 = vcombine.high %v9088_v14, %v9087_v6 }
 0x339   :  { %4396 = vmatprep.mubr.f32.mxu1 %v4029_v60  ;;  %6116 = vmatpush3.msra.mxu0 %v2977_v20  ;;  %v5558_v15 = vcombine.low %v9084_v39, %v9083_v0  ;;  %v4028_v60 = vcombine.low %v4011_v9, %v4025_v24  ;;  %v3023_v20 = vld [vmem:[#allocation7 + $0x3e8] sm:$0xff]  ;;  %v4782_v44 = vcombine.high %v8560_v1, %v8563_v43  ;;  %v3022_v39 = vld [vmem:[#allocation7 + $0x3e0] sm:$0xff] }
 0x33a   :  { %6160 = vmatpush3.msra.mxu1 %v3009_v28  ;;  %6117 = vmatprep.subr.mxu0 %v2992_v38  ;;  %v2975_v38 = vld [vmem:[#allocation7 + $0x268] sm:$0xff]  ;;  %v4781_v28 = vcombine.low %v8560_v1, %v8563_v43  ;;  %v8579_v9 = vrot.slane %v5560_v54, %v7924_v61  ;;  %v3006_v54 = vld [vmem:[#allocation7 + $0x360] sm:$0xff]  ;;  %v4980_v1 = vrot.slane %v9074_v57, %v7924_v61 }
 0x33b   :  { %6161 = vmatprep.subr.mxu1 %v3024_v5  ;;  %6118 = vmatpush3.msra.mxu0 %v2976_v40  ;;  %v8576_v33 = vrot.slane %v5558_v15, %v7924_v61  ;;  %v9089_v24 = vld [vmem:[#allocation48_spill] sm:$0xff]  ;;  %v9090_v5 = vld [vmem:[#allocation41_spill] sm:$0xff]  ;;  %v2974_v15 = vld [vmem:[#allocation7 + $0x260] sm:$0xff] }
 0x33c   :  { %6162 = vmatpush3.msra.mxu1 %v3008_v2  ;;  %4312 = vmatmul.mubr.f32.gmra.mxu0 %v4026_v12  ;;  %v5561_v40 = vcombine.high %v9090_v5, %v9089_v24  ;;  %v8584_v2 = vrot.slane %v5559_v52, %v7924_v61  ;;  %v9091_v12 = vcombine.high %v8432_v31, %v8435_v59  ;;  %v2989_v52 = vld [vmem:[#allocation7 + $0x2d8] sm:$0xff]  ;;  %v9123_v43 = vld [vmem:[#allocation51_spill] sm:$0xff] }
 0x33d   :  { %4397 = vmatmul.mubr.f32.gmra.mxu1 %v4028_v60  ;;  %6119 = vmatprep.subr.mxu0 %v2991_v42  ;;  %v9092_v42 = vcombine.high %v8448_v23, %v8453_v13  ;;  %v4852_v60 = vcombine.high %v8576_v33, %v8579_v9  ;;  %v3021_v24 = vld [vmem:[#allocation7 + $0x3d8] sm:$0xff] }
 0x33e   :  { %6163 = vmatprep.subr.mxu1 %v3023_v20  ;;  %4316 = vmatprep.mubr.f32.mxu0 %v9091_v12  ;;  %v8595_v6 = vrot.slane %v5561_v40, %v7924_v61  ;;  %v9093_v40 = vcombine.low %v8432_v31, %v8435_v59  ;;  %v2972_v31 = vld [vmem:[#allocation7 + $0x250] sm:$0xff]  ;;  %v9099_v59 = vcombine.low %v8456_v50, %v8459_v19  ;;  %v2983_v20 = vld [vmem:[#allocation7 + $0x2a8] sm:$0xff] }
 0x33f   :  { %4401 = vmatprep.mubr.f32.mxu1 %v9092_v42  ;;  %6120 = vmatpush3.msra.mxu0 %v2975_v38  ;;  %v8605_v42 = vrot.slane %v9072_v55, %v7924_v61  ;;  %v2988_v38 = vld [vmem:[#allocation7 + $0x2d0] sm:$0xff]  ;;  %v9095_v55 = vcombine.high %v8456_v50, %v8459_v19  ;;  %v3002_v50 = vld [vmem:[#allocation7 + $0x340] sm:$0xff]  ;;  %v2985_v19 = vld [vmem:[#allocation7 + $0x2b8] sm:$0xff] }
 0x340   :  { %6164 = vmatpush3.msra.mxu1 %v3007_v53  ;;  %6121 = vmatprep.subr.mxu0 %v2990_v18  ;;  %v4854_v12 = vcombine.high %v8584_v2, %v8595_v6  ;;  %v2973_v53 = vld [vmem:[#allocation7 + $0x258] sm:$0xff]  ;;  %v8612_v18 = vrot.slane %v8279_v22, %v7924_v61  ;;  %v8637_v22 = vrot.slane %v9080_v26, %v7924_v61 }
 0x341   :  { %6165 = vmatprep.subr.mxu1 %v3022_v39  ;;  %6122 = vmatpush3.msra.mxu0 %v2974_v15  ;;  %v9094_v39 = vcombine.low %v8448_v23, %v8453_v13  ;;  %v3005_v15 = vld [vmem:[#allocation7 + $0x358] sm:$0xff]  ;;  %v9096_v23 = vcombine.high %v8474_v8, %v8477_v47  ;;  %v3004_v13 = vld [vmem:[#allocation7 + $0x350] sm:$0xff] }
 0x342   :  { %6166 = vmatpush3.msra.mxu1 %v3006_v54  ;;  %4317 = vmatmul.mubr.f32.gmra.mxu0 %v9093_v40  ;;  %v3020_v54 = vld [vmem:[#allocation7 + $0x3d0] sm:$0xff]  ;;  %v9098_v40 = vld [vmem:[#allocation18_spill] sm:$0xff]  ;;  %v9125_v57 = vcombine.high %v8605_v42, %v8612_v18 }
 0x343   :  { %4402 = vmatmul.mubr.f32.gmra.mxu1 %v9094_v39  ;;  %6123 = vmatprep.subr.mxu0 %v2989_v52  ;;  %v9097_v52 = vld [vmem:[#allocation17_spill] sm:$0xff]  ;;  %v8633_v39 = vrot.slane %v9098_v40, %v7924_v61 }
 0x344   :  { %6167 = vmatprep.subr.mxu1 %v3021_v24  ;;  %4321 = vmatprep.mubr.f32.mxu0 %v9095_v55  ;;  %v8629_v24 = vrot.slane %v9097_v52, %v7924_v61  ;;  %v2987_v55 = vld [vmem:[#allocation7 + $0x2c8] sm:$0xff] }
 0x345   :  { %4406 = vmatprep.mubr.f32.mxu1 %v9096_v23  ;;  %6124 = vmatpush3.msra.mxu0 %v2973_v53  ;;  %v8641_v23 = vrot.slane %v9082_v46, %v7924_v61  ;;  %v3019_v53 = vld [vmem:[#allocation7 + $0x3c8] sm:$0xff]  ;;  %v2986_v46 = vld [vmem:[#allocation7 + $0x2c0] sm:$0xff] }
 0x346   :  { %6168 = vmatpush3.msra.mxu1 %v3005_v15  ;;  %6125 = vmatprep.subr.mxu0 %v2988_v38  ;;  %v2971_v52 = vld [vmem:[#allocation7 + $0x248] sm:$0xff]  ;;  %v9100_v38 = vcombine.low %v8474_v8, %v8477_v47  ;;  %v3991_v26 = vcombine.high %v8629_v24, %v8633_v39  ;;  %v3017_v8 = vld [vmem:[#allocation7 + $0x3b8] sm:$0xff] }
 0x347   :  { %6169 = vmatprep.subr.mxu1 %v3020_v54  ;;  %6126 = vmatpush3.msra.mxu0 %v2972_v31  ;;  %v3003_v15 = vld [vmem:[#allocation7 + $0x348] sm:$0xff]  ;;  %v3993_v54 = vcombine.high %v8637_v22, %v8641_v23  ;;  %v3018_v31 = vld [vmem:[#allocation7 + $0x3c0] sm:$0xff]  ;;  %v2969_v47 = vld [vmem:[#allocation7 + $0x238] sm:$0xff] }
 0x348   :  { %6170 = vmatpush3.msra.mxu1 %v3004_v13  ;;  %4322 = vmatmul.mubr.f32.gmra.mxu0 %v9099_v59  ;;  %v2970_v13 = vld [vmem:[#allocation7 + $0x240] sm:$0xff]  ;;  %v3001_v59 = vld [vmem:[#allocation7 + $0x338] sm:$0xff] }
 0x349   :  { %4407 = vmatmul.mubr.f32.gmra.mxu1 %v9100_v38  ;;  %6127 = vmatprep.subr.mxu0 %v2987_v55  ;;  %v2984_v55 = vld [vmem:[#allocation7 + $0x2b0] sm:$0xff] }
 0x34a   :  { %6171 = vmatprep.subr.mxu1 %v3019_v53  ;;  %6128 = vmatpush3.msra.mxu0 %v2971_v52  ;;  %v3016_v53 = vld [vmem:[#allocation7 + $0x3b0] sm:$0xff] }
 0x34b   :  { %4476 = vmatprep.mubr.f32.mxu0 %v3991_v26  ;;  %6172 = vmatpush3.msra.mxu1 %v3003_v15  ;;  %v2968_v52 = vld [vmem:[#allocation7 + $0x230] sm:$0xff]  ;;  %v3015_v15 = vld [vmem:[#allocation7 + $0x3a8] sm:$0xff] }
 0x34c   :  { %4561 = vmatprep.mubr.f32.mxu1 %v3993_v54  ;;  %6129 = vmatprep.subr.mxu0 %v2986_v46  ;;  %v3000_v38 = vld [vmem:[#allocation7 + $0x330] sm:$0xff]  ;;  %v2967_v26 = vld [vmem:[#allocation7 + $0x228] sm:$0xff]  ;;  %v2982_v54 = vld [vmem:[#allocation7 + $0x2a0] sm:$0xff] }
 0x34d   :  { %6173 = vmatprep.subr.mxu1 %v3018_v31  ;;  %6130 = vmatpush3.msra.mxu0 %v2970_v13  ;;  %v2999_v46 = vld [vmem:[#allocation7 + $0x328] sm:$0xff]  ;;  %v3014_v31 = vld [vmem:[#allocation7 + $0x3a0] sm:$0xff] }
 0x34e   :  { %6174 = vmatpush3.msra.mxu1 %v3002_v50  ;;  %6131 = vmatprep.subr.mxu0 %v2985_v19  ;;  %v2966_v13 = vld [vmem:[#allocation7 + $0x220] sm:$0xff]  ;;  %v2981_v19 = vld [vmem:[#allocation7 + $0x298] sm:$0xff] }
 0x34f   :  { %6175 = vmatprep.subr.mxu1 %v3017_v8  ;;  %6132 = vmatpush3.msra.mxu0 %v2969_v47  ;;  %v2998_v50 = vld [vmem:[#allocation7 + $0x320] sm:$0xff]  ;;  %v3013_v8 = vld [vmem:[#allocation7 + $0x398] sm:$0xff] }
 0x350   :  { %6176 = vmatpush3.msra.mxu1 %v3001_v59  ;;  %6133 = vmatprep.subr.mxu0 %v2984_v55  ;;  %v2965_v47 = vld [vmem:[#allocation7 + $0x218] sm:$0xff]  ;;  %v2980_v55 = vld [vmem:[#allocation7 + $0x290] sm:$0xff] }
 0x351   :  { %6177 = vmatprep.subr.mxu1 %v3016_v53  ;;  %6134 = vmatpush3.msra.mxu0 %v2968_v52  ;;  %v2997_v59 = vld [vmem:[#allocation7 + $0x318] sm:$0xff]  ;;  %v3012_v53 = vld [vmem:[#allocation7 + $0x390] sm:$0xff] }
 0x352   :  { %6178 = vmatpush3.msra.mxu1 %v3000_v38  ;;  %6135 = vmatprep.subr.mxu0 %v2983_v20  ;;  %v2964_v52 = vld [vmem:[#allocation7 + $0x210] sm:$0xff]  ;;  %v2979_v38 = vld [vmem:[#allocation7 + $0x288] sm:$0xff] }
 0x353   :  { %6179 = vmatprep.subr.mxu1 %v3015_v15  ;;  %6136 = vmatpush3.msra.mxu0 %v2967_v26  ;;  %v2996_v20 = vld [vmem:[#allocation7 + $0x310] sm:$0xff]  ;;  %v3011_v15 = vld [vmem:[#allocation7 + $0x388] sm:$0xff] }
 0x354   :  { %6180 = vmatpush3.msra.mxu1 %v2999_v46  ;;  %6137 = vmatprep.subr.mxu0 %v2982_v54  ;;  %v2963_v26 = vld [vmem:[#allocation7 + $0x208] sm:$0xff]  ;;  %v2978_v54 = vld [vmem:[#allocation7 + $0x280] sm:$0xff] }
 0x355   :  { %6181 = vmatprep.subr.mxu1 %v3014_v31  ;;  %6138 = vmatpush3.msra.mxu0 %v2966_v13  ;;  %v2995_v46 = vld [vmem:[#allocation7 + $0x308] sm:$0xff]  ;;  %v3010_v31 = vld [vmem:[#allocation7 + $0x380] sm:$0xff] }
 0x356   :  { %6182 = vmatpush3.msra.mxu1 %v2998_v50  ;;  %6139 = vmatprep.subr.mxu0 %v2981_v19  ;;  %v2962_v13 = vld [vmem:[#allocation7 + $0x200] sm:$0xff] }
 0x357   :  { %6183 = vmatprep.subr.mxu1 %v3013_v8  ;;  %6140 = vmatpush3.msra.mxu0 %v2965_v47  ;;  %v9101_v50 = vld [vmem:[#allocation34_spill] sm:$0xff]  ;;  %v4054_v8 = vrot.slane %v9083_v0, %v7924_v61 }
 0x358   :  { %6184 = vmatpush3.msra.mxu1 %v2997_v59  ;;  %6141 = vmatprep.subr.mxu0 %v2980_v55  ;;  %v4040_v19 = vrot.slane %v9101_v50, %v7924_v61  ;;  %v2994_v47 = vld [vmem:[#allocation7 + $0x300] sm:$0xff]  ;;  %v4047_v59 = vrot.slane %v9088_v14, %v7924_v61  ;;  %v4061_v55 = vrot.slane %v9090_v5, %v7924_v61  ;;  %v4646_v0 = vld [vmem:[#allocation7 + $0x9f8] sm:$0xff] }
 0x359   :  { %6185 = vmatprep.subr.mxu1 %v3012_v53  ;;  %6142 = vmatpush3.msra.mxu0 %v2964_v52  ;;  %v3990_v53 = vcombine.low %v8629_v24, %v8633_v39  ;;  %v4614_v52 = vld [vmem:[#allocation7 + $0x8f8] sm:$0xff]  ;;  %v4645_v24 = vld [vmem:[#allocation7 + $0x9f0] sm:$0xff] }
 0x35a   :  { %6186 = vmatpush3.msra.mxu1 %v2996_v20  ;;  %6143 = vmatprep.subr.mxu0 %v2979_v38  ;;  %v3992_v20 = vcombine.low %v8637_v22, %v8641_v23  ;;  %v4063_v38 = vcombine.high %v4040_v19, %v4054_v8  ;;  %v4065_v14 = vcombine.high %v4047_v59, %v4061_v55  ;;  %v4630_v5 = vld [vmem:[#allocation7 + $0x978] sm:$0xff]  ;;  %v4597_v39 = vld [vmem:[#allocation7 + $0x870] sm:$0xff]  ;;  %v4612_v23 = vld [vmem:[#allocation7 + $0x8e8] sm:$0xff] }
 0x35b   :  { %6187 = vmatprep.subr.mxu1 %v3011_v15  ;;  %6144 = vmatpush3.msra.mxu0 %v2963_v26  ;;  %v4598_v15 = vld [vmem:[#allocation7 + $0x878] sm:$0xff]  ;;  %v4613_v26 = vld [vmem:[#allocation7 + $0x8f0] sm:$0xff]  ;;  %v4062_v22 = vcombine.low %v4040_v19, %v4054_v8  ;;  %v9103_v19 = vcombine.high %v8508_v11, %v8511_v58  ;;  %v4627_v8 = vld [vmem:[#allocation7 + $0x960] sm:$0xff] }
 0x35c   :  { %6188 = vmatpush3.msra.mxu1 %v2995_v46  ;;  %6145 = vmatprep.subr.mxu0 %v2978_v54  ;;  %v4629_v46 = vld [vmem:[#allocation7 + $0x970] sm:$0xff]  ;;  %v4064_v54 = vcombine.low %v4047_v59, %v4061_v55  ;;  %v4610_v59 = vld [vmem:[#allocation7 + $0x8d8] sm:$0xff] }
 0x35d   :  { %6189 = vmatprep.subr.mxu1 %v3010_v31  ;;  %6146 = vmatpush3.msra.mxu0 %v2962_v13  ;;  %v4644_v31 = vld [vmem:[#allocation7 + $0x9e8] sm:$0xff]  ;;  %v4642_v55 = vld [vmem:[#allocation7 + $0x9d8] sm:$0xff] }
 0x35e   :  { %6190 = vmatpush3.msra.mxu1 %v2994_v47  ;;  %4477 = vmatmul.mubr.f32.vlgmr.msra.gmra.mxu0 %v3990_v53  ;;  %v4596_v13 = vld [vmem:[#allocation7 + $0x868] sm:$0xff]  ;;  %v4611_v53 = vld [vmem:[#allocation7 + $0x8e0] sm:$0xff] }
 0x35f   :  { %4562 = vmatmul.mubr.f32.vlgmr.msra.gmra.mxu1 %v3992_v20  ;;  %6203 = vmatprep.subr.mxu0 %v4614_v52  ;;  %v4628_v47 = vld [vmem:[#allocation7 + $0x968] sm:$0xff]  ;;  %v9102_v52 = vcombine.high %v8492_v25, %v8501_v30  ;;  %v4643_v20 = vld [vmem:[#allocation7 + $0x9e0] sm:$0xff] }
 0x360   :  { %6247 = vmatprep.subr.mxu1 %v4646_v0  ;;  %4481 = vmatprep.mubr.f32.mxu0 %v4063_v38  ;;  %v4595_v0 = vld [vmem:[#allocation7 + $0x860] sm:$0xff] }
 0x361   :  { %4566 = vmatprep.mubr.f32.mxu1 %v4065_v14  ;;  %6204 = vmatpush3.msra.mxu0 %v4598_v15  ;;  %v9104_v38 = vld [vmem:[#allocation19_spill] sm:$0xff]  ;;  %v9105_v14 = vld [vmem:[#allocation21_spill] sm:$0xff] }
 0x362   :  { %6248 = vmatpush3.msra.mxu1 %v4630_v5  ;;  %6205 = vmatprep.subr.mxu0 %v4613_v26  ;;  %v5546_v15 = vcombine.low %v9104_v38, %v7939_v49  ;;  %v5548_v5 = vcombine.low %v9105_v14, %v9075_v41  ;;  %v9106_v26 = vcombine.low %v8492_v25, %v8501_v30  ;;  %v4641_v41 = vld [vmem:[#allocation7 + $0x9d0] sm:$0xff]  ;;  %v4606_v14 = vld [vmem:[#allocation7 + $0x8b8] sm:$0xff] }
 0x363   :  { %6249 = vmatprep.subr.mxu1 %v4645_v24  ;;  %6206 = vmatpush3.msra.mxu0 %v4597_v39  ;;  %v4594_v24 = vld [vmem:[#allocation7 + $0x858] sm:$0xff]  ;;  %v9107_v39 = vld [vmem:[#allocation35_spill] sm:$0xff]  ;;  %v9109_v49 = vcombine.high %v8514_v34, %v8521_v3  ;;  %v9110_v25 = vld [vmem:[#allocation20_spill] sm:$0xff] }
 0x364   :  { %6250 = vmatpush3.msra.mxu1 %v4629_v46  ;;  %4482 = vmatmul.mubr.f32.gmra.mxu0 %v4062_v22  ;;  %v5549_v46 = vcombine.high %v7966_v45, %v9107_v39  ;;  %v9108_v22 = vcombine.low %v8508_v11, %v8511_v58  ;;  %v5547_v30 = vcombine.high %v7963_v4, %v9110_v25  ;;  %v4625_v11 = vld [vmem:[#allocation7 + $0x950] sm:$0xff]  ;;  %v4640_v4 = vld [vmem:[#allocation7 + $0x9c8] sm:$0xff]  ;;  %v4587_v25 = vld [vmem:[#allocation7 + $0x820] sm:$0xff] }
 0x365   :  { %4567 = vmatmul.mubr.f32.gmra.mxu1 %v4064_v54  ;;  %6207 = vmatprep.subr.mxu0 %v4612_v23  ;;  %v4626_v23 = vld [vmem:[#allocation7 + $0x958] sm:$0xff]  ;;  %v4609_v54 = vld [vmem:[#allocation7 + $0x8d0] sm:$0xff]  ;;  %v9111_v45 = vcombine.high %v8532_v37, %v8537_v62  ;;  %v8692_v58 = vrot.slane %v5546_v15, %v7924_v61  ;;  %v4623_v15 = vld [vmem:[#allocation7 + $0x940] sm:$0xff] }
 0x366   :  { %6251 = vmatprep.subr.mxu1 %v4644_v31  ;;  %4486 = vmatprep.mubr.f32.mxu0 %v9102_v52  ;;  %v4593_v31 = vld [vmem:[#allocation7 + $0x850] sm:$0xff]  ;;  %v4592_v52 = vld [vmem:[#allocation7 + $0x848] sm:$0xff] }
 0x367   :  { %4571 = vmatprep.mubr.f32.mxu1 %v9103_v19  ;;  %6208 = vmatpush3.msra.mxu0 %v4596_v13  ;;  %v8695_v13 = vrot.slane %v5548_v5, %v7924_v61  ;;  %v8704_v19 = vrot.slane %v5547_v30, %v7924_v61  ;;  %v4622_v5 = vld [vmem:[#allocation7 + $0x938] sm:$0xff]  ;;  %v4589_v39 = vld [vmem:[#allocation7 + $0x830] sm:$0xff]  ;;  %v4619_v30 = vld [vmem:[#allocation7 + $0x920] sm:$0xff] }
 0x368   :  { %6252 = vmatpush3.msra.mxu1 %v4628_v47  ;;  %6209 = vmatprep.subr.mxu0 %v4611_v53  ;;  %v4608_v47 = vld [vmem:[#allocation7 + $0x8c8] sm:$0xff]  ;;  %v8698_v53 = vrot.slane %v5549_v46, %v7924_v61  ;;  %v4621_v46 = vld [vmem:[#allocation7 + $0x930] sm:$0xff] }
 0x369   :  { %6253 = vmatprep.subr.mxu1 %v4643_v20  ;;  %6210 = vmatpush3.msra.mxu0 %v4595_v0  ;;  %v9112_v20 = vcombine.low %v8514_v34, %v8521_v3  ;;  %v4624_v0 = vld [vmem:[#allocation7 + $0x948] sm:$0xff]  ;;  %v4639_v34 = vld [vmem:[#allocation7 + $0x9c0] sm:$0xff] }
 0x36a   :  { %6254 = vmatpush3.msra.mxu1 %v4627_v8  ;;  %4487 = vmatmul.mubr.f32.gmra.mxu0 %v9106_v26  ;;  %v9113_v8 = vcombine.low %v8532_v37, %v8537_v62  ;;  %v4746_v38 = vcombine.high %v8704_v19, %v8698_v53  ;;  %v4591_v3 = vld [vmem:[#allocation7 + $0x840] sm:$0xff]  ;;  %v4638_v62 = vld [vmem:[#allocation7 + $0x9b8] sm:$0xff]  ;;  %v4605_v26 = vld [vmem:[#allocation7 + $0x8b0] sm:$0xff] }
 0x36b   :  { %4572 = vmatmul.mubr.f32.gmra.mxu1 %v9108_v22  ;;  %6211 = vmatprep.subr.mxu0 %v4610_v59  ;;  %v4744_v59 = vcombine.high %v8692_v58, %v8695_v13  ;;  %v4590_v37 = vld [vmem:[#allocation7 + $0x838] sm:$0xff]  ;;  %v4604_v22 = vld [vmem:[#allocation7 + $0x8a8] sm:$0xff] }
 0x36c   :  { %6255 = vmatprep.subr.mxu1 %v4642_v55  ;;  %4491 = vmatprep.mubr.f32.mxu0 %v9109_v49  ;;  %v4607_v55 = vld [vmem:[#allocation7 + $0x8c0] sm:$0xff]  ;;  %v4620_v49 = vld [vmem:[#allocation7 + $0x928] sm:$0xff] }
 0x36d   :  { %4576 = vmatprep.mubr.f32.mxu1 %v9111_v45  ;;  %6212 = vmatpush3.msra.mxu0 %v4594_v24  ;;  %v4637_v24 = vld [vmem:[#allocation7 + $0x9b0] sm:$0xff]  ;;  %v4602_v45 = vld [vmem:[#allocation7 + $0x898] sm:$0xff] }
 0x36e   :  { %6256 = vmatpush3.msra.mxu1 %v4626_v23  ;;  %6213 = vmatprep.subr.mxu0 %v4609_v54  ;;  %v4636_v23 = vld [vmem:[#allocation7 + $0x9a8] sm:$0xff] }
 0x36f   :  { %6257 = vmatprep.subr.mxu1 %v4641_v41  ;;  %6214 = vmatpush3.msra.mxu0 %v4593_v31  ;;  %v4588_v54 = vld [vmem:[#allocation7 + $0x828] sm:$0xff]  ;;  %v4603_v41 = vld [vmem:[#allocation7 + $0x8a0] sm:$0xff] }
 0x370   :  { %6258 = vmatpush3.msra.mxu1 %v4625_v11  ;;  %4492 = vmatmul.mubr.f32.gmra.mxu0 %v9112_v20  ;;  %v4635_v31 = vld [vmem:[#allocation7 + $0x9a0] sm:$0xff]  ;;  %v4634_v11 = vld [vmem:[#allocation7 + $0x998] sm:$0xff]  ;;  %v4633_v20 = vld [vmem:[#allocation7 + $0x990] sm:$0xff] }
 0x371   :  { %4577 = vmatmul.mubr.f32.gmra.mxu1 %v9113_v8  ;;  %6215 = vmatprep.subr.mxu0 %v4608_v47  ;;  %v4586_v47 = vld [vmem:[#allocation7 + $0x818] sm:$0xff]  ;;  %v9114_v8 = vld [vmem:[#allocation27_spill] sm:$0xff] }
 0x372   :  { %6259 = vmatprep.subr.mxu1 %v4640_v4  ;;  %6216 = vmatpush3.msra.mxu0 %v4592_v52  ;;  %v4618_v4 = vld [vmem:[#allocation7 + $0x918] sm:$0xff]  ;;  %v4601_v52 = vld [vmem:[#allocation7 + $0x890] sm:$0xff] }
 0x373   :  { %5095 = vmatprep.mubr.f32.mxu0 %v4744_v59  ;;  %6260 = vmatpush3.msra.mxu1 %v4624_v0  ;;  %v4585_v0 = vld [vmem:[#allocation7 + $0x810] sm:$0xff]  ;;  %v5554_v59 = vcombine.low %v9114_v8, %v9076_v29 }
 0x374   :  { %5180 = vmatprep.mubr.f32.mxu1 %v4746_v38  ;;  %6217 = vmatprep.subr.mxu0 %v4607_v55  ;;  %v9115_v55 = vld [vmem:[#allocation25_spill] sm:$0xff] }
 0x375   :  { %6261 = vmatprep.subr.mxu1 %v4639_v34  ;;  %6218 = vmatpush3.msra.mxu0 %v4591_v3  ;;  %v9116_v38 = vld [vmem:[#allocation29_spill] sm:$0xff] }
 0x376   :  { %6262 = vmatpush3.msra.mxu1 %v4623_v15  ;;  %6219 = vmatprep.subr.mxu0 %v4606_v14  ;;  %v5556_v34 = vcombine.low %v9116_v38, %v9115_v55  ;;  %v4617_v3 = vld [vmem:[#allocation7 + $0x910] sm:$0xff]  ;;  %v4600_v15 = vld [vmem:[#allocation7 + $0x888] sm:$0xff]  ;;  %v9117_v14 = vld [vmem:[#allocation38_spill] sm:$0xff]  ;;  %v4865_v55 = vrot.slane %v7942_v63, %v7924_v61  ;;  %v4951_v63 = vrot.slane %v7972_v21, %v7924_v61 }
 0x377   :  { %6263 = vmatprep.subr.mxu1 %v4638_v62  ;;  %6220 = vmatpush3.msra.mxu0 %v4590_v37  ;;  %v5557_v62 = vcombine.high %v9078_v56, %v9117_v14  ;;  %v4632_v37 = vld [vmem:[#allocation7 + $0x988] sm:$0xff]  ;;  %v4615_v56 = vld [vmem:[#allocation7 + $0x900] sm:$0xff]  ;;  %v4706_v21 = vld [vmem:[#allocation7 + $0xbd8] sm:$0xff] }
 0x378   :  { %6264 = vmatpush3.msra.mxu1 %v4622_v5  ;;  %6221 = vmatprep.subr.mxu0 %v4605_v26  ;;  %v4584_v5 = vld [vmem:[#allocation7 + $0x808] sm:$0xff]  ;;  %v4707_v14 = vld [vmem:[#allocation7 + $0xbe0] sm:$0xff] }
 0x379   :  { %6265 = vmatprep.subr.mxu1 %v4637_v24  ;;  %6222 = vmatpush3.msra.mxu0 %v4589_v39  ;;  %v4616_v26 = vld [vmem:[#allocation7 + $0x908] sm:$0xff]  ;;  %v4599_v24 = vld [vmem:[#allocation7 + $0x880] sm:$0xff] }
 0x37a   :  { %6266 = vmatpush3.msra.mxu1 %v4621_v46  ;;  %6223 = vmatprep.subr.mxu0 %v4604_v22  ;;  %v9118_v39 = vld [vmem:[#allocation28_spill] sm:$0xff]  ;;  %v4631_v46 = vld [vmem:[#allocation7 + $0x980] sm:$0xff] }
 0x37b   :  { %6267 = vmatprep.subr.mxu1 %v4636_v23  ;;  %6224 = vmatpush3.msra.mxu0 %v4588_v54  ;;  %v5555_v29 = vcombine.high %v9077_v10, %v9118_v39  ;;  %v4583_v22 = vld [vmem:[#allocation7 + $0x800] sm:$0xff]  ;;  %v4793_v23 = vrot.slane %v5554_v59, %v7924_v61  ;;  %v4807_v54 = vrot.slane %v5556_v34, %v7924_v61  ;;  %v4676_v59 = vld [vmem:[#allocation7 + $0xae8] sm:$0xff] }
 0x37c   :  { %6268 = vmatpush3.msra.mxu1 %v4620_v49  ;;  %6225 = vmatprep.subr.mxu0 %v4603_v41  ;;  %v4814_v49 = vrot.slane %v5557_v62, %v7924_v61  ;;  %v4743_v41 = vcombine.low %v8692_v58, %v8695_v13  ;;  %v4745_v10 = vcombine.low %v8704_v19, %v8698_v53  ;;  %v4677_v58 = vld [vmem:[#allocation7 + $0xaf0] sm:$0xff]  ;;  %v4659_v62 = vld [vmem:[#allocation7 + $0xa60] sm:$0xff] }
 0x37d   :  { %6269 = vmatprep.subr.mxu1 %v4635_v31  ;;  %6226 = vmatpush3.msra.mxu0 %v4587_v25  ;;  %v4678_v31 = vld [vmem:[#allocation7 + $0xaf8] sm:$0xff]  ;;  %v4709_v13 = vld [vmem:[#allocation7 + $0xbf0] sm:$0xff]  ;;  %v4879_v53 = vrot.slane %v7954_v51, %v7924_v61  ;;  %v4815_v8 = vcombine.low %v4793_v23, %v4807_v54  ;;  %v4708_v51 = vld [vmem:[#allocation7 + $0xbe8] sm:$0xff] }
 0x37e   :  { %6270 = vmatpush3.msra.mxu1 %v4619_v30  ;;  %6227 = vmatprep.subr.mxu0 %v4602_v45  ;;  %v4710_v25 = vld [vmem:[#allocation7 + $0xbf8] sm:$0xff]  ;;  %v4800_v30 = vrot.slane %v5555_v29, %v7924_v61  ;;  %v4816_v45 = vcombine.high %v4793_v23, %v4807_v54  ;;  %v4693_v19 = vld [vmem:[#allocation7 + $0xb70] sm:$0xff]  ;;  %v9120_v23 = vld [vmem:[#allocation43_spill] sm:$0xff] }
 0x37f   :  { %6271 = vmatprep.subr.mxu1 %v4634_v11  ;;  %6228 = vmatpush3.msra.mxu0 %v4586_v47  ;;  %v4662_v11 = vld [vmem:[#allocation7 + $0xa78] sm:$0xff]  ;;  %v4888_v34 = vcombine.high %v4865_v55, %v4879_v53  ;;  %v4887_v39 = vcombine.low %v4865_v55, %v4879_v53  ;;  %v5550_v54 = vcombine.low %v9120_v23, %v9098_v40  ;;  %v4697_v23 = vld [vmem:[#allocation7 + $0xb90] sm:$0xff] }
 0x380   :  { %6272 = vmatpush3.msra.mxu1 %v4618_v4  ;;  %6229 = vmatprep.subr.mxu0 %v4601_v52  ;;  %v4818_v47 = vcombine.high %v4800_v30, %v4814_v49  ;;  %v4694_v4 = vld [vmem:[#allocation7 + $0xb78] sm:$0xff]  ;;  %v4661_v52 = vld [vmem:[#allocation7 + $0xa70] sm:$0xff]  ;;  %v4817_v38 = vcombine.low %v4800_v30, %v4814_v49 }
 0x381   :  { %6273 = vmatprep.subr.mxu1 %v4633_v20  ;;  %6230 = vmatpush3.msra.mxu0 %v4585_v0  ;;  %v4872_v20 = vrot.slane %v8050_v17, %v7924_v61  ;;  %v4886_v0 = vrot.slane %v8082_v35, %v7924_v61  ;;  %v4675_v35 = vld [vmem:[#allocation7 + $0xae0] sm:$0xff]  ;;  %v4674_v29 = vld [vmem:[#allocation7 + $0xad8] sm:$0xff]  ;;  %v4657_v30 = vld [vmem:[#allocation7 + $0xa50] sm:$0xff]  ;;  %v8750_v40 = vrot.slane %v5550_v54, %v7924_v61 }
 0x382   :  { %6274 = vmatpush3.msra.mxu1 %v4617_v3  ;;  %6231 = vmatprep.subr.mxu0 %v4600_v15  ;;  %v4660_v3 = vld [vmem:[#allocation7 + $0xa68] sm:$0xff]  ;;  %v4702_v55 = vld [vmem:[#allocation7 + $0xbb8] sm:$0xff]  ;;  %v4649_v54 = vld [vmem:[#allocation7 + $0xa10] sm:$0xff] }
 0x383   :  { %6275 = vmatprep.subr.mxu1 %v4632_v37  ;;  %6232 = vmatpush3.msra.mxu0 %v4584_v5  ;;  %v4890_v17 = vcombine.high %v4872_v20, %v4886_v0  ;;  %v4692_v15 = vld [vmem:[#allocation7 + $0xb68] sm:$0xff]  ;;  %v4691_v37 = vld [vmem:[#allocation7 + $0xb60] sm:$0xff]  ;;  %v4944_v5 = vrot.slane %v9070_v36, %v7924_v61 }
 0x384   :  { %6276 = vmatpush3.msra.mxu1 %v4616_v26  ;;  %6233 = vmatprep.subr.mxu0 %v4599_v24  ;;  %v9119_v26 = vld [vmem:[#allocation40_spill] sm:$0xff] }
 0x385   :  { %6277 = vmatprep.subr.mxu1 %v4631_v46  ;;  %6234 = vmatpush3.msra.mxu0 %v4583_v22  ;;  %v4958_v24 = vrot.slane %v9119_v26, %v7924_v61  ;;  %v4937_v46 = vrot.slane %v7960_v32, %v7924_v61  ;;  %v4889_v22 = vcombine.low %v4872_v20, %v4886_v0  ;;  %v4705_v32 = vld [vmem:[#allocation7 + $0xbd0] sm:$0xff]  ;;  %v4703_v20 = vld [vmem:[#allocation7 + $0xbc0] sm:$0xff] }
 0x386   :  { %6278 = vmatpush3.msra.mxu1 %v4615_v56  ;;  %5096 = vmatmul.mubr.f32.vlgmr.msra.gmra.mxu0 %v4743_v41  ;;  %v9121_v56 = vld [vmem:[#allocation32_spill] sm:$0xff]  ;;  %v4658_v41 = vld [vmem:[#allocation7 + $0xa58] sm:$0xff]  ;;  %v4655_v0 = vld [vmem:[#allocation7 + $0xa40] sm:$0xff] }
 0x387   :  { %5181 = vmatmul.mubr.f32.vlgmr.msra.gmra.mxu1 %v4745_v10  ;;  %6291 = vmatprep.subr.mxu0 %v4678_v31  ;;  %v5552_v36 = vcombine.low %v9121_v56, %v9101_v50  ;;  %v4960_v49 = vcombine.high %v4937_v46, %v4951_v63  ;;  %v4962_v31 = vcombine.high %v4944_v5, %v4958_v24  ;;  %v4690_v10 = vld [vmem:[#allocation7 + $0xb58] sm:$0xff]  ;;  %v4683_v26 = vld [vmem:[#allocation7 + $0xb20] sm:$0xff]  ;;  %v4681_v56 = vld [vmem:[#allocation7 + $0xb10] sm:$0xff] }
 0x388   :  { %6335 = vmatprep.subr.mxu1 %v4710_v25  ;;  %5100 = vmatprep.mubr.f32.mxu0 %v4816_v45  ;;  %v4673_v25 = vld [vmem:[#allocation7 + $0xad0] sm:$0xff] }
 0x389   :  { %5185 = vmatprep.mubr.f32.mxu1 %v4818_v47  ;;  %6292 = vmatpush3.msra.mxu0 %v4662_v11  ;;  %v4689_v45 = vld [vmem:[#allocation7 + $0xb50] sm:$0xff]  ;;  %v8753_v50 = vrot.slane %v5552_v36, %v7924_v61  ;;  %v4959_v11 = vcombine.low %v4937_v46, %v4951_v63  ;;  %v4672_v47 = vld [vmem:[#allocation7 + $0xac8] sm:$0xff]  ;;  %v4667_v63 = vld [vmem:[#allocation7 + $0xaa0] sm:$0xff] }
 0x38a   :  { %6336 = vmatpush3.msra.mxu1 %v4694_v4  ;;  %6293 = vmatprep.subr.mxu0 %v4677_v58  ;;  %v4961_v4 = vcombine.low %v4944_v5, %v4958_v24  ;;  %v4704_v58 = vld [vmem:[#allocation7 + $0xbc8] sm:$0xff]  ;;  %v4651_v5 = vld [vmem:[#allocation7 + $0xa20] sm:$0xff]  ;;  %v4666_v24 = vld [vmem:[#allocation7 + $0xa98] sm:$0xff] }
 0x38b   :  { %6337 = vmatprep.subr.mxu1 %v4709_v13  ;;  %6294 = vmatpush3.msra.mxu0 %v4661_v52  ;;  %v4656_v13 = vld [vmem:[#allocation7 + $0xa48] sm:$0xff]  ;;  %v4780_v53 = vcombine.high %v8750_v40, %v8753_v50  ;;  %v4682_v46 = vld [vmem:[#allocation7 + $0xb18] sm:$0xff] }
 0x38c   :  { %6338 = vmatpush3.msra.mxu1 %v4693_v19  ;;  %5101 = vmatmul.mubr.f32.gmra.mxu0 %v4815_v8  ;;  %v4688_v52 = vld [vmem:[#allocation7 + $0xb48] sm:$0xff]  ;;  %v4671_v19 = vld [vmem:[#allocation7 + $0xac0] sm:$0xff] }
 0x38d   :  { %5186 = vmatmul.mubr.f32.gmra.mxu1 %v4817_v38  ;;  %6295 = vmatprep.subr.mxu0 %v4676_v59  ;;  %v4687_v8 = vld [vmem:[#allocation7 + $0xb40] sm:$0xff]  ;;  %v4670_v59 = vld [vmem:[#allocation7 + $0xab8] sm:$0xff]  ;;  %v4664_v36 = vld [vmem:[#allocation7 + $0xa88] sm:$0xff] }
 0x38e   :  { %6339 = vmatprep.subr.mxu1 %v4708_v51  ;;  %5105 = vmatprep.mubr.f32.mxu0 %v4888_v34  ;;  %v4654_v38 = vld [vmem:[#allocation7 + $0xa38] sm:$0xff]  ;;  %v4669_v34 = vld [vmem:[#allocation7 + $0xab0] sm:$0xff] }
 0x38f   :  { %5190 = vmatprep.mubr.f32.mxu1 %v4890_v17  ;;  %6296 = vmatpush3.msra.mxu0 %v4660_v3  ;;  %v4686_v51 = vld [vmem:[#allocation7 + $0xb38] sm:$0xff]  ;;  %v4701_v3 = vld [vmem:[#allocation7 + $0xbb0] sm:$0xff] }
 0x390   :  { %6340 = vmatpush3.msra.mxu1 %v4692_v15  ;;  %6297 = vmatprep.subr.mxu0 %v4675_v35  ;;  %v4653_v17 = vld [vmem:[#allocation7 + $0xa30] sm:$0xff]  ;;  %v4668_v35 = vld [vmem:[#allocation7 + $0xaa8] sm:$0xff] }
 0x391   :  { %6341 = vmatprep.subr.mxu1 %v4707_v14  ;;  %6298 = vmatpush3.msra.mxu0 %v4659_v62  ;;  %v4685_v15 = vld [vmem:[#allocation7 + $0xb30] sm:$0xff]  ;;  %v4700_v14 = vld [vmem:[#allocation7 + $0xba8] sm:$0xff] }
 0x392   :  { %6342 = vmatpush3.msra.mxu1 %v4691_v37  ;;  %5106 = vmatmul.mubr.f32.gmra.mxu0 %v4887_v39  ;;  %v4652_v62 = vld [vmem:[#allocation7 + $0xa28] sm:$0xff]  ;;  %v4699_v37 = vld [vmem:[#allocation7 + $0xba0] sm:$0xff]  ;;  %v4698_v39 = vld [vmem:[#allocation7 + $0xb98] sm:$0xff] }
 0x393   :  { %5191 = vmatmul.mubr.f32.gmra.mxu1 %v4889_v22  ;;  %6299 = vmatprep.subr.mxu0 %v4674_v29  ;;  %v4650_v29 = vld [vmem:[#allocation7 + $0xa18] sm:$0xff]  ;;  %v4665_v22 = vld [vmem:[#allocation7 + $0xa90] sm:$0xff] }
 0x394   :  { %6343 = vmatprep.subr.mxu1 %v4706_v21  ;;  %5110 = vmatprep.mubr.f32.mxu0 %v4960_v49 }
 0x395   :  { %5195 = vmatprep.mubr.f32.mxu1 %v4962_v31  ;;  %6300 = vmatpush3.msra.mxu0 %v4658_v41  ;;  %v4696_v31 = vld [vmem:[#allocation7 + $0xb88] sm:$0xff] }
 0x396   :  { %6344 = vmatpush3.msra.mxu1 %v4690_v10  ;;  %6301 = vmatprep.subr.mxu0 %v4673_v25  ;;  %v4648_v10 = vld [vmem:[#allocation7 + $0xa08] sm:$0xff] }
 0x397   :  { %6345 = vmatprep.subr.mxu1 %v4705_v32  ;;  %6302 = vmatpush3.msra.mxu0 %v4657_v30  ;;  %v4680_v32 = vld [vmem:[#allocation7 + $0xb08] sm:$0xff]  ;;  %v4663_v30 = vld [vmem:[#allocation7 + $0xa80] sm:$0xff] }
 0x398   :  { %6346 = vmatpush3.msra.mxu1 %v4689_v45  ;;  %5111 = vmatmul.mubr.f32.gmra.mxu0 %v4959_v11  ;;  %v4695_v11 = vld [vmem:[#allocation7 + $0xb80] sm:$0xff] }
 0x399   :  { %5196 = vmatmul.mubr.f32.gmra.mxu1 %v4961_v4  ;;  %6303 = vmatprep.subr.mxu0 %v4672_v47  ;;  %v4647_v47 = vld [vmem:[#allocation7 + $0xa00] sm:$0xff] }
 0x39a   :  { %6347 = vmatprep.subr.mxu1 %v4704_v58  ;;  %6304 = vmatpush3.msra.mxu0 %v4656_v13  ;;  %v4679_v58 = vld [vmem:[#allocation7 + $0xb00] sm:$0xff]  ;;  %v4779_v13 = vcombine.low %v8750_v40, %v8753_v50 }
 0x39b   :  { %5265 = vmatprep.mubr.f32.mxu0 %v4780_v53  ;;  %6348 = vmatpush3.msra.mxu1 %v4688_v52  ;;  %v4901_v52 = vrot.slane %v8004_v48, %v7924_v61 }
 0x39c   :  { %5350 = vmatprep.mubr.f32.mxu1 %v4782_v44  ;;  %6305 = vmatprep.subr.mxu0 %v4671_v19  ;;  %v4684_v44 = vld [vmem:[#allocation7 + $0xb28] sm:$0xff]  ;;  %v4915_v19 = vrot.slane %v8016_v27, %v7924_v61 }
 0x39d   :  { %6349 = vmatprep.subr.mxu1 %v4703_v20  ;;  %6306 = vmatpush3.msra.mxu0 %v4655_v0  ;;  %v4908_v20 = vrot.slane %v9071_v16, %v7924_v61  ;;  %v4922_v0 = vrot.slane %v9073_v7, %v7924_v61 }
 0x39e   :  { %6350 = vmatpush3.msra.mxu1 %v4687_v8  ;;  %6307 = vmatprep.subr.mxu0 %v4670_v59  ;;  %v4924_v27 = vcombine.high %v4901_v52, %v4915_v19  ;;  %v9122_v8 = vcombine.low %v8576_v33, %v8579_v9 }
 0x39f   :  { %6351 = vmatprep.subr.mxu1 %v4702_v55  ;;  %6308 = vmatpush3.msra.mxu0 %v4654_v38  ;;  %v4926_v16 = vcombine.high %v4908_v20, %v4922_v0  ;;  %v9124_v55 = vcombine.low %v8584_v2, %v8595_v6  ;;  %v9126_v2 = vcombine.low %v8605_v42, %v8612_v18 }
 0x3a0   :  { %6352 = vmatpush3.msra.mxu1 %v4686_v51  ;;  %6309 = vmatprep.subr.mxu0 %v4669_v34  ;;  %v4925_v51 = vcombine.low %v4908_v20, %v4922_v0 }
 0x3a1   :  { %6353 = vmatprep.subr.mxu1 %v4701_v3  ;;  %6310 = vmatpush3.msra.mxu0 %v4653_v17 }
 0x3a2   :  { %6354 = vmatpush3.msra.mxu1 %v4685_v15  ;;  %6311 = vmatprep.subr.mxu0 %v4668_v35 }
 0x3a3   :  { %6355 = vmatprep.subr.mxu1 %v4700_v14  ;;  %6312 = vmatpush3.msra.mxu0 %v4652_v62  ;;  %v5883_v21 = vpop.f32.mrf.mxu0 }
 0x3a4   :  { %6356 = vmatpush3.msra.mxu1 %v4684_v44  ;;  %6313 = vmatprep.subr.mxu0 %v4667_v63 }
 0x3a5   :  { %6357 = vmatprep.subr.mxu1 %v4699_v37  ;;  %6314 = vmatpush3.msra.mxu0 %v4651_v5  ;;  %v5927_v49 = vpop.f32.mrf.mxu1  ;;  %v5884_v41 = vpop.f32.mrf.mxu0 }
 0x3a6   :  { %6358 = vmatpush3.msra.mxu1 %v4683_v26  ;;  %6315 = vmatprep.subr.mxu0 %v4666_v24  ;;  %v5885_v25 = vadd.f32 %v5884_v41, %v5883_v21 }
 0x3a7   :  { %6359 = vmatprep.subr.mxu1 %v4698_v39  ;;  %6316 = vmatpush3.msra.mxu0 %v4650_v29  ;;  %v5928_v45 = vpop.f32.mrf.mxu1 }
 0x3a8   :  { %6360 = vmatpush3.msra.mxu1 %v4682_v46  ;;  %6317 = vmatprep.subr.mxu0 %v4665_v22  ;;  %v5929_v4 = vadd.f32 %v5928_v45, %v5927_v49 }
 0x3a9   :  { %6361 = vmatprep.subr.mxu1 %v4697_v23  ;;  %6318 = vmatpush3.msra.mxu0 %v4649_v54 }
 0x3aa   :  { %6362 = vmatpush3.msra.mxu1 %v4681_v56  ;;  %6319 = vmatprep.subr.mxu0 %v4664_v36  ;;  %v8764_v53 = vadd.f32 %v5929_v4, %v5885_v25 }
 0x3ab   :  { %6363 = vmatprep.subr.mxu1 %v4696_v31  ;;  %6320 = vmatpush3.msra.mxu0 %v4648_v10 }
 0x3ac   :  { %6364 = vmatpush3.msra.mxu1 %v4680_v32  ;;  %6321 = vmatprep.subr.mxu0 %v4663_v30 }
 0x3ad   :  { %6365 = vmatprep.subr.mxu1 %v4695_v11  ;;  %6322 = vmatpush3.msra.mxu0 %v4647_v47  ;;  %v5886_v48 = vpop.f32.mrf.mxu0  ;;  %v5930_v40 = vpop.f32.mrf.mxu1 }
 0x3ae   :  { %6366 = vmatpush3.msra.mxu1 %v4679_v58  ;;  %5266 = vmatmul.mubr.f32.vlgmr.msra.gmra.mxu0 %v4779_v13 }
 0x3af   :  { %5351 = vmatmul.mubr.f32.vlgmr.msra.gmra.mxu1 %v4781_v28  ;;  %5270 = vmatprep.mubr.f32.mxu0 %v4852_v60  ;;  %v5887_v50 = vpop.f32.mrf.mxu0  ;;  %v5931_v7 = vpop.f32.mrf.mxu1  ;;  %v4994_v28 = vrot.slane %v9123_v43, %v7924_v61 }
 0x3b0   :  { %5355 = vmatprep.mubr.f32.mxu1 %v4854_v12  ;;  %v5888_v60 = vadd.f32 %v5887_v50, %v5886_v48  ;;  %v5932_v59 = vadd.f32 %v5931_v7, %v5930_v40  ;;  %v4923_v12 = vcombine.low %v4901_v52, %v4915_v19 }
 0x3b1   :  { %v4998_v33 = vcombine.high %v4980_v1, %v4994_v28  ;;  %v4997_v34 = vcombine.low %v4980_v1, %v4994_v28 }
 0x3b2   :  { %5271 = vmatmul.mubr.f32.gmra.mxu0 %v9122_v8  ;;  %v8791_v38 = vadd.f32 %v5932_v59, %v5888_v60 }
 0x3b3   :  { %5356 = vmatmul.mubr.f32.gmra.mxu1 %v9124_v55  ;;  %5275 = vmatprep.mubr.f32.mxu0 %v4924_v27 }
 0x3b4   :  { %5360 = vmatprep.mubr.f32.mxu1 %v4926_v16 }
 0x3b6   :  { %5276 = vmatmul.mubr.f32.gmra.mxu0 %v4923_v12 }
 0x3b7   :  { %5361 = vmatmul.mubr.f32.gmra.mxu1 %v4925_v51  ;;  %5280 = vmatprep.mubr.f32.mxu0 %v9125_v57  ;;  %v5889_v61 = vpop.f32.mrf.mxu0  ;;  %v5933_v9 = vpop.f32.mrf.mxu1 }
 0x3b8   :  { %5365 = vmatprep.mubr.f32.mxu1 %v4998_v33 }
 0x3b9   :  { %v5890_v6 = vpop.f32.mrf.mxu0  ;;  %v5934_v3 = vpop.f32.mrf.mxu1 }
 0x3ba   :  { %5281 = vmatmul.mubr.f32.gmra.mxu0 %v9126_v2  ;;  %v5891_v17 = vadd.f32 %v5890_v6, %v5889_v61  ;;  %v5935_v15 = vadd.f32 %v5934_v3, %v5933_v9 }
 0x3bb   :  { %5366 = vmatmul.mubr.f32.gmra.mxu1 %v4997_v34 }
 0x3bc   :  { %v8799_v35 = vadd.f32 %v5935_v15, %v5891_v17 }
 0x3be   :  { %v5892_v14 = vpop.f32.mrf.mxu0  ;;  %v5936_v62 = vpop.f32.mrf.mxu1 }
 0x3c0   :  { %v5893_v44 = vpop.f32.mrf.mxu0  ;;  %v5937_v37 = vpop.f32.mrf.mxu1 }
 0x3c1   :  { %v5894_v63 = vadd.f32 %v5893_v44, %v5892_v14  ;;  %v5938_v5 = vadd.f32 %v5937_v37, %v5936_v62 }
 0x3c3   :  { %v8801_v26 = vadd.f32 %v5938_v5, %v5894_v63 }
 0x3ce   :  { %v5971_v24 = vpop.f32.mrf.mxu0 }
 0x3cf   :  { %v6015_v39 = vpop.f32.mrf.mxu1 }
 0x3d0   :  { %v5972_v29 = vpop.f32.mrf.mxu0 }
 0x3d1   :  { %v6016_v42 = vpop.f32.mrf.mxu1  ;;  %v5973_v44 = vadd.f32 %v5972_v29, %v5971_v24 }
 0x3d4   :  { %v5974_v18 = vpop.f32.mrf.mxu0 }
 0x3d5   :  { %v6018_v46 = vpop.f32.mrf.mxu1 }
 0x3d6   :  { %v5975_v22 = vpop.f32.mrf.mxu0 }
 0x3d7   :  { %v6019_v21 = vpop.f32.mrf.mxu1  ;;  %v5976_v5 = vadd.f32 %v5975_v22, %v5974_v18 }
 0x3da   :  { %v5977_v23 = vpop.f32.mrf.mxu0 }
 0x3db   :  { %v8803_v54 = vpop.f32.mrf.mxu1 }
 0x3dc   :  { %v5978_v56 = vpop.f32.mrf.mxu0 }
 0x3dd   :  { %v8805_v36 = vpop.f32.mrf.mxu1 }
 0x3e0   :  { %v5980_v49 = vpop.f32.mrf.mxu0 }
 0x3e1   :  { %v8807_v41 = vpop.f32.mrf.mxu1 }
 0x3e2   :  { %v5981_v31 = vpop.f32.mrf.mxu0 }
 0x3e3   :  { %v8809_v10 = vpop.f32.mrf.mxu1  ;;  %v5982_v29 = vadd.f32 %v5981_v31, %v5980_v49 }
 0x3f6   :  { %v6059_v25 = vpop.f32.mrf.mxu0 }
 0x3f7   :  { %v6103_v32 = vpop.f32.mrf.mxu1 }
 0x3f8   :  { %v6060_v30 = vpop.f32.mrf.mxu0 }
 0x3f9   :  { %v6104_v45 = vpop.f32.mrf.mxu1 }
 0x3fc   :  { %v6062_v11 = vpop.f32.mrf.mxu0 }
 0x3fd   :  { %v8811_v47 = vpop.f32.mrf.mxu1 }
 0x3fe   :  { %v6063_v4 = vpop.f32.mrf.mxu0 }
 0x3ff   :  { %v8813_v58 = vpop.f32.mrf.mxu1 }
 0x400   :  { %v6108_v49 = vadd.f32 %v8813_v58, %v8811_v47 }
 0x402   :  { %v8815_v13 = vpop.f32.mrf.mxu0 }
 0x403   :  { %v8817_v52 = vpop.f32.mrf.mxu1 }
 0x404   :  { %v6066_v19 = vpop.f32.mrf.mxu0 }
 0x405   :  { %v8819_v20 = vpop.f32.mrf.mxu1 }
 0x406   :  { %9127 = vst [vmem:[#allocation37_spill] sm:$0xff] %v8819_v20 }
 0x408   :  { %v8821_v0 = vpop.f32.mrf.mxu0 }
 0x409   :  { %v8823_v48 = vpop.f32.mrf.mxu1 }
 0x40a   :  { %9128 = vst [vmem:[#allocation47_spill] sm:$0xff] %v8823_v48  ;;  %v8825_v40 = vpop.f32.mrf.mxu0  ;;  %v6020_v48 = vadd.f32 %v6019_v21, %v6018_v46  ;;  %v6026_v46 = vadd.f32 %v8809_v10, %v8807_v41 }
 0x40b   :  { %v8827_v27 = vpop.f32.mrf.mxu1 }
 0x40c   :  { %9129 = vst [vmem:[#allocation26_spill] sm:$0xff] %v8827_v27 }
 0x41e   :  { %v6147_v16 = vpop.f32.mrf.mxu0 }
 0x41f   :  { %v8829_v50 = vpop.f32.mrf.mxu1 }
 0x420   :  { %v6148_v7 = vpop.f32.mrf.mxu0 }
 0x421   :  { %v8831_v8 = vpop.f32.mrf.mxu1 }
 0x422   :  { %v6193_v47 = vadd.f32 %v8831_v8, %v8829_v50 }
 0x424   :  { %v6150_v1 = vpop.f32.mrf.mxu0 }
 0x425   :  { %v8833_v43 = vpop.f32.mrf.mxu1 }
 0x426   :  { %9130 = vst [vmem:[#allocation49_spill] sm:$0xff] %v8833_v43  ;;  %v6151_v28 = vpop.f32.mrf.mxu0  ;;  %v6064_v43 = vadd.f32 %v6063_v4, %v6062_v11 }
 0x427   :  { %v8835_v60 = vpop.f32.mrf.mxu1 }
 0x428   :  { %9131 = vst [vmem:[#allocation50_spill] sm:$0xff] %v8835_v60  ;;  %v5979_v60 = vadd.f32 %v5978_v56, %v5977_v23 }
 0x42a   :  { %v8837_v59 = vpop.f32.mrf.mxu0  ;;  %v3829_v18 = vadd.f32 %v5979_v60, %v8799_v35  ;;  %v6152_v35 = vadd.f32 %v6151_v28, %v6150_v1 }
 0x42b   :  { %9132 = vst [vmem:[#allocation15_spill] sm:$0xff] %v8837_v59  ;;  %v8839_v55 = vpop.f32.mrf.mxu1 }
 0x42c   :  { %9133 = vst [vmem:[#allocation16_spill] sm:$0xff] %v8839_v55  ;;  %v8841_v12 = vpop.f32.mrf.mxu0 }
 0x42d   :  { %9134 = vst [vmem:[#allocation23_spill] sm:$0xff] %v8841_v12  ;;  %v8843_v51 = vpop.f32.mrf.mxu1 }
 0x42e   :  { %9135 = vst [vmem:[#allocation24_spill] sm:$0xff] %v8843_v51  ;;  %v3819_v51 = vadd.f32 %v5973_v44, %v8764_v53  ;;  %v6023_v53 = vadd.f32 %v8805_v36, %v8803_v54  ;;  %v6067_v54 = vadd.f32 %v6066_v19, %v8815_v13  ;;  %v9140_v13 = vld [vmem:[#allocation37_spill] sm:$0xff]  ;;  %v9146_v44 = vld [vmem:[#allocation26_spill] sm:$0xff] }
 0x42f   :  { %v6111_v19 = vadd.f32 %v9140_v13, %v8817_v52 }
 0x430   :  { %v8845_v33 = vpop.f32.mrf.mxu0 }
 0x431   :  { %9136 = vst [vmem:[#allocation30_spill] sm:$0xff] %v8845_v33  ;;  %v8847_v57 = vpop.f32.mrf.mxu1  ;;  %v6017_v33 = vadd.f32 %v6016_v42, %v6015_v39  ;;  %v6105_v39 = vadd.f32 %v6104_v45, %v6103_v32  ;;  %v3914_v32 = vadd.f32 %v6023_v53, %v3829_v18 }
 0x432   :  { %9137 = vst [vmem:[#allocation31_spill] sm:$0xff] %v8847_v57  ;;  %v8849_v61 = vpop.f32.mrf.mxu0 }
 0x433   :  { %9138 = vst [vmem:[#allocation33_spill] sm:$0xff] %v8849_v61  ;;  %v8851_v9 = vpop.f32.mrf.mxu1  ;;  %v3824_v61 = vadd.f32 %v5976_v5, %v8791_v38  ;;  %v3904_v27 = vadd.f32 %v6017_v33, %v3819_v51  ;;  %v6149_v38 = vadd.f32 %v6148_v7, %v6147_v16  ;;  %v9141_v33 = vld [vmem:[#allocation15_spill] sm:$0xff] }
 0x434   :  { %9139 = vst [vmem:[#allocation42_spill] sm:$0xff] %v8851_v9  ;;  %v6061_v9 = vadd.f32 %v6060_v30, %v6059_v25  ;;  %v3834_v25 = vadd.f32 %v5982_v29, %v8801_v26  ;;  %v4319_v26 = vadd.f32 %v6067_v54, %v3914_v32 }
 0x435   :  { %v3909_v24 = vadd.f32 %v6020_v48, %v3824_v61  ;;  %v9142_v61 = vld [vmem:[#allocation23_spill] sm:$0xff]  ;;  %v9150_v32 = vld [vmem:[#allocation24_spill] sm:$0xff] }
 0x436   :  { %v4309_v20 = vadd.f32 %v6061_v9, %v3904_v27  ;;  %v3919_v7 = vadd.f32 %v6026_v46, %v3834_v25  ;;  %v6155_v9 = vadd.f32 %v9142_v61, %v9141_v33 }
 0x437   :  { %v4314_v42 = vadd.f32 %v6064_v43, %v3909_v24  ;;  %v5562_v24 = vld [vmem:[#allocation8] ss:$0 sm:$0xff] }
 0x438   :  { %v4394_v30 = vadd.f32 %v6105_v39, %v4309_v20  ;;  %v6070_v20 = vadd.f32 %v8825_v40, %v8821_v0  ;;  %v9144_v0 = vld [vmem:[#allocation50_spill] sm:$0xff] }
 0x439   :  { %v4399_v45 = vadd.f32 %v6108_v49, %v4314_v42 }
 0x43a   :  { %v4479_v11 = vadd.f32 %v6149_v38, %v4394_v30  ;;  %v4324_v52 = vadd.f32 %v6070_v20, %v3919_v7  ;;  %v9148_v42 = vld [vmem:[#allocation33_spill] sm:$0xff]  ;;  %v9151_v20 = vld [vmem:[#allocation31_spill] sm:$0xff] }
 0x43b   :  { %v4484_v1 = vadd.f32 %v6152_v35, %v4399_v45 }
 0x43c   :  { %v4564_v51 = vadd.f32 %v6193_v47, %v4479_v11  ;;  %v9152_v47 = vld [vmem:[#allocation42_spill] sm:$0xff] }
 0x446   :  { %v6235_v34 = vpop.f32.mrf.mxu0 }
 0x447   :  { %v6279_v2 = vpop.f32.mrf.mxu1 }
 0x448   :  { %v6236_v6 = vpop.f32.mrf.mxu0 }
 0x449   :  { %v6280_v3 = vpop.f32.mrf.mxu1  ;;  %v6237_v21 = vadd.f32 %v6236_v6, %v6235_v34 }
 0x44a   :  { %v6281_v23 = vadd.f32 %v6280_v3, %v6279_v2  ;;  %v9143_v3 = vld [vmem:[#allocation49_spill] sm:$0xff] }
 0x44b   :  { %v6196_v40 = vadd.f32 %v9144_v0, %v9143_v3 }
 0x44c   :  { %v6238_v17 = vpop.f32.mrf.mxu0  ;;  %v5183_v48 = vadd.f32 %v6281_v23, %v6237_v21 }
 0x44d   :  { %v6282_v15 = vpop.f32.mrf.mxu1  ;;  %v4569_v53 = vadd.f32 %v6196_v40, %v4484_v1 }
 0x44e   :  { %v6239_v14 = vpop.f32.mrf.mxu0 }
 0x44f   :  { %v6283_v62 = vpop.f32.mrf.mxu1  ;;  %v6240_v41 = vadd.f32 %v6239_v14, %v6238_v17  ;;  %v4404_v14 = vadd.f32 %v6111_v19, %v4319_v26 }
 0x450   :  { %v6284_v10 = vadd.f32 %v6283_v62, %v6282_v15  ;;  %v9145_v62 = vld [vmem:[#allocation47_spill] sm:$0xff] }
 0x451   :  { %v6114_v5 = vadd.f32 %v9146_v44, %v9145_v62 }
 0x452   :  { %v6241_v63 = vpop.f32.mrf.mxu0  ;;  %v5188_v17 = vadd.f32 %v6284_v10, %v6240_v41 }
 0x453   :  { %v6285_v37 = vpop.f32.mrf.mxu1  ;;  %v4409_v35 = vadd.f32 %v6114_v5, %v4324_v52 }
 0x454   :  { %v6242_v55 = vpop.f32.mrf.mxu0 }
 0x455   :  { %v6286_v57 = vpop.f32.mrf.mxu1  ;;  %v6243_v34 = vadd.f32 %v6242_v55, %v6241_v63  ;;  %v4489_v63 = vadd.f32 %v6155_v9, %v4404_v14 }
 0x456   :  { %v6287_v2 = vadd.f32 %v6286_v57, %v6285_v37  ;;  %v9147_v37 = vld [vmem:[#allocation30_spill] sm:$0xff] }
 0x457   :  { %v6158_v38 = vadd.f32 %v9148_v42, %v9147_v37 }
 0x458   :  { %v8855_v12 = vpop.f32.mrf.mxu0  ;;  %v5193_v46 = vadd.f32 %v6287_v2, %v6243_v34 }
 0x459   :  { %v8857_v59 = vpop.f32.mrf.mxu1 }
 0x45a   :  { %v6245_v22 = vpop.f32.mrf.mxu0 }
 0x45b   :  { %v6289_v56 = vpop.f32.mrf.mxu1  ;;  %v6246_v21 = vadd.f32 %v6245_v22, %v8855_v12 }
 0x45c   :  { %v6290_v25 = vadd.f32 %v6289_v56, %v8857_v59 }
 0x45e   :  { %v5198_v22 = vadd.f32 %v6290_v25, %v6246_v21 }
 0x46e   :  { %v6323_v36 = vpop.f32.mrf.mxu0 }
 0x46f   :  { %v6367_v31 = vpop.f32.mrf.mxu1 }
 0x470   :  { %v6324_v4 = vpop.f32.mrf.mxu0 }
 0x471   :  { %v6325_v27 = vadd.f32 %v6324_v4, %v6323_v36  ;;  %v6368_v16 = vpop.f32.mrf.mxu1 }
 0x472   :  { %v6326_v58 = vpop.f32.mrf.mxu0  ;;  %v6369_v28 = vadd.f32 %v6368_v16, %v6367_v31  ;;  %v9149_v31 = vld [vmem:[#allocation16_spill] sm:$0xff]  ;;  %v4494_v16 = vadd.f32 %v6158_v38, %v4409_v35 }
 0x473   :  { %v5268_v43 = vadd.f32 %v6325_v27, %v5183_v48  ;;  %v6370_v60 = vpop.f32.mrf.mxu1  ;;  %v6199_v45 = vadd.f32 %v9150_v32, %v9149_v31 }
 0x474   :  { %v6327_v6 = vpop.f32.mrf.mxu0 }
 0x475   :  { %v5353_v50 = vadd.f32 %v6369_v28, %v5268_v43  ;;  %v6328_v8 = vadd.f32 %v6327_v6, %v6326_v58  ;;  %v6371_v15 = vpop.f32.mrf.mxu1  ;;  %v4574_v27 = vadd.f32 %v6199_v45, %v4489_v63  ;;  %v6202_v58 = vadd.f32 %v9152_v47, %v9151_v20 }
 0x476   :  { %v6329_v29 = vpop.f32.mrf.mxu0  ;;  %v6372_v55 = vadd.f32 %v6371_v15, %v6370_v60 }
 0x477   :  { %v5371_v18 = vadd.f32 %v5353_v50, %v4564_v51  ;;  %v5273_v39 = vadd.f32 %v6328_v8, %v5188_v17  ;;  %v6373_v57 = vpop.f32.mrf.mxu1  ;;  %v4579_v43 = vadd.f32 %v6202_v58, %v4494_v16 }
 0x478   :  { %v6330_v23 = vpop.f32.mrf.mxu0 }
 0x479   :  { %v5382_v30 = vadd.f32 %v5562_v24, %v5371_v18  ;;  %v5358_v49 = vadd.f32 %v6372_v55, %v5273_v39  ;;  %v6331_v54 = vadd.f32 %v6330_v23, %v6329_v29  ;;  %v6374_v36 = vpop.f32.mrf.mxu1 }
 0x47a   :  { %v6332_v11 = vpop.f32.mrf.mxu0  ;;  %v6375_v41 = vadd.f32 %v6374_v36, %v6373_v57 }
 0x47b   :  { %5386 = vst [vmem:[#allocation10] sm:$0xff] %v5382_v30  ;;  %v5372_v4 = vadd.f32 %v5358_v49, %v4569_v53  ;;  %v5278_v48 = vadd.f32 %v6331_v54, %v5193_v46  ;;  %v6376_v10 = vpop.f32.mrf.mxu1 }
 0x47c   :  { %v6333_v12 = vpop.f32.mrf.mxu0 }
 0x47d   :  { %v5383_v7 = vadd.f32 %v5562_v24, %v5372_v4  ;;  %v5363_v59 = vadd.f32 %v6375_v41, %v5278_v48  ;;  %v6334_v56 = vadd.f32 %v6333_v12, %v6332_v11  ;;  %v6377_v26 = vpop.f32.mrf.mxu1 }
 0x47e   :  { %v6378_v1 = vadd.f32 %v6377_v26, %v6376_v10 }
 0x47f   :  { %5387 = vst [vmem:[#allocation10 + $0x8] sm:$0xff] %v5383_v7  ;;  %v5373_v13 = vadd.f32 %v5363_v59, %v4574_v27  ;;  %v5283_v19 = vadd.f32 %v6334_v56, %v5198_v22 }
 0x481   :  { %v5384_v28 = vadd.f32 %v5562_v24, %v5373_v13  ;;  %v5368_v60 = vadd.f32 %v6378_v1, %v5283_v19 }
 0x483   :  { %5388 = vst [vmem:[#allocation10 + $0x10] sm:$0xff] %v5384_v28  ;;  %v5374_v51 = vadd.f32 %v5368_v60, %v4579_v43 }
 0x485   :  { %v5385_v33 = vadd.f32 %v5562_v24, %v5374_v51 }
 0x487   :  { %5389 = vst [vmem:[#allocation10 + $0x18] sm:$0xff] %v5385_v33 }
 0x488   :  { %6988 = shalt.err (!%p6985_p10)
}
 0x489   :  { %5401 = dma.vmem_to_hbm [thread:$0]  %s5396_s18, 512, %s8900_s6, [#allocation4], %s7007_s30, %s7007_s30, %s7008_s7  }
 0x48a   :  { %7003 = dma.done.wait [#allocation4], 512  }
 0x48b   :  { %7004 = vsyncadd [#allocation4], 4294966784 }
 0x48c   :  { %5405 = vsyncpa [#allocation3], 1 }
 0x48d   :  { %5406 = vsyncpa [#allocation6], 1 }
 0x48e   :  { %5407 = vsyncpa [#allocation9], 1 }
 0x48f   :  { %5408 = vsyncpa [#allocation4], 1 }

</bundles_post_ra>
